<compile_context>
chip_gen: v7x
topology: tpu7x:2x2x1
jax: 0.10.0
libtpu: 0.0.40
codegen_flags: <defaults>
</compile_context>

<pallas_src>
import numpy as np
import jax
import jax.numpy as jnp
from jax import lax
from jax.experimental import pallas as pl
from jax.experimental.pallas import tpu as pltpu

EMB_DIM = 50
HIDDEN = 128
NUM_CLASSES = 5
OUT_PAD = 128          # lane-dense padded classifier width


def emoji_lstm_kernel(idx_ref, ptab_ref, whh0_ref, wih1_ref, whh1_ref, b1_ref,
                      wl_ref, bl_ref, out_ref, xproj_ref):
    # Static sizes recovered from ref shapes.
    Bp = out_ref.shape[0]                 # padded batch (multiple of 8)
    T = xproj_ref.shape[0]                # timesteps
    B = idx_ref.shape[0] // T             # real batch rows carried in SMEM indices
    H = HIDDEN

    # ---- layer-0 input projection via table gather (no matmul) ----------------
    # ptab = embedding @ W_ih0 + b0 was precomputed offline; here we only gather
    # the B*T needed rows. Padded batch rows stay zero (rows are independent and
    # sliced off in the wrapper).
    xproj_ref[...] = jnp.zeros_like(xproj_ref)
    for b in range(B):                    # static tiny loops: B*T = 16 row copies
        for t in range(T):
            tok = idx_ref[b * T + t]                              # SMEM scalar
            xproj_ref[t, pl.ds(b, 1), :] = ptab_ref[pl.ds(tok, 1), :]

    whh0 = whh0_ref[...]                                  # (H, 4H)  gates [i,f,o,g]
    wih1 = wih1_ref[...]                                  # (H, 4H)
    whh1 = whh1_ref[...]                                  # (H, 4H)
    b1 = jnp.broadcast_to(b1_ref[...], (Bp, 4 * H))       # broadcast once, not per-step

    def activations(gates, c):
        # gate order [i, f, o, g]: one contiguous "sigmoid" slab + one tanh slab.
        # sigmoid(x) = 0.5*tanh(0.5*x) + 0.5 -> single EUP pass (exact identity).
        s = 0.5 * jnp.tanh(0.5 * gates[:, :3 * H]) + 0.5  # (Bp, 3H)
        g = jnp.tanh(gates[:, 3 * H:])                    # (Bp, H)
        i = s[:, :H]
        f = s[:, H:2 * H]
        o = s[:, 2 * H:3 * H]
        c_new = f * c + i * g
        h_new = o * jnp.tanh(c_new)
        return h_new, c_new

    def step(t, carry):
        h0, c0, h1, c1 = carry
        # h1 @ W_hh1 depends only on the *previous* step's h1 -> issue first so it
        # overlaps layer-0's matmul + activations instead of extending the chain.
        r1 = jnp.dot(h1, whh1, preferred_element_type=jnp.float32)
        # layer 0: recurrent matmul only (input projection pre-gathered).
        g0 = xproj_ref[t] + jnp.dot(h0, whh0, preferred_element_type=jnp.float32)
        h0, c0 = activations(g0, c0)
        # layer 1: only the h0_new-dependent matmul remains on the critical path.
        g1 = jnp.dot(h0, wih1, preferred_element_type=jnp.float32) + r1 + b1
        h1, c1 = activations(g1, c1)
        return (h0, c0, h1, c1)

    zeros = jnp.zeros((Bp, H), jnp.float32)
    # T=8 static; full unroll gives the LLO scheduler the whole chain.
    # (If bundle dumps ever show vreg spills, drop to unroll=2 or 4.)
    _, _, h1, _ = lax.fori_loop(0, T, step, (zeros, zeros, zeros, zeros),
                                unroll=True)

    # ReLU on the sequence output then take t=T-1  ==  ReLU on last hidden state.
    h_last = jnp.maximum(h1, 0.0)
    out_ref[...] = (jnp.dot(h_last, wl_ref[...], preferred_element_type=jnp.float32)
                    + bl_ref[...])                        # (Bp, 128) lane-dense store


def prepare_kernel_params(params):
    """One-time weight layout prep (gate reorder, transposes, table pre-projection)."""
    def reorder(w):
        # PyTorch gate order [i, f, g, o] along 4H -> kernel order [i, f, o, g].
        i, f, g, o = jnp.split(w, 4, axis=0)
        return jnp.concatenate([i, f, o, g], axis=0)

    wih0 = reorder(params["w_ih0"]).T                                   # (E, 4H)
    b0 = reorder(params["b_ih0"] + params["b_hh0"]).reshape(1, -1)      # (1, 4H)
    # Pre-project the embedding table through layer-0's input weights (+ folded
    # bias): the kernel then just gathers rows, no K=50 matmul per forward call.
    ptab = params["embedding"].astype(jnp.float32) @ wih0 + b0          # (vocab, 4H)

    whh0 = reorder(params["w_hh0"]).T                                   # (H, 4H)
    wih1 = reorder(params["w_ih1"]).T                                   # (H, 4H)
    whh1 = reorder(params["w_hh1"]).T                                   # (H, 4H)
    b1 = reorder(params["b_ih1"] + params["b_hh1"]).reshape(1, -1)      # (1, 4H)

    # Pad the classifier to 128 output lanes (zero columns) for an unmasked store.
    wl = jnp.zeros((HIDDEN, OUT_PAD), jnp.float32).at[:, :NUM_CLASSES].set(
        params["w_lin"].T)
    bl = jnp.zeros((1, OUT_PAD), jnp.float32).at[:, :NUM_CLASSES].set(
        params["b_lin"])

    return (ptab, whh0, wih1, whh1, b1, wl, bl)


@jax.jit
def emoji_lstm_forward(x_idx, kparams):
    """Forward pass: token indices -> SMEM, projected table + weights -> VMEM."""
    B, T = x_idx.shape
    Bp = ((B + 7) // 8) * 8                               # pad batch to sublane tile
    ptab, whh0, wih1, whh1, b1, wl, bl = kparams

    idx_flat = x_idx.reshape(B * T).astype(jnp.int32)     # 1-D SMEM scalar table

    smem = pl.BlockSpec(memory_space=pltpu.MemorySpace.SMEM)
    vmem = pl.BlockSpec(memory_space=pltpu.MemorySpace.VMEM)

    out_pad = pl.pallas_call(
        emoji_lstm_kernel,
        out_shape=jax.ShapeDtypeStruct((Bp, OUT_PAD), jnp.float32),
        in_specs=[smem, vmem, vmem, vmem, vmem, vmem, vmem, vmem],
        out_specs=vmem,
        scratch_shapes=[pltpu.VMEM((T, Bp, 4 * HIDDEN), jnp.float32)],
    )(idx_flat, ptab, whh0, wih1, whh1, b1, wl, bl)

    return out_pad[:B, :NUM_CLASSES]


def reference_forward(x_idx, params):
    """Pure-JAX reference (PyTorch semantics) for correctness check."""
    emb = params["embedding"][x_idx].astype(jnp.float32)  # (B, T, E)
    B, T, _ = emb.shape
    H = HIDDEN

    def cell(x_t, h, c, wih, whh, b):
        g = x_t @ wih.T + h @ whh.T + b
        i = jax.nn.sigmoid(g[:, :H])
        f = jax.nn.sigmoid(g[:, H:2 * H])
        gg = jnp.tanh(g[:, 2 * H:3 * H])
        o = jax.nn.sigmoid(g[:, 3 * H:])
        c = f * c + i * gg
        h = o * jnp.tanh(c)
        return h, c

    h0 = c0 = h1 = c1 = jnp.zeros((B, H), jnp.float32)
    b0 = params["b_ih0"] + params["b_hh0"]
    b1 = params["b_ih1"] + params["b_hh1"]
    for t in range(T):
        x_t = emb[:, t, :]
        h0, c0 = cell(x_t, h0, c0, params["w_ih0"], params["w_hh0"], b0)
        h1, c1 = cell(h0, h1, c1, params["w_ih1"], params["w_hh1"], b1)
    h = jnp.maximum(h1, 0.0)
    return h @ params["w_lin"].T + params["b_lin"]


def make_params(key, vocab_len):
    """Deterministic synthetic parameters matching nn.Embedding/nn.LSTM/nn.Linear shapes."""
    ks = jax.random.split(key, 12)
    s = 0.1  # keep gates away from saturation
    return {
        "embedding": jax.random.normal(ks[0], (vocab_len, EMB_DIM), jnp.float32) * s,
        # LSTM layer 0 (input 50 -> hidden 128), PyTorch gate order [i, f, g, o]
        "w_ih0": jax.random.normal(ks[1], (4 * HIDDEN, EMB_DIM), jnp.float32) * s,
        "w_hh0": jax.random.normal(ks[2], (4 * HIDDEN, HIDDEN), jnp.float32) * s,
        "b_ih0": jax.random.normal(ks[3], (4 * HIDDEN,), jnp.float32) * s,
        "b_hh0": jax.random.normal(ks[4], (4 * HIDDEN,), jnp.float32) * s,
        # LSTM layer 1 (input 128 -> hidden 128)
        "w_ih1": jax.random.normal(ks[5], (4 * HIDDEN, HIDDEN), jnp.float32) * s,
        "w_hh1": jax.random.normal(ks[6], (4 * HIDDEN, HIDDEN), jnp.float32) * s,
        "b_ih1": jax.random.normal(ks[7], (4 * HIDDEN,), jnp.float32) * s,
        "b_hh1": jax.random.normal(ks[8], (4 * HIDDEN,), jnp.float32) * s,
        # Linear(128 -> 5)
        "w_lin": jax.random.normal(ks[9], (NUM_CLASSES, HIDDEN), jnp.float32) * s,
        "b_lin": jax.random.normal(ks[10], (NUM_CLASSES,), jnp.float32) * s,
    }


if __name__ == "__main__":
    key = jax.random.PRNGKey(0)
    k_params, k_idx = jax.random.split(key)

    VOCAB_LEN = 21      # tiny synthetic vocab (20 words + padding index 0)
    BATCH, SEQ = 2, 8

    params = make_params(k_params, VOCAB_LEN)
    x_idx = jax.random.randint(k_idx, (BATCH, SEQ), 0, VOCAB_LEN, dtype=jnp.int32)

    kparams = jax.tree_util.tree_map(jax.block_until_ready,
                                     prepare_kernel_params(params))

    out = jax.block_until_ready(emoji_lstm_forward(x_idx, kparams))
    ref = jax.block_until_ready(reference_forward(x_idx, params))

    assert out.shape == (BATCH, NUM_CLASSES)
    np.testing.assert_allclose(np.asarray(out), np.asarray(ref), rtol=1e-5, atol=1e-5)
    print("KERNEL_OK")
</pallas_src>

<mosaic_0001>
module attributes {stable_mosaic.version = 11 : i64} {
  func.func @emoji_lstm_kernel(%arg0: memref<16xi32, #tpu.memory_space<smem>>, %arg1: memref<21x512xf32, #tpu.memory_space<vmem>>, %arg2: memref<128x512xf32, #tpu.memory_space<vmem>>, %arg3: memref<128x512xf32, #tpu.memory_space<vmem>>, %arg4: memref<128x512xf32, #tpu.memory_space<vmem>>, %arg5: memref<1x512xf32, #tpu.memory_space<vmem>>, %arg6: memref<128x128xf32, #tpu.memory_space<vmem>>, %arg7: memref<1x128xf32, #tpu.memory_space<vmem>>, %arg8: memref<8x128xf32, #tpu.memory_space<vmem>>, %arg9: memref<8x8x512xf32, #tpu.memory_space<vmem>>) attributes {dimension_semantics = [], scalar_prefetch = 0 : i64, scratch_operands = 1 : i64, tpu.core_type = #tpu.core_type<tc>} {
    %cst = arith.constant 0.000000e+00 : f32
    %0 = vector.broadcast %cst : f32 to vector<8x8x512xf32>
    %c0 = arith.constant 0 : index
    %c0_0 = arith.constant 0 : index
    %c0_1 = arith.constant 0 : index
    %1 = vector.load %arg9[%c0, %c0_0, %c0_1] : memref<8x8x512xf32, #tpu.memory_space<vmem>>, vector<8x8x512xf32>
    tpu.vector_store %arg9[%c0, %c0_0, %c0_1], %0 {strides = array<i32>} : memref<8x8x512xf32, #tpu.memory_space<vmem>>, vector<8x8x512xf32>,
    %c0_2 = arith.constant 0 : index
    %2 = memref.load %arg0[%c0_2] : memref<16xi32, #tpu.memory_space<smem>>
    %3 = arith.index_cast %2 : i32 to index
    %c0_3 = arith.constant 0 : index
    %4 = vector.load %arg1[%3, %c0_3] : memref<21x512xf32, #tpu.memory_space<vmem>>, vector<1x512xf32>
    %c0_4 = arith.constant 0 : index
    %c0_5 = arith.constant 0 : index
    %c0_6 = arith.constant 0 : index
    %5 = vector.load %arg9[%c0_4, %c0_5, %c0_6] : memref<8x8x512xf32, #tpu.memory_space<vmem>>, vector<1x1x512xf32>
    %6 = vector.shape_cast %5 : vector<1x1x512xf32> to vector<1x512xf32>
    %7 = vector.shape_cast %4 : vector<1x512xf32> to vector<1x1x512xf32>
    tpu.vector_store %arg9[%c0_4, %c0_5, %c0_6], %7 {strides = array<i32>} : memref<8x8x512xf32, #tpu.memory_space<vmem>>, vector<1x1x512xf32>,
    %c1 = arith.constant 1 : index
    %8 = memref.load %arg0[%c1] : memref<16xi32, #tpu.memory_space<smem>>
    %9 = arith.index_cast %8 : i32 to index
    %c0_7 = arith.constant 0 : index
    %10 = vector.load %arg1[%9, %c0_7] : memref<21x512xf32, #tpu.memory_space<vmem>>, vector<1x512xf32>
    %c1_8 = arith.constant 1 : index
    %c0_9 = arith.constant 0 : index
    %c0_10 = arith.constant 0 : index
    %11 = vector.load %arg9[%c1_8, %c0_9, %c0_10] : memref<8x8x512xf32, #tpu.memory_space<vmem>>, vector<1x1x512xf32>
    %12 = vector.shape_cast %11 : vector<1x1x512xf32> to vector<1x512xf32>
    %13 = vector.shape_cast %10 : vector<1x512xf32> to vector<1x1x512xf32>
    tpu.vector_store %arg9[%c1_8, %c0_9, %c0_10], %13 {strides = array<i32>} : memref<8x8x512xf32, #tpu.memory_space<vmem>>, vector<1x1x512xf32>,
    %c2 = arith.constant 2 : index
    %14 = memref.load %arg0[%c2] : memref<16xi32, #tpu.memory_space<smem>>
    %15 = arith.index_cast %14 : i32 to index
    %c0_11 = arith.constant 0 : index
    %16 = vector.load %arg1[%15, %c0_11] : memref<21x512xf32, #tpu.memory_space<vmem>>, vector<1x512xf32>
    %c2_12 = arith.constant 2 : index
    %c0_13 = arith.constant 0 : index
    %c0_14 = arith.constant 0 : index
    %17 = vector.load %arg9[%c2_12, %c0_13, %c0_14] : memref<8x8x512xf32, #tpu.memory_space<vmem>>, vector<1x1x512xf32>
    %18 = vector.shape_cast %17 : vector<1x1x512xf32> to vector<1x512xf32>
    %19 = vector.shape_cast %16 : vector<1x512xf32> to vector<1x1x512xf32>
    tpu.vector_store %arg9[%c2_12, %c0_13, %c0_14], %19 {strides = array<i32>} : memref<8x8x512xf32, #tpu.memory_space<vmem>>, vector<1x1x512xf32>,
    %c3 = arith.constant 3 : index
    %20 = memref.load %arg0[%c3] : memref<16xi32, #tpu.memory_space<smem>>
    %21 = arith.index_cast %20 : i32 to index
    %c0_15 = arith.constant 0 : index
    %22 = vector.load %arg1[%21, %c0_15] : memref<21x512xf32, #tpu.memory_space<vmem>>, vector<1x512xf32>
    %c3_16 = arith.constant 3 : index
    %c0_17 = arith.constant 0 : index
    %c0_18 = arith.constant 0 : index
    %23 = vector.load %arg9[%c3_16, %c0_17, %c0_18] : memref<8x8x512xf32, #tpu.memory_space<vmem>>, vector<1x1x512xf32>
    %24 = vector.shape_cast %23 : vector<1x1x512xf32> to vector<1x512xf32>
    %25 = vector.shape_cast %22 : vector<1x512xf32> to vector<1x1x512xf32>
    tpu.vector_store %arg9[%c3_16, %c0_17, %c0_18], %25 {strides = array<i32>} : memref<8x8x512xf32, #tpu.memory_space<vmem>>, vector<1x1x512xf32>,
    %c4 = arith.constant 4 : index
    %26 = memref.load %arg0[%c4] : memref<16xi32, #tpu.memory_space<smem>>
    %27 = arith.index_cast %26 : i32 to index
    %c0_19 = arith.constant 0 : index
    %28 = vector.load %arg1[%27, %c0_19] : memref<21x512xf32, #tpu.memory_space<vmem>>, vector<1x512xf32>
    %c4_20 = arith.constant 4 : index
    %c0_21 = arith.constant 0 : index
    %c0_22 = arith.constant 0 : index
    %29 = vector.load %arg9[%c4_20, %c0_21, %c0_22] : memref<8x8x512xf32, #tpu.memory_space<vmem>>, vector<1x1x512xf32>
    %30 = vector.shape_cast %29 : vector<1x1x512xf32> to vector<1x512xf32>
    %31 = vector.shape_cast %28 : vector<1x512xf32> to vector<1x1x512xf32>
    tpu.vector_store %arg9[%c4_20, %c0_21, %c0_22], %31 {strides = array<i32>} : memref<8x8x512xf32, #tpu.memory_space<vmem>>, vector<1x1x512xf32>,
    %c5 = arith.constant 5 : index
    %32 = memref.load %arg0[%c5] : memref<16xi32, #tpu.memory_space<smem>>
    %33 = arith.index_cast %32 : i32 to index
    %c0_23 = arith.constant 0 : index
    %34 = vector.load %arg1[%33, %c0_23] : memref<21x512xf32, #tpu.memory_space<vmem>>, vector<1x512xf32>
    %c5_24 = arith.constant 5 : index
    %c0_25 = arith.constant 0 : index
    %c0_26 = arith.constant 0 : index
    %35 = vector.load %arg9[%c5_24, %c0_25, %c0_26] : memref<8x8x512xf32, #tpu.memory_space<vmem>>, vector<1x1x512xf32>
    %36 = vector.shape_cast %35 : vector<1x1x512xf32> to vector<1x512xf32>
    %37 = vector.shape_cast %34 : vector<1x512xf32> to vector<1x1x512xf32>
    tpu.vector_store %arg9[%c5_24, %c0_25, %c0_26], %37 {strides = array<i32>} : memref<8x8x512xf32, #tpu.memory_space<vmem>>, vector<1x1x512xf32>,
    %c6 = arith.constant 6 : index
    %38 = memref.load %arg0[%c6] : memref<16xi32, #tpu.memory_space<smem>>
    %39 = arith.index_cast %38 : i32 to index
    %c0_27 = arith.constant 0 : index
    %40 = vector.load %arg1[%39, %c0_27] : memref<21x512xf32, #tpu.memory_space<vmem>>, vector<1x512xf32>
    %c6_28 = arith.constant 6 : index
    %c0_29 = arith.constant 0 : index
    %c0_30 = arith.constant 0 : index
    %41 = vector.load %arg9[%c6_28, %c0_29, %c0_30] : memref<8x8x512xf32, #tpu.memory_space<vmem>>, vector<1x1x512xf32>
    %42 = vector.shape_cast %41 : vector<1x1x512xf32> to vector<1x512xf32>
    %43 = vector.shape_cast %40 : vector<1x512xf32> to vector<1x1x512xf32>
    tpu.vector_store %arg9[%c6_28, %c0_29, %c0_30], %43 {strides = array<i32>} : memref<8x8x512xf32, #tpu.memory_space<vmem>>, vector<1x1x512xf32>,
    %c7 = arith.constant 7 : index
    %44 = memref.load %arg0[%c7] : memref<16xi32, #tpu.memory_space<smem>>
    %45 = arith.index_cast %44 : i32 to index
    %c0_31 = arith.constant 0 : index
    %46 = vector.load %arg1[%45, %c0_31] : memref<21x512xf32, #tpu.memory_space<vmem>>, vector<1x512xf32>
    %c7_32 = arith.constant 7 : index
    %c0_33 = arith.constant 0 : index
    %c0_34 = arith.constant 0 : index
    %47 = vector.load %arg9[%c7_32, %c0_33, %c0_34] : memref<8x8x512xf32, #tpu.memory_space<vmem>>, vector<1x1x512xf32>
    %48 = vector.shape_cast %47 : vector<1x1x512xf32> to vector<1x512xf32>
    %49 = vector.shape_cast %46 : vector<1x512xf32> to vector<1x1x512xf32>
    tpu.vector_store %arg9[%c7_32, %c0_33, %c0_34], %49 {strides = array<i32>} : memref<8x8x512xf32, #tpu.memory_space<vmem>>, vector<1x1x512xf32>,
    %c8 = arith.constant 8 : index
    %50 = memref.load %arg0[%c8] : memref<16xi32, #tpu.memory_space<smem>>
    %51 = arith.index_cast %50 : i32 to index
    %c0_35 = arith.constant 0 : index
    %52 = vector.load %arg1[%51, %c0_35] : memref<21x512xf32, #tpu.memory_space<vmem>>, vector<1x512xf32>
    %c0_36 = arith.constant 0 : index
    %c1_37 = arith.constant 1 : index
    %c0_38 = arith.constant 0 : index
    %53 = vector.load %arg9[%c0_36, %c1_37, %c0_38] : memref<8x8x512xf32, #tpu.memory_space<vmem>>, vector<1x1x512xf32>
    %54 = vector.shape_cast %53 : vector<1x1x512xf32> to vector<1x512xf32>
    %55 = vector.shape_cast %52 : vector<1x512xf32> to vector<1x1x512xf32>
    tpu.vector_store %arg9[%c0_36, %c1_37, %c0_38], %55 {strides = array<i32>} : memref<8x8x512xf32, #tpu.memory_space<vmem>>, vector<1x1x512xf32>,
    %c9 = arith.constant 9 : index
    %56 = memref.load %arg0[%c9] : memref<16xi32, #tpu.memory_space<smem>>
    %57 = arith.index_cast %56 : i32 to index
    %c0_39 = arith.constant 0 : index
    %58 = vector.load %arg1[%57, %c0_39] : memref<21x512xf32, #tpu.memory_space<vmem>>, vector<1x512xf32>
    %c1_40 = arith.constant 1 : index
    %c1_41 = arith.constant 1 : index
    %c0_42 = arith.constant 0 : index
    %59 = vector.load %arg9[%c1_40, %c1_41, %c0_42] : memref<8x8x512xf32, #tpu.memory_space<vmem>>, vector<1x1x512xf32>
    %60 = vector.shape_cast %59 : vector<1x1x512xf32> to vector<1x512xf32>
    %61 = vector.shape_cast %58 : vector<1x512xf32> to vector<1x1x512xf32>
    tpu.vector_store %arg9[%c1_40, %c1_41, %c0_42], %61 {strides = array<i32>} : memref<8x8x512xf32, #tpu.memory_space<vmem>>, vector<1x1x512xf32>,
    %c10 = arith.constant 10 : index
    %62 = memref.load %arg0[%c10] : memref<16xi32, #tpu.memory_space<smem>>
    %63 = arith.index_cast %62 : i32 to index
    %c0_43 = arith.constant 0 : index
    %64 = vector.load %arg1[%63, %c0_43] : memref<21x512xf32, #tpu.memory_space<vmem>>, vector<1x512xf32>
    %c2_44 = arith.constant 2 : index
    %c1_45 = arith.constant 1 : index
    %c0_46 = arith.constant 0 : index
    %65 = vector.load %arg9[%c2_44, %c1_45, %c0_46] : memref<8x8x512xf32, #tpu.memory_space<vmem>>, vector<1x1x512xf32>
    %66 = vector.shape_cast %65 : vector<1x1x512xf32> to vector<1x512xf32>
    %67 = vector.shape_cast %64 : vector<1x512xf32> to vector<1x1x512xf32>
    tpu.vector_store %arg9[%c2_44, %c1_45, %c0_46], %67 {strides = array<i32>} : memref<8x8x512xf32, #tpu.memory_space<vmem>>, vector<1x1x512xf32>,
    %c11 = arith.constant 11 : index
    %68 = memref.load %arg0[%c11] : memref<16xi32, #tpu.memory_space<smem>>
    %69 = arith.index_cast %68 : i32 to index
    %c0_47 = arith.constant 0 : index
    %70 = vector.load %arg1[%69, %c0_47] : memref<21x512xf32, #tpu.memory_space<vmem>>, vector<1x512xf32>
    %c3_48 = arith.constant 3 : index
    %c1_49 = arith.constant 1 : index
    %c0_50 = arith.constant 0 : index
    %71 = vector.load %arg9[%c3_48, %c1_49, %c0_50] : memref<8x8x512xf32, #tpu.memory_space<vmem>>, vector<1x1x512xf32>
    %72 = vector.shape_cast %71 : vector<1x1x512xf32> to vector<1x512xf32>
    %73 = vector.shape_cast %70 : vector<1x512xf32> to vector<1x1x512xf32>
    tpu.vector_store %arg9[%c3_48, %c1_49, %c0_50], %73 {strides = array<i32>} : memref<8x8x512xf32, #tpu.memory_space<vmem>>, vector<1x1x512xf32>,
    %c12 = arith.constant 12 : index
    %74 = memref.load %arg0[%c12] : memref<16xi32, #tpu.memory_space<smem>>
    %75 = arith.index_cast %74 : i32 to index
    %c0_51 = arith.constant 0 : index
    %76 = vector.load %arg1[%75, %c0_51] : memref<21x512xf32, #tpu.memory_space<vmem>>, vector<1x512xf32>
    %c4_52 = arith.constant 4 : index
    %c1_53 = arith.constant 1 : index
    %c0_54 = arith.constant 0 : index
    %77 = vector.load %arg9[%c4_52, %c1_53, %c0_54] : memref<8x8x512xf32, #tpu.memory_space<vmem>>, vector<1x1x512xf32>
    %78 = vector.shape_cast %77 : vector<1x1x512xf32> to vector<1x512xf32>
    %79 = vector.shape_cast %76 : vector<1x512xf32> to vector<1x1x512xf32>
    tpu.vector_store %arg9[%c4_52, %c1_53, %c0_54], %79 {strides = array<i32>} : memref<8x8x512xf32, #tpu.memory_space<vmem>>, vector<1x1x512xf32>,
    %c13 = arith.constant 13 : index
    %80 = memref.load %arg0[%c13] : memref<16xi32, #tpu.memory_space<smem>>
    %81 = arith.index_cast %80 : i32 to index
    %c0_55 = arith.constant 0 : index
    %82 = vector.load %arg1[%81, %c0_55] : memref<21x512xf32, #tpu.memory_space<vmem>>, vector<1x512xf32>
    %c5_56 = arith.constant 5 : index
    %c1_57 = arith.constant 1 : index
    %c0_58 = arith.constant 0 : index
    %83 = vector.load %arg9[%c5_56, %c1_57, %c0_58] : memref<8x8x512xf32, #tpu.memory_space<vmem>>, vector<1x1x512xf32>
    %84 = vector.shape_cast %83 : vector<1x1x512xf32> to vector<1x512xf32>
    %85 = vector.shape_cast %82 : vector<1x512xf32> to vector<1x1x512xf32>
    tpu.vector_store %arg9[%c5_56, %c1_57, %c0_58], %85 {strides = array<i32>} : memref<8x8x512xf32, #tpu.memory_space<vmem>>, vector<1x1x512xf32>,
    %c14 = arith.constant 14 : index
    %86 = memref.load %arg0[%c14] : memref<16xi32, #tpu.memory_space<smem>>
    %87 = arith.index_cast %86 : i32 to index
    %c0_59 = arith.constant 0 : index
    %88 = vector.load %arg1[%87, %c0_59] : memref<21x512xf32, #tpu.memory_space<vmem>>, vector<1x512xf32>
    %c6_60 = arith.constant 6 : index
    %c1_61 = arith.constant 1 : index
    %c0_62 = arith.constant 0 : index
    %89 = vector.load %arg9[%c6_60, %c1_61, %c0_62] : memref<8x8x512xf32, #tpu.memory_space<vmem>>, vector<1x1x512xf32>
    %90 = vector.shape_cast %89 : vector<1x1x512xf32> to vector<1x512xf32>
    %91 = vector.shape_cast %88 : vector<1x512xf32> to vector<1x1x512xf32>
    tpu.vector_store %arg9[%c6_60, %c1_61, %c0_62], %91 {strides = array<i32>} : memref<8x8x512xf32, #tpu.memory_space<vmem>>, vector<1x1x512xf32>,
    %c15 = arith.constant 15 : index
    %92 = memref.load %arg0[%c15] : memref<16xi32, #tpu.memory_space<smem>>
    %93 = arith.index_cast %92 : i32 to index
    %c0_63 = arith.constant 0 : index
    %94 = vector.load %arg1[%93, %c0_63] : memref<21x512xf32, #tpu.memory_space<vmem>>, vector<1x512xf32>
    %c7_64 = arith.constant 7 : index
    %c1_65 = arith.constant 1 : index
    %c0_66 = arith.constant 0 : index
    %95 = vector.load %arg9[%c7_64, %c1_65, %c0_66] : memref<8x8x512xf32, #tpu.memory_space<vmem>>, vector<1x1x512xf32>
    %96 = vector.shape_cast %95 : vector<1x1x512xf32> to vector<1x512xf32>
    %97 = vector.shape_cast %94 : vector<1x512xf32> to vector<1x1x512xf32>
    tpu.vector_store %arg9[%c7_64, %c1_65, %c0_66], %97 {strides = array<i32>} : memref<8x8x512xf32, #tpu.memory_space<vmem>>, vector<1x1x512xf32>,
    %c0_67 = arith.constant 0 : index
    %c0_68 = arith.constant 0 : index
    %98 = vector.load %arg2[%c0_67, %c0_68] : memref<128x512xf32, #tpu.memory_space<vmem>>, vector<128x512xf32>
    %c0_69 = arith.constant 0 : index
    %c0_70 = arith.constant 0 : index
    %99 = vector.load %arg3[%c0_69, %c0_70] : memref<128x512xf32, #tpu.memory_space<vmem>>, vector<128x512xf32>
    %c0_71 = arith.constant 0 : index
    %c0_72 = arith.constant 0 : index
    %100 = vector.load %arg4[%c0_71, %c0_72] : memref<128x512xf32, #tpu.memory_space<vmem>>, vector<128x512xf32>
    %c0_73 = arith.constant 0 : index
    %c0_74 = arith.constant 0 : index
    %101 = vector.load %arg5[%c0_73, %c0_74] : memref<1x512xf32, #tpu.memory_space<vmem>>, vector<1x512xf32>
    %102 = vector.shape_cast %101 : vector<1x512xf32> to vector<1x512xf32>
    %103 = vector.broadcast %102 : vector<1x512xf32> to vector<8x512xf32>
    %cst_75 = arith.constant 0.000000e+00 : f32
    %104 = vector.broadcast %cst_75 : f32 to vector<8x128xf32>
    %c0_i32 = arith.constant 0 : i32
    %cst_76 = arith.constant dense<0.000000e+00> : vector<8x512xf32>
    %105 = tpu.matmul %104, %100, %cst_76 {dimension_numbers = #tpu.dot_dimension_numbers<[1], [0], [0], [1], [0, 0, 1, 1], [], []>} : vector<8x128xf32>, vector<128x512xf32>, vector<8x512xf32> -> vector<8x512xf32>
    %106 = arith.index_cast %c0_i32 : i32 to index
    %c0_77 = arith.constant 0 : index
    %c0_78 = arith.constant 0 : index
    %107 = vector.load %arg9[%106, %c0_77, %c0_78] : memref<8x8x512xf32, #tpu.memory_space<vmem>>, vector<1x8x512xf32>
    %108 = vector.shape_cast %107 : vector<1x8x512xf32> to vector<8x512xf32>
    %cst_79 = arith.constant dense<0.000000e+00> : vector<8x512xf32>
    %109 = tpu.matmul %104, %98, %cst_79 {dimension_numbers = #tpu.dot_dimension_numbers<[1], [0], [0], [1], [0, 0, 1, 1], [], []>} : vector<8x128xf32>, vector<128x512xf32>, vector<8x512xf32> -> vector<8x512xf32>
    %110 = arith.addf %108, %109 : vector<8x512xf32>
    %111 = vector.extract_strided_slice %110 {offsets = [0, 0], sizes = [8, 384], strides = [1, 1]} : vector<8x512xf32> to vector<8x384xf32>
    %cst_80 = arith.constant 5.000000e-01 : f32
    %112 = vector.broadcast %cst_80 : f32 to vector<8x384xf32>
    %113 = arith.mulf %112, %111 : vector<8x384xf32>
    %114 = math.tanh %113 : vector<8x384xf32>
    %cst_81 = arith.constant 5.000000e-01 : f32
    %115 = vector.broadcast %cst_81 : f32 to vector<8x384xf32>
    %116 = arith.mulf %115, %114 : vector<8x384xf32>
    %cst_82 = arith.constant 5.000000e-01 : f32
    %117 = vector.broadcast %cst_82 : f32 to vector<8x384xf32>
    %118 = arith.addf %116, %117 : vector<8x384xf32>
    %119 = vector.extract_strided_slice %110 {offsets = [0, 384], sizes = [8, 128], strides = [1, 1]} : vector<8x512xf32> to vector<8x128xf32>
    %120 = math.tanh %119 : vector<8x128xf32>
    %121 = vector.extract_strided_slice %118 {offsets = [0, 0], sizes = [8, 128], strides = [1, 1]} : vector<8x384xf32> to vector<8x128xf32>
    %122 = vector.extract_strided_slice %118 {offsets = [0, 128], sizes = [8, 128], strides = [1, 1]} : vector<8x384xf32> to vector<8x128xf32>
    %123 = vector.extract_strided_slice %118 {offsets = [0, 256], sizes = [8, 128], strides = [1, 1]} : vector<8x384xf32> to vector<8x128xf32>
    %124 = arith.mulf %122, %104 : vector<8x128xf32>
    %125 = arith.mulf %121, %120 : vector<8x128xf32>
    %126 = arith.addf %124, %125 : vector<8x128xf32>
    %127 = math.tanh %126 : vector<8x128xf32>
    %128 = arith.mulf %123, %127 : vector<8x128xf32>
    %cst_83 = arith.constant dense<0.000000e+00> : vector<8x512xf32>
    %129 = tpu.matmul %128, %99, %cst_83 {dimension_numbers = #tpu.dot_dimension_numbers<[1], [0], [0], [1], [0, 0, 1, 1], [], []>} : vector<8x128xf32>, vector<128x512xf32>, vector<8x512xf32> -> vector<8x512xf32>
    %130 = arith.addf %129, %105 : vector<8x512xf32>
    %131 = arith.addf %130, %103 : vector<8x512xf32>
    %132 = vector.extract_strided_slice %131 {offsets = [0, 0], sizes = [8, 384], strides = [1, 1]} : vector<8x512xf32> to vector<8x384xf32>
    %cst_84 = arith.constant 5.000000e-01 : f32
    %133 = vector.broadcast %cst_84 : f32 to vector<8x384xf32>
    %134 = arith.mulf %133, %132 : vector<8x384xf32>
    %135 = math.tanh %134 : vector<8x384xf32>
    %cst_85 = arith.constant 5.000000e-01 : f32
    %136 = vector.broadcast %cst_85 : f32 to vector<8x384xf32>
    %137 = arith.mulf %136, %135 : vector<8x384xf32>
    %cst_86 = arith.constant 5.000000e-01 : f32
    %138 = vector.broadcast %cst_86 : f32 to vector<8x384xf32>
    %139 = arith.addf %137, %138 : vector<8x384xf32>
    %140 = vector.extract_strided_slice %131 {offsets = [0, 384], sizes = [8, 128], strides = [1, 1]} : vector<8x512xf32> to vector<8x128xf32>
    %141 = math.tanh %140 : vector<8x128xf32>
    %142 = vector.extract_strided_slice %139 {offsets = [0, 0], sizes = [8, 128], strides = [1, 1]} : vector<8x384xf32> to vector<8x128xf32>
    %143 = vector.extract_strided_slice %139 {offsets = [0, 128], sizes = [8, 128], strides = [1, 1]} : vector<8x384xf32> to vector<8x128xf32>
    %144 = vector.extract_strided_slice %139 {offsets = [0, 256], sizes = [8, 128], strides = [1, 1]} : vector<8x384xf32> to vector<8x128xf32>
    %145 = arith.mulf %143, %104 : vector<8x128xf32>
    %146 = arith.mulf %142, %141 : vector<8x128xf32>
    %147 = arith.addf %145, %146 : vector<8x128xf32>
    %148 = math.tanh %147 : vector<8x128xf32>
    %149 = arith.mulf %144, %148 : vector<8x128xf32>
    %c1_i32 = arith.constant 1 : i32
    %cst_87 = arith.constant dense<0.000000e+00> : vector<8x512xf32>
    %150 = tpu.matmul %149, %100, %cst_87 {dimension_numbers = #tpu.dot_dimension_numbers<[1], [0], [0], [1], [0, 0, 1, 1], [], []>} : vector<8x128xf32>, vector<128x512xf32>, vector<8x512xf32> -> vector<8x512xf32>
    %151 = arith.index_cast %c1_i32 : i32 to index
    %c0_88 = arith.constant 0 : index
    %c0_89 = arith.constant 0 : index
    %152 = vector.load %arg9[%151, %c0_88, %c0_89] : memref<8x8x512xf32, #tpu.memory_space<vmem>>, vector<1x8x512xf32>
    %153 = vector.shape_cast %152 : vector<1x8x512xf32> to vector<8x512xf32>
    %cst_90 = arith.constant dense<0.000000e+00> : vector<8x512xf32>
    %154 = tpu.matmul %128, %98, %cst_90 {dimension_numbers = #tpu.dot_dimension_numbers<[1], [0], [0], [1], [0, 0, 1, 1], [], []>} : vector<8x128xf32>, vector<128x512xf32>, vector<8x512xf32> -> vector<8x512xf32>
    %155 = arith.addf %153, %154 : vector<8x512xf32>
    %156 = vector.extract_strided_slice %155 {offsets = [0, 0], sizes = [8, 384], strides = [1, 1]} : vector<8x512xf32> to vector<8x384xf32>
    %cst_91 = arith.constant 5.000000e-01 : f32
    %157 = vector.broadcast %cst_91 : f32 to vector<8x384xf32>
    %158 = arith.mulf %157, %156 : vector<8x384xf32>
    %159 = math.tanh %158 : vector<8x384xf32>
    %cst_92 = arith.constant 5.000000e-01 : f32
    %160 = vector.broadcast %cst_92 : f32 to vector<8x384xf32>
    %161 = arith.mulf %160, %159 : vector<8x384xf32>
    %cst_93 = arith.constant 5.000000e-01 : f32
    %162 = vector.broadcast %cst_93 : f32 to vector<8x384xf32>
    %163 = arith.addf %161, %162 : vector<8x384xf32>
    %164 = vector.extract_strided_slice %155 {offsets = [0, 384], sizes = [8, 128], strides = [1, 1]} : vector<8x512xf32> to vector<8x128xf32>
    %165 = math.tanh %164 : vector<8x128xf32>
    %166 = vector.extract_strided_slice %163 {offsets = [0, 0], sizes = [8, 128], strides = [1, 1]} : vector<8x384xf32> to vector<8x128xf32>
    %167 = vector.extract_strided_slice %163 {offsets = [0, 128], sizes = [8, 128], strides = [1, 1]} : vector<8x384xf32> to vector<8x128xf32>
    %168 = vector.extract_strided_slice %163 {offsets = [0, 256], sizes = [8, 128], strides = [1, 1]} : vector<8x384xf32> to vector<8x128xf32>
    %169 = arith.mulf %167, %126 : vector<8x128xf32>
    %170 = arith.mulf %166, %165 : vector<8x128xf32>
    %171 = arith.addf %169, %170 : vector<8x128xf32>
    %172 = math.tanh %171 : vector<8x128xf32>
    %173 = arith.mulf %168, %172 : vector<8x128xf32>
    %cst_94 = arith.constant dense<0.000000e+00> : vector<8x512xf32>
    %174 = tpu.matmul %173, %99, %cst_94 {dimension_numbers = #tpu.dot_dimension_numbers<[1], [0], [0], [1], [0, 0, 1, 1], [], []>} : vector<8x128xf32>, vector<128x512xf32>, vector<8x512xf32> -> vector<8x512xf32>
    %175 = arith.addf %174, %150 : vector<8x512xf32>
    %176 = arith.addf %175, %103 : vector<8x512xf32>
    %177 = vector.extract_strided_slice %176 {offsets = [0, 0], sizes = [8, 384], strides = [1, 1]} : vector<8x512xf32> to vector<8x384xf32>
    %cst_95 = arith.constant 5.000000e-01 : f32
    %178 = vector.broadcast %cst_95 : f32 to vector<8x384xf32>
    %179 = arith.mulf %178, %177 : vector<8x384xf32>
    %180 = math.tanh %179 : vector<8x384xf32>
    %cst_96 = arith.constant 5.000000e-01 : f32
    %181 = vector.broadcast %cst_96 : f32 to vector<8x384xf32>
    %182 = arith.mulf %181, %180 : vector<8x384xf32>
    %cst_97 = arith.constant 5.000000e-01 : f32
    %183 = vector.broadcast %cst_97 : f32 to vector<8x384xf32>
    %184 = arith.addf %182, %183 : vector<8x384xf32>
    %185 = vector.extract_strided_slice %176 {offsets = [0, 384], sizes = [8, 128], strides = [1, 1]} : vector<8x512xf32> to vector<8x128xf32>
    %186 = math.tanh %185 : vector<8x128xf32>
    %187 = vector.extract_strided_slice %184 {offsets = [0, 0], sizes = [8, 128], strides = [1, 1]} : vector<8x384xf32> to vector<8x128xf32>
    %188 = vector.extract_strided_slice %184 {offsets = [0, 128], sizes = [8, 128], strides = [1, 1]} : vector<8x384xf32> to vector<8x128xf32>
    %189 = vector.extract_strided_slice %184 {offsets = [0, 256], sizes = [8, 128], strides = [1, 1]} : vector<8x384xf32> to vector<8x128xf32>
    %190 = arith.mulf %188, %147 : vector<8x128xf32>
    %191 = arith.mulf %187, %186 : vector<8x128xf32>
    %192 = arith.addf %190, %191 : vector<8x128xf32>
    %193 = math.tanh %192 : vector<8x128xf32>
    %194 = arith.mulf %189, %193 : vector<8x128xf32>
    %c2_i32 = arith.constant 2 : i32
    %cst_98 = arith.constant dense<0.000000e+00> : vector<8x512xf32>
    %195 = tpu.matmul %194, %100, %cst_98 {dimension_numbers = #tpu.dot_dimension_numbers<[1], [0], [0], [1], [0, 0, 1, 1], [], []>} : vector<8x128xf32>, vector<128x512xf32>, vector<8x512xf32> -> vector<8x512xf32>
    %196 = arith.index_cast %c2_i32 : i32 to index
    %c0_99 = arith.constant 0 : index
    %c0_100 = arith.constant 0 : index
    %197 = vector.load %arg9[%196, %c0_99, %c0_100] : memref<8x8x512xf32, #tpu.memory_space<vmem>>, vector<1x8x512xf32>
    %198 = vector.shape_cast %197 : vector<1x8x512xf32> to vector<8x512xf32>
    %cst_101 = arith.constant dense<0.000000e+00> : vector<8x512xf32>
    %199 = tpu.matmul %173, %98, %cst_101 {dimension_numbers = #tpu.dot_dimension_numbers<[1], [0], [0], [1], [0, 0, 1, 1], [], []>} : vector<8x128xf32>, vector<128x512xf32>, vector<8x512xf32> -> vector<8x512xf32>
    %200 = arith.addf %198, %199 : vector<8x512xf32>
    %201 = vector.extract_strided_slice %200 {offsets = [0, 0], sizes = [8, 384], strides = [1, 1]} : vector<8x512xf32> to vector<8x384xf32>
    %cst_102 = arith.constant 5.000000e-01 : f32
    %202 = vector.broadcast %cst_102 : f32 to vector<8x384xf32>
    %203 = arith.mulf %202, %201 : vector<8x384xf32>
    %204 = math.tanh %203 : vector<8x384xf32>
    %cst_103 = arith.constant 5.000000e-01 : f32
    %205 = vector.broadcast %cst_103 : f32 to vector<8x384xf32>
    %206 = arith.mulf %205, %204 : vector<8x384xf32>
    %cst_104 = arith.constant 5.000000e-01 : f32
    %207 = vector.broadcast %cst_104 : f32 to vector<8x384xf32>
    %208 = arith.addf %206, %207 : vector<8x384xf32>
    %209 = vector.extract_strided_slice %200 {offsets = [0, 384], sizes = [8, 128], strides = [1, 1]} : vector<8x512xf32> to vector<8x128xf32>
    %210 = math.tanh %209 : vector<8x128xf32>
    %211 = vector.extract_strided_slice %208 {offsets = [0, 0], sizes = [8, 128], strides = [1, 1]} : vector<8x384xf32> to vector<8x128xf32>
    %212 = vector.extract_strided_slice %208 {offsets = [0, 128], sizes = [8, 128], strides = [1, 1]} : vector<8x384xf32> to vector<8x128xf32>
    %213 = vector.extract_strided_slice %208 {offsets = [0, 256], sizes = [8, 128], strides = [1, 1]} : vector<8x384xf32> to vector<8x128xf32>
    %214 = arith.mulf %212, %171 : vector<8x128xf32>
    %215 = arith.mulf %211, %210 : vector<8x128xf32>
    %216 = arith.addf %214, %215 : vector<8x128xf32>
    %217 = math.tanh %216 : vector<8x128xf32>
    %218 = arith.mulf %213, %217 : vector<8x128xf32>
    %cst_105 = arith.constant dense<0.000000e+00> : vector<8x512xf32>
    %219 = tpu.matmul %218, %99, %cst_105 {dimension_numbers = #tpu.dot_dimension_numbers<[1], [0], [0], [1], [0, 0, 1, 1], [], []>} : vector<8x128xf32>, vector<128x512xf32>, vector<8x512xf32> -> vector<8x512xf32>
    %220 = arith.addf %219, %195 : vector<8x512xf32>
    %221 = arith.addf %220, %103 : vector<8x512xf32>
    %222 = vector.extract_strided_slice %221 {offsets = [0, 0], sizes = [8, 384], strides = [1, 1]} : vector<8x512xf32> to vector<8x384xf32>
    %cst_106 = arith.constant 5.000000e-01 : f32
    %223 = vector.broadcast %cst_106 : f32 to vector<8x384xf32>
    %224 = arith.mulf %223, %222 : vector<8x384xf32>
    %225 = math.tanh %224 : vector<8x384xf32>
    %cst_107 = arith.constant 5.000000e-01 : f32
    %226 = vector.broadcast %cst_107 : f32 to vector<8x384xf32>
    %227 = arith.mulf %226, %225 : vector<8x384xf32>
    %cst_108 = arith.constant 5.000000e-01 : f32
    %228 = vector.broadcast %cst_108 : f32 to vector<8x384xf32>
    %229 = arith.addf %227, %228 : vector<8x384xf32>
    %230 = vector.extract_strided_slice %221 {offsets = [0, 384], sizes = [8, 128], strides = [1, 1]} : vector<8x512xf32> to vector<8x128xf32>
    %231 = math.tanh %230 : vector<8x128xf32>
    %232 = vector.extract_strided_slice %229 {offsets = [0, 0], sizes = [8, 128], strides = [1, 1]} : vector<8x384xf32> to vector<8x128xf32>
    %233 = vector.extract_strided_slice %229 {offsets = [0, 128], sizes = [8, 128], strides = [1, 1]} : vector<8x384xf32> to vector<8x128xf32>
    %234 = vector.extract_strided_slice %229 {offsets = [0, 256], sizes = [8, 128], strides = [1, 1]} : vector<8x384xf32> to vector<8x128xf32>
    %235 = arith.mulf %233, %192 : vector<8x128xf32>
    %236 = arith.mulf %232, %231 : vector<8x128xf32>
    %237 = arith.addf %235, %236 : vector<8x128xf32>
    %238 = math.tanh %237 : vector<8x128xf32>
    %239 = arith.mulf %234, %238 : vector<8x128xf32>
    %c3_i32 = arith.constant 3 : i32
    %cst_109 = arith.constant dense<0.000000e+00> : vector<8x512xf32>
    %240 = tpu.matmul %239, %100, %cst_109 {dimension_numbers = #tpu.dot_dimension_numbers<[1], [0], [0], [1], [0, 0, 1, 1], [], []>} : vector<8x128xf32>, vector<128x512xf32>, vector<8x512xf32> -> vector<8x512xf32>
    %241 = arith.index_cast %c3_i32 : i32 to index
    %c0_110 = arith.constant 0 : index
    %c0_111 = arith.constant 0 : index
    %242 = vector.load %arg9[%241, %c0_110, %c0_111] : memref<8x8x512xf32, #tpu.memory_space<vmem>>, vector<1x8x512xf32>
    %243 = vector.shape_cast %242 : vector<1x8x512xf32> to vector<8x512xf32>
    %cst_112 = arith.constant dense<0.000000e+00> : vector<8x512xf32>
    %244 = tpu.matmul %218, %98, %cst_112 {dimension_numbers = #tpu.dot_dimension_numbers<[1], [0], [0], [1], [0, 0, 1, 1], [], []>} : vector<8x128xf32>, vector<128x512xf32>, vector<8x512xf32> -> vector<8x512xf32>
    %245 = arith.addf %243, %244 : vector<8x512xf32>
    %246 = vector.extract_strided_slice %245 {offsets = [0, 0], sizes = [8, 384], strides = [1, 1]} : vector<8x512xf32> to vector<8x384xf32>
    %cst_113 = arith.constant 5.000000e-01 : f32
    %247 = vector.broadcast %cst_113 : f32 to vector<8x384xf32>
    %248 = arith.mulf %247, %246 : vector<8x384xf32>
    %249 = math.tanh %248 : vector<8x384xf32>
    %cst_114 = arith.constant 5.000000e-01 : f32
    %250 = vector.broadcast %cst_114 : f32 to vector<8x384xf32>
    %251 = arith.mulf %250, %249 : vector<8x384xf32>
    %cst_115 = arith.constant 5.000000e-01 : f32
    %252 = vector.broadcast %cst_115 : f32 to vector<8x384xf32>
    %253 = arith.addf %251, %252 : vector<8x384xf32>
    %254 = vector.extract_strided_slice %245 {offsets = [0, 384], sizes = [8, 128], strides = [1, 1]} : vector<8x512xf32> to vector<8x128xf32>
    %255 = math.tanh %254 : vector<8x128xf32>
    %256 = vector.extract_strided_slice %253 {offsets = [0, 0], sizes = [8, 128], strides = [1, 1]} : vector<8x384xf32> to vector<8x128xf32>
    %257 = vector.extract_strided_slice %253 {offsets = [0, 128], sizes = [8, 128], strides = [1, 1]} : vector<8x384xf32> to vector<8x128xf32>
    %258 = vector.extract_strided_slice %253 {offsets = [0, 256], sizes = [8, 128], strides = [1, 1]} : vector<8x384xf32> to vector<8x128xf32>
    %259 = arith.mulf %257, %216 : vector<8x128xf32>
    %260 = arith.mulf %256, %255 : vector<8x128xf32>
    %261 = arith.addf %259, %260 : vector<8x128xf32>
    %262 = math.tanh %261 : vector<8x128xf32>
    %263 = arith.mulf %258, %262 : vector<8x128xf32>
    %cst_116 = arith.constant dense<0.000000e+00> : vector<8x512xf32>
    %264 = tpu.matmul %263, %99, %cst_116 {dimension_numbers = #tpu.dot_dimension_numbers<[1], [0], [0], [1], [0, 0, 1, 1], [], []>} : vector<8x128xf32>, vector<128x512xf32>, vector<8x512xf32> -> vector<8x512xf32>
    %265 = arith.addf %264, %240 : vector<8x512xf32>
    %266 = arith.addf %265, %103 : vector<8x512xf32>
    %267 = vector.extract_strided_slice %266 {offsets = [0, 0], sizes = [8, 384], strides = [1, 1]} : vector<8x512xf32> to vector<8x384xf32>
    %cst_117 = arith.constant 5.000000e-01 : f32
    %268 = vector.broadcast %cst_117 : f32 to vector<8x384xf32>
    %269 = arith.mulf %268, %267 : vector<8x384xf32>
    %270 = math.tanh %269 : vector<8x384xf32>
    %cst_118 = arith.constant 5.000000e-01 : f32
    %271 = vector.broadcast %cst_118 : f32 to vector<8x384xf32>
    %272 = arith.mulf %271, %270 : vector<8x384xf32>
    %cst_119 = arith.constant 5.000000e-01 : f32
    %273 = vector.broadcast %cst_119 : f32 to vector<8x384xf32>
    %274 = arith.addf %272, %273 : vector<8x384xf32>
    %275 = vector.extract_strided_slice %266 {offsets = [0, 384], sizes = [8, 128], strides = [1, 1]} : vector<8x512xf32> to vector<8x128xf32>
    %276 = math.tanh %275 : vector<8x128xf32>
    %277 = vector.extract_strided_slice %274 {offsets = [0, 0], sizes = [8, 128], strides = [1, 1]} : vector<8x384xf32> to vector<8x128xf32>
    %278 = vector.extract_strided_slice %274 {offsets = [0, 128], sizes = [8, 128], strides = [1, 1]} : vector<8x384xf32> to vector<8x128xf32>
    %279 = vector.extract_strided_slice %274 {offsets = [0, 256], sizes = [8, 128], strides = [1, 1]} : vector<8x384xf32> to vector<8x128xf32>
    %280 = arith.mulf %278, %237 : vector<8x128xf32>
    %281 = arith.mulf %277, %276 : vector<8x128xf32>
    %282 = arith.addf %280, %281 : vector<8x128xf32>
    %283 = math.tanh %282 : vector<8x128xf32>
    %284 = arith.mulf %279, %283 : vector<8x128xf32>
    %c4_i32 = arith.constant 4 : i32
    %cst_120 = arith.constant dense<0.000000e+00> : vector<8x512xf32>
    %285 = tpu.matmul %284, %100, %cst_120 {dimension_numbers = #tpu.dot_dimension_numbers<[1], [0], [0], [1], [0, 0, 1, 1], [], []>} : vector<8x128xf32>, vector<128x512xf32>, vector<8x512xf32> -> vector<8x512xf32>
    %286 = arith.index_cast %c4_i32 : i32 to index
    %c0_121 = arith.constant 0 : index
    %c0_122 = arith.constant 0 : index
    %287 = vector.load %arg9[%286, %c0_121, %c0_122] : memref<8x8x512xf32, #tpu.memory_space<vmem>>, vector<1x8x512xf32>
    %288 = vector.shape_cast %287 : vector<1x8x512xf32> to vector<8x512xf32>
    %cst_123 = arith.constant dense<0.000000e+00> : vector<8x512xf32>
    %289 = tpu.matmul %263, %98, %cst_123 {dimension_numbers = #tpu.dot_dimension_numbers<[1], [0], [0], [1], [0, 0, 1, 1], [], []>} : vector<8x128xf32>, vector<128x512xf32>, vector<8x512xf32> -> vector<8x512xf32>
    %290 = arith.addf %288, %289 : vector<8x512xf32>
    %291 = vector.extract_strided_slice %290 {offsets = [0, 0], sizes = [8, 384], strides = [1, 1]} : vector<8x512xf32> to vector<8x384xf32>
    %cst_124 = arith.constant 5.000000e-01 : f32
    %292 = vector.broadcast %cst_124 : f32 to vector<8x384xf32>
    %293 = arith.mulf %292, %291 : vector<8x384xf32>
    %294 = math.tanh %293 : vector<8x384xf32>
    %cst_125 = arith.constant 5.000000e-01 : f32
    %295 = vector.broadcast %cst_125 : f32 to vector<8x384xf32>
    %296 = arith.mulf %295, %294 : vector<8x384xf32>
    %cst_126 = arith.constant 5.000000e-01 : f32
    %297 = vector.broadcast %cst_126 : f32 to vector<8x384xf32>
    %298 = arith.addf %296, %297 : vector<8x384xf32>
    %299 = vector.extract_strided_slice %290 {offsets = [0, 384], sizes = [8, 128], strides = [1, 1]} : vector<8x512xf32> to vector<8x128xf32>
    %300 = math.tanh %299 : vector<8x128xf32>
    %301 = vector.extract_strided_slice %298 {offsets = [0, 0], sizes = [8, 128], strides = [1, 1]} : vector<8x384xf32> to vector<8x128xf32>
    %302 = vector.extract_strided_slice %298 {offsets = [0, 128], sizes = [8, 128], strides = [1, 1]} : vector<8x384xf32> to vector<8x128xf32>
    %303 = vector.extract_strided_slice %298 {offsets = [0, 256], sizes = [8, 128], strides = [1, 1]} : vector<8x384xf32> to vector<8x128xf32>
    %304 = arith.mulf %302, %261 : vector<8x128xf32>
    %305 = arith.mulf %301, %300 : vector<8x128xf32>
    %306 = arith.addf %304, %305 : vector<8x128xf32>
    %307 = math.tanh %306 : vector<8x128xf32>
    %308 = arith.mulf %303, %307 : vector<8x128xf32>
    %cst_127 = arith.constant dense<0.000000e+00> : vector<8x512xf32>
    %309 = tpu.matmul %308, %99, %cst_127 {dimension_numbers = #tpu.dot_dimension_numbers<[1], [0], [0], [1], [0, 0, 1, 1], [], []>} : vector<8x128xf32>, vector<128x512xf32>, vector<8x512xf32> -> vector<8x512xf32>
    %310 = arith.addf %309, %285 : vector<8x512xf32>
    %311 = arith.addf %310, %103 : vector<8x512xf32>
    %312 = vector.extract_strided_slice %311 {offsets = [0, 0], sizes = [8, 384], strides = [1, 1]} : vector<8x512xf32> to vector<8x384xf32>
    %cst_128 = arith.constant 5.000000e-01 : f32
    %313 = vector.broadcast %cst_128 : f32 to vector<8x384xf32>
    %314 = arith.mulf %313, %312 : vector<8x384xf32>
    %315 = math.tanh %314 : vector<8x384xf32>
    %cst_129 = arith.constant 5.000000e-01 : f32
    %316 = vector.broadcast %cst_129 : f32 to vector<8x384xf32>
    %317 = arith.mulf %316, %315 : vector<8x384xf32>
    %cst_130 = arith.constant 5.000000e-01 : f32
    %318 = vector.broadcast %cst_130 : f32 to vector<8x384xf32>
    %319 = arith.addf %317, %318 : vector<8x384xf32>
    %320 = vector.extract_strided_slice %311 {offsets = [0, 384], sizes = [8, 128], strides = [1, 1]} : vector<8x512xf32> to vector<8x128xf32>
    %321 = math.tanh %320 : vector<8x128xf32>
    %322 = vector.extract_strided_slice %319 {offsets = [0, 0], sizes = [8, 128], strides = [1, 1]} : vector<8x384xf32> to vector<8x128xf32>
    %323 = vector.extract_strided_slice %319 {offsets = [0, 128], sizes = [8, 128], strides = [1, 1]} : vector<8x384xf32> to vector<8x128xf32>
    %324 = vector.extract_strided_slice %319 {offsets = [0, 256], sizes = [8, 128], strides = [1, 1]} : vector<8x384xf32> to vector<8x128xf32>
    %325 = arith.mulf %323, %282 : vector<8x128xf32>
    %326 = arith.mulf %322, %321 : vector<8x128xf32>
    %327 = arith.addf %325, %326 : vector<8x128xf32>
    %328 = math.tanh %327 : vector<8x128xf32>
    %329 = arith.mulf %324, %328 : vector<8x128xf32>
    %c5_i32 = arith.constant 5 : i32
    %cst_131 = arith.constant dense<0.000000e+00> : vector<8x512xf32>
    %330 = tpu.matmul %329, %100, %cst_131 {dimension_numbers = #tpu.dot_dimension_numbers<[1], [0], [0], [1], [0, 0, 1, 1], [], []>} : vector<8x128xf32>, vector<128x512xf32>, vector<8x512xf32> -> vector<8x512xf32>
    %331 = arith.index_cast %c5_i32 : i32 to index
    %c0_132 = arith.constant 0 : index
    %c0_133 = arith.constant 0 : index
    %332 = vector.load %arg9[%331, %c0_132, %c0_133] : memref<8x8x512xf32, #tpu.memory_space<vmem>>, vector<1x8x512xf32>
    %333 = vector.shape_cast %332 : vector<1x8x512xf32> to vector<8x512xf32>
    %cst_134 = arith.constant dense<0.000000e+00> : vector<8x512xf32>
    %334 = tpu.matmul %308, %98, %cst_134 {dimension_numbers = #tpu.dot_dimension_numbers<[1], [0], [0], [1], [0, 0, 1, 1], [], []>} : vector<8x128xf32>, vector<128x512xf32>, vector<8x512xf32> -> vector<8x512xf32>
    %335 = arith.addf %333, %334 : vector<8x512xf32>
    %336 = vector.extract_strided_slice %335 {offsets = [0, 0], sizes = [8, 384], strides = [1, 1]} : vector<8x512xf32> to vector<8x384xf32>
    %cst_135 = arith.constant 5.000000e-01 : f32
    %337 = vector.broadcast %cst_135 : f32 to vector<8x384xf32>
    %338 = arith.mulf %337, %336 : vector<8x384xf32>
    %339 = math.tanh %338 : vector<8x384xf32>
    %cst_136 = arith.constant 5.000000e-01 : f32
    %340 = vector.broadcast %cst_136 : f32 to vector<8x384xf32>
    %341 = arith.mulf %340, %339 : vector<8x384xf32>
    %cst_137 = arith.constant 5.000000e-01 : f32
    %342 = vector.broadcast %cst_137 : f32 to vector<8x384xf32>
    %343 = arith.addf %341, %342 : vector<8x384xf32>
    %344 = vector.extract_strided_slice %335 {offsets = [0, 384], sizes = [8, 128], strides = [1, 1]} : vector<8x512xf32> to vector<8x128xf32>
    %345 = math.tanh %344 : vector<8x128xf32>
    %346 = vector.extract_strided_slice %343 {offsets = [0, 0], sizes = [8, 128], strides = [1, 1]} : vector<8x384xf32> to vector<8x128xf32>
    %347 = vector.extract_strided_slice %343 {offsets = [0, 128], sizes = [8, 128], strides = [1, 1]} : vector<8x384xf32> to vector<8x128xf32>
    %348 = vector.extract_strided_slice %343 {offsets = [0, 256], sizes = [8, 128], strides = [1, 1]} : vector<8x384xf32> to vector<8x128xf32>
    %349 = arith.mulf %347, %306 : vector<8x128xf32>
    %350 = arith.mulf %346, %345 : vector<8x128xf32>
    %351 = arith.addf %349, %350 : vector<8x128xf32>
    %352 = math.tanh %351 : vector<8x128xf32>
    %353 = arith.mulf %348, %352 : vector<8x128xf32>
    %cst_138 = arith.constant dense<0.000000e+00> : vector<8x512xf32>
    %354 = tpu.matmul %353, %99, %cst_138 {dimension_numbers = #tpu.dot_dimension_numbers<[1], [0], [0], [1], [0, 0, 1, 1], [], []>} : vector<8x128xf32>, vector<128x512xf32>, vector<8x512xf32> -> vector<8x512xf32>
    %355 = arith.addf %354, %330 : vector<8x512xf32>
    %356 = arith.addf %355, %103 : vector<8x512xf32>
    %357 = vector.extract_strided_slice %356 {offsets = [0, 0], sizes = [8, 384], strides = [1, 1]} : vector<8x512xf32> to vector<8x384xf32>
    %cst_139 = arith.constant 5.000000e-01 : f32
    %358 = vector.broadcast %cst_139 : f32 to vector<8x384xf32>
    %359 = arith.mulf %358, %357 : vector<8x384xf32>
    %360 = math.tanh %359 : vector<8x384xf32>
    %cst_140 = arith.constant 5.000000e-01 : f32
    %361 = vector.broadcast %cst_140 : f32 to vector<8x384xf32>
    %362 = arith.mulf %361, %360 : vector<8x384xf32>
    %cst_141 = arith.constant 5.000000e-01 : f32
    %363 = vector.broadcast %cst_141 : f32 to vector<8x384xf32>
    %364 = arith.addf %362, %363 : vector<8x384xf32>
    %365 = vector.extract_strided_slice %356 {offsets = [0, 384], sizes = [8, 128], strides = [1, 1]} : vector<8x512xf32> to vector<8x128xf32>
    %366 = math.tanh %365 : vector<8x128xf32>
    %367 = vector.extract_strided_slice %364 {offsets = [0, 0], sizes = [8, 128], strides = [1, 1]} : vector<8x384xf32> to vector<8x128xf32>
    %368 = vector.extract_strided_slice %364 {offsets = [0, 128], sizes = [8, 128], strides = [1, 1]} : vector<8x384xf32> to vector<8x128xf32>
    %369 = vector.extract_strided_slice %364 {offsets = [0, 256], sizes = [8, 128], strides = [1, 1]} : vector<8x384xf32> to vector<8x128xf32>
    %370 = arith.mulf %368, %327 : vector<8x128xf32>
    %371 = arith.mulf %367, %366 : vector<8x128xf32>
    %372 = arith.addf %370, %371 : vector<8x128xf32>
    %373 = math.tanh %372 : vector<8x128xf32>
    %374 = arith.mulf %369, %373 : vector<8x128xf32>
    %c6_i32 = arith.constant 6 : i32
    %cst_142 = arith.constant dense<0.000000e+00> : vector<8x512xf32>
    %375 = tpu.matmul %374, %100, %cst_142 {dimension_numbers = #tpu.dot_dimension_numbers<[1], [0], [0], [1], [0, 0, 1, 1], [], []>} : vector<8x128xf32>, vector<128x512xf32>, vector<8x512xf32> -> vector<8x512xf32>
    %376 = arith.index_cast %c6_i32 : i32 to index
    %c0_143 = arith.constant 0 : index
    %c0_144 = arith.constant 0 : index
    %377 = vector.load %arg9[%376, %c0_143, %c0_144] : memref<8x8x512xf32, #tpu.memory_space<vmem>>, vector<1x8x512xf32>
    %378 = vector.shape_cast %377 : vector<1x8x512xf32> to vector<8x512xf32>
    %cst_145 = arith.constant dense<0.000000e+00> : vector<8x512xf32>
    %379 = tpu.matmul %353, %98, %cst_145 {dimension_numbers = #tpu.dot_dimension_numbers<[1], [0], [0], [1], [0, 0, 1, 1], [], []>} : vector<8x128xf32>, vector<128x512xf32>, vector<8x512xf32> -> vector<8x512xf32>
    %380 = arith.addf %378, %379 : vector<8x512xf32>
    %381 = vector.extract_strided_slice %380 {offsets = [0, 0], sizes = [8, 384], strides = [1, 1]} : vector<8x512xf32> to vector<8x384xf32>
    %cst_146 = arith.constant 5.000000e-01 : f32
    %382 = vector.broadcast %cst_146 : f32 to vector<8x384xf32>
    %383 = arith.mulf %382, %381 : vector<8x384xf32>
    %384 = math.tanh %383 : vector<8x384xf32>
    %cst_147 = arith.constant 5.000000e-01 : f32
    %385 = vector.broadcast %cst_147 : f32 to vector<8x384xf32>
    %386 = arith.mulf %385, %384 : vector<8x384xf32>
    %cst_148 = arith.constant 5.000000e-01 : f32
    %387 = vector.broadcast %cst_148 : f32 to vector<8x384xf32>
    %388 = arith.addf %386, %387 : vector<8x384xf32>
    %389 = vector.extract_strided_slice %380 {offsets = [0, 384], sizes = [8, 128], strides = [1, 1]} : vector<8x512xf32> to vector<8x128xf32>
    %390 = math.tanh %389 : vector<8x128xf32>
    %391 = vector.extract_strided_slice %388 {offsets = [0, 0], sizes = [8, 128], strides = [1, 1]} : vector<8x384xf32> to vector<8x128xf32>
    %392 = vector.extract_strided_slice %388 {offsets = [0, 128], sizes = [8, 128], strides = [1, 1]} : vector<8x384xf32> to vector<8x128xf32>
    %393 = vector.extract_strided_slice %388 {offsets = [0, 256], sizes = [8, 128], strides = [1, 1]} : vector<8x384xf32> to vector<8x128xf32>
    %394 = arith.mulf %392, %351 : vector<8x128xf32>
    %395 = arith.mulf %391, %390 : vector<8x128xf32>
    %396 = arith.addf %394, %395 : vector<8x128xf32>
    %397 = math.tanh %396 : vector<8x128xf32>
    %398 = arith.mulf %393, %397 : vector<8x128xf32>
    %cst_149 = arith.constant dense<0.000000e+00> : vector<8x512xf32>
    %399 = tpu.matmul %398, %99, %cst_149 {dimension_numbers = #tpu.dot_dimension_numbers<[1], [0], [0], [1], [0, 0, 1, 1], [], []>} : vector<8x128xf32>, vector<128x512xf32>, vector<8x512xf32> -> vector<8x512xf32>
    %400 = arith.addf %399, %375 : vector<8x512xf32>
    %401 = arith.addf %400, %103 : vector<8x512xf32>
    %402 = vector.extract_strided_slice %401 {offsets = [0, 0], sizes = [8, 384], strides = [1, 1]} : vector<8x512xf32> to vector<8x384xf32>
    %cst_150 = arith.constant 5.000000e-01 : f32
    %403 = vector.broadcast %cst_150 : f32 to vector<8x384xf32>
    %404 = arith.mulf %403, %402 : vector<8x384xf32>
    %405 = math.tanh %404 : vector<8x384xf32>
    %cst_151 = arith.constant 5.000000e-01 : f32
    %406 = vector.broadcast %cst_151 : f32 to vector<8x384xf32>
    %407 = arith.mulf %406, %405 : vector<8x384xf32>
    %cst_152 = arith.constant 5.000000e-01 : f32
    %408 = vector.broadcast %cst_152 : f32 to vector<8x384xf32>
    %409 = arith.addf %407, %408 : vector<8x384xf32>
    %410 = vector.extract_strided_slice %401 {offsets = [0, 384], sizes = [8, 128], strides = [1, 1]} : vector<8x512xf32> to vector<8x128xf32>
    %411 = math.tanh %410 : vector<8x128xf32>
    %412 = vector.extract_strided_slice %409 {offsets = [0, 0], sizes = [8, 128], strides = [1, 1]} : vector<8x384xf32> to vector<8x128xf32>
    %413 = vector.extract_strided_slice %409 {offsets = [0, 128], sizes = [8, 128], strides = [1, 1]} : vector<8x384xf32> to vector<8x128xf32>
    %414 = vector.extract_strided_slice %409 {offsets = [0, 256], sizes = [8, 128], strides = [1, 1]} : vector<8x384xf32> to vector<8x128xf32>
    %415 = arith.mulf %413, %372 : vector<8x128xf32>
    %416 = arith.mulf %412, %411 : vector<8x128xf32>
    %417 = arith.addf %415, %416 : vector<8x128xf32>
    %418 = math.tanh %417 : vector<8x128xf32>
    %419 = arith.mulf %414, %418 : vector<8x128xf32>
    %c7_i32 = arith.constant 7 : i32
    %cst_153 = arith.constant dense<0.000000e+00> : vector<8x512xf32>
    %420 = tpu.matmul %419, %100, %cst_153 {dimension_numbers = #tpu.dot_dimension_numbers<[1], [0], [0], [1], [0, 0, 1, 1], [], []>} : vector<8x128xf32>, vector<128x512xf32>, vector<8x512xf32> -> vector<8x512xf32>
    %421 = arith.index_cast %c7_i32 : i32 to index
    %c0_154 = arith.constant 0 : index
    %c0_155 = arith.constant 0 : index
    %422 = vector.load %arg9[%421, %c0_154, %c0_155] : memref<8x8x512xf32, #tpu.memory_space<vmem>>, vector<1x8x512xf32>
    %423 = vector.shape_cast %422 : vector<1x8x512xf32> to vector<8x512xf32>
    %cst_156 = arith.constant dense<0.000000e+00> : vector<8x512xf32>
    %424 = tpu.matmul %398, %98, %cst_156 {dimension_numbers = #tpu.dot_dimension_numbers<[1], [0], [0], [1], [0, 0, 1, 1], [], []>} : vector<8x128xf32>, vector<128x512xf32>, vector<8x512xf32> -> vector<8x512xf32>
    %425 = arith.addf %423, %424 : vector<8x512xf32>
    %426 = vector.extract_strided_slice %425 {offsets = [0, 0], sizes = [8, 384], strides = [1, 1]} : vector<8x512xf32> to vector<8x384xf32>
    %cst_157 = arith.constant 5.000000e-01 : f32
    %427 = vector.broadcast %cst_157 : f32 to vector<8x384xf32>
    %428 = arith.mulf %427, %426 : vector<8x384xf32>
    %429 = math.tanh %428 : vector<8x384xf32>
    %cst_158 = arith.constant 5.000000e-01 : f32
    %430 = vector.broadcast %cst_158 : f32 to vector<8x384xf32>
    %431 = arith.mulf %430, %429 : vector<8x384xf32>
    %cst_159 = arith.constant 5.000000e-01 : f32
    %432 = vector.broadcast %cst_159 : f32 to vector<8x384xf32>
    %433 = arith.addf %431, %432 : vector<8x384xf32>
    %434 = vector.extract_strided_slice %425 {offsets = [0, 384], sizes = [8, 128], strides = [1, 1]} : vector<8x512xf32> to vector<8x128xf32>
    %435 = math.tanh %434 : vector<8x128xf32>
    %436 = vector.extract_strided_slice %433 {offsets = [0, 0], sizes = [8, 128], strides = [1, 1]} : vector<8x384xf32> to vector<8x128xf32>
    %437 = vector.extract_strided_slice %433 {offsets = [0, 128], sizes = [8, 128], strides = [1, 1]} : vector<8x384xf32> to vector<8x128xf32>
    %438 = vector.extract_strided_slice %433 {offsets = [0, 256], sizes = [8, 128], strides = [1, 1]} : vector<8x384xf32> to vector<8x128xf32>
    %439 = arith.mulf %437, %396 : vector<8x128xf32>
    %440 = arith.mulf %436, %435 : vector<8x128xf32>
    %441 = arith.addf %439, %440 : vector<8x128xf32>
    %442 = math.tanh %441 : vector<8x128xf32>
    %443 = arith.mulf %438, %442 : vector<8x128xf32>
    %cst_160 = arith.constant dense<0.000000e+00> : vector<8x512xf32>
    %444 = tpu.matmul %443, %99, %cst_160 {dimension_numbers = #tpu.dot_dimension_numbers<[1], [0], [0], [1], [0, 0, 1, 1], [], []>} : vector<8x128xf32>, vector<128x512xf32>, vector<8x512xf32> -> vector<8x512xf32>
    %445 = arith.addf %444, %420 : vector<8x512xf32>
    %446 = arith.addf %445, %103 : vector<8x512xf32>
    %447 = vector.extract_strided_slice %446 {offsets = [0, 0], sizes = [8, 384], strides = [1, 1]} : vector<8x512xf32> to vector<8x384xf32>
    %cst_161 = arith.constant 5.000000e-01 : f32
    %448 = vector.broadcast %cst_161 : f32 to vector<8x384xf32>
    %449 = arith.mulf %448, %447 : vector<8x384xf32>
    %450 = math.tanh %449 : vector<8x384xf32>
    %cst_162 = arith.constant 5.000000e-01 : f32
    %451 = vector.broadcast %cst_162 : f32 to vector<8x384xf32>
    %452 = arith.mulf %451, %450 : vector<8x384xf32>
    %cst_163 = arith.constant 5.000000e-01 : f32
    %453 = vector.broadcast %cst_163 : f32 to vector<8x384xf32>
    %454 = arith.addf %452, %453 : vector<8x384xf32>
    %455 = vector.extract_strided_slice %446 {offsets = [0, 384], sizes = [8, 128], strides = [1, 1]} : vector<8x512xf32> to vector<8x128xf32>
    %456 = math.tanh %455 : vector<8x128xf32>
    %457 = vector.extract_strided_slice %454 {offsets = [0, 0], sizes = [8, 128], strides = [1, 1]} : vector<8x384xf32> to vector<8x128xf32>
    %458 = vector.extract_strided_slice %454 {offsets = [0, 128], sizes = [8, 128], strides = [1, 1]} : vector<8x384xf32> to vector<8x128xf32>
    %459 = vector.extract_strided_slice %454 {offsets = [0, 256], sizes = [8, 128], strides = [1, 1]} : vector<8x384xf32> to vector<8x128xf32>
    %460 = arith.mulf %458, %417 : vector<8x128xf32>
    %461 = arith.mulf %457, %456 : vector<8x128xf32>
    %462 = arith.addf %460, %461 : vector<8x128xf32>
    %463 = math.tanh %462 : vector<8x128xf32>
    %464 = arith.mulf %459, %463 : vector<8x128xf32>
    %c8_i32 = arith.constant 8 : i32
    %cst_164 = arith.constant 0.000000e+00 : f32
    %465 = vector.broadcast %cst_164 : f32 to vector<8x128xf32>
    %466 = arith.maximumf %464, %465 : vector<8x128xf32>
    %c0_165 = arith.constant 0 : index
    %c0_166 = arith.constant 0 : index
    %467 = vector.load %arg6[%c0_165, %c0_166] : memref<128x128xf32, #tpu.memory_space<vmem>>, vector<128x128xf32>
    %cst_167 = arith.constant dense<0.000000e+00> : vector<8x128xf32>
    %468 = tpu.matmul %466, %467, %cst_167 {dimension_numbers = #tpu.dot_dimension_numbers<[1], [0], [0], [1], [0, 0, 1, 1], [], []>} : vector<8x128xf32>, vector<128x128xf32>, vector<8x128xf32> -> vector<8x128xf32>
    %c0_168 = arith.constant 0 : index
    %c0_169 = arith.constant 0 : index
    %469 = vector.load %arg7[%c0_168, %c0_169] : memref<1x128xf32, #tpu.memory_space<vmem>>, vector<1x128xf32>
    %470 = vector.broadcast %469 : vector<1x128xf32> to vector<8x128xf32>
    %471 = arith.addf %468, %470 : vector<8x128xf32>
    %c0_170 = arith.constant 0 : index
    %c0_171 = arith.constant 0 : index
    %472 = vector.load %arg8[%c0_170, %c0_171] : memref<8x128xf32, #tpu.memory_space<vmem>>, vector<8x128xf32>
    tpu.vector_store %arg8[%c0_170, %c0_171], %471 {strides = array<i32>} : memref<8x128xf32, #tpu.memory_space<vmem>>, vector<8x128xf32>,
    return
  }
}

</mosaic_0001>

<bundles_post_ra>
// kernel: emoji_lstm_forward.1
= control target key start
LH: loop header
LB: loop body
LE: loop exit
PB: predicated region body
PF: predicated region fallthrough
CT: control target
= control target key end

     0   :  { %13 = vsyncpa [#allocation5], 0  ;;  %s7915_s0 = inlined_call_operand.vmem [shape: s32[16], index: 0, kind: input, shape index: {}]   ;;  %s7916_s1 = inlined_call_operand.hbm [shape: f32[21,512], index: 1, kind: input, shape index: {}]   ;;  %s7917_s2 = inlined_call_operand.hbm [shape: f32[128,512], index: 2, kind: input, shape index: {}]   ;;  %s7918_s3 = inlined_call_operand.hbm [shape: f32[128,512], index: 3, kind: input, shape index: {}]   ;;  %s7919_s4 = inlined_call_operand.hbm [shape: f32[128,512], index: 4, kind: input, shape index: {}]   ;;  %s7920_s5 = inlined_call_operand.vmem [shape: f32[1,512], index: 5, kind: input, shape index: {}]   ;;  %s7921_s6 = inlined_call_operand.hbm [shape: f32[128,128], index: 6, kind: input, shape index: {}]   ;;  %s7922_s7 = inlined_call_operand.vmem [shape: f32[1,128], index: 7, kind: input, shape index: {}]   ;;  %s7923_s8 = inlined_call_operand.vmem [shape: f32[8,128], index: 8, kind: output, shape index: {}]  }
   0x1   :  { %14 = vsyncpa [#allocation4], 0 }
   0x2   :  { %15 = vsyncpa [#allocation8], 0 }
   0x3   :  { %16 = vsyncpa [#allocation11], 0  ;;  %s6530_s27 = smov [#allocation7]   ;;  %s6531_s29 = smov [#allocation10]  }
   0x4   :  { %s44_s28 = sshll.u32 %s6530_s27, 4  ;;  %s68_s30 = sshll.u32 %s6531_s29, 4  ;;  %s45_s28 = int_to_ptr.vmem [resolvable:$true] %s44_s28  ;;  %s6588_s30 = int_to_ptr.vmem [resolvable:$true] %s68_s30 }
   0x5   :  { %s6400_s11 = scalar_lea.hbm %s7917_s2, 8192 }
   0x6   :  { %p6401_p0 = scmp.ne.s32.totalorder %s7917_s2, %s6400_s11  ;;  %p6404_p1 = scmp.lt.u32.totalorder %s6400_s11, %s7917_s2 }
   0x8   :  { %p6406_p2 = pnand %p6404_p1, %p6401_p0 }
   0xa   :  { %6409 = shalt.err (!%p6406_p2)
}
   0xb   :  { %s6410_s16 = scalar_lea.vmem %s45_s28, 8192  ;;  %p6415_p4 = scmp.lt.s32.totalorder %s45_s28, %s45_s28 }
   0xc   :  { %p6411_p3 = scmp.ne.s32.totalorder %s45_s28, %s6410_s16  ;;  %p6416_p5 = scmp.lt.s32.totalorder %s6410_s16, %s6410_s16 }
   0xe   :  { %p6417_p6 = por %p6416_p5, %p6415_p4 }
  0x10   :  { %p6418_p7 = pnand %p6417_p6, %p6411_p3 }
  0x12   :  { %6421 = shalt.err (!%p6418_p7)
}
  0x13   :  { %s6532_s17 = smov 512   ;;  %s6533_s18 = smov 32  }
  0x14   :  { %50 = dma.hbm_to_vmem [thread:$0]  %s7917_s2, 8192, %s45_s28, [#allocation8], %s6532_s17, %s6532_s17, %s6533_s18  }
  0x15   :  { %s6422_s23 = scalar_lea.hbm %s7919_s4, 8192 }
  0x16   :  { %p6423_p8 = scmp.ne.s32.totalorder %s7919_s4, %s6422_s23  ;;  %p6426_p9 = scmp.lt.u32.totalorder %s6422_s23, %s7919_s4 }
  0x18   :  { %p6428_p10 = pnand %p6426_p9, %p6423_p8 }
  0x1a   :  { %6431 = shalt.err (!%p6428_p10)
}
  0x1b   :  { %s6432_s29 = scalar_lea.vmem %s6588_s30, 8192  ;;  %p6437_p12 = scmp.lt.s32.totalorder %s6588_s30, %s6588_s30 }
  0x1c   :  { %p6433_p11 = scmp.ne.s32.totalorder %s6588_s30, %s6432_s29  ;;  %p6438_p13 = scmp.lt.s32.totalorder %s6432_s29, %s6432_s29 }
  0x1e   :  { %p6439_p0 = por %p6438_p13, %p6437_p12 }
  0x20   :  { %p6440_p1 = pnand %p6439_p0, %p6433_p11 }
  0x22   :  { %6443 = shalt.err (!%p6440_p1)
}
  0x23   :  { %74 = dma.hbm_to_vmem [thread:$0]  %s7919_s4, 8192, %s6588_s30, [#allocation11], %s6532_s17, %s6532_s17, %s6533_s18  }
  0x24   :  { %s23_s11 = sshll.u32 %s7915_s0, 4  ;;  %s24_s11 = int_to_ptr.vmem [resolvable:$true] %s23_s11 }
  0x25   :  { %s6444_s12 = scalar_lea.vmem %s24_s11, 16  ;;  %p6449_p3 = scmp.lt.s32.totalorder %s24_s11, %s24_s11 }
  0x26   :  { %p6445_p2 = scmp.ne.s32.totalorder %s24_s11, %s6444_s12  ;;  %p6450_p4 = scmp.lt.s32.totalorder %s6444_s12, %s6444_s12 }
  0x28   :  { %p6451_p5 = por %p6450_p4, %p6449_p3 }
  0x2a   :  { %p6452_p6 = pnand %p6451_p5, %p6445_p2 }
  0x2c   :  { %6455 = shalt.err (!%p6452_p6)
}
  0x2d   :  { %s6534_s13 = smov [#allocation3]   ;;  %s6535_s14 = smov [#allocation6]  }
  0x2e   :  { %26 = dma.vmem_to_smem %s24_s11, 16, %s6534_s13, [#allocation5]  }
  0x2f   :  { %s32_s15 = sshll.u32 %s6535_s14, 4  ;;  %s6536_s16 = smov [#allocation9]   ;;  %s33_s15 = int_to_ptr.vmem [resolvable:$true] %s32_s15 }
  0x30   :  { %s56_s19 = sshll.u32 %s6536_s16, 4  ;;  %s6456_s20 = scalar_lea.hbm %s7916_s1, 1536  ;;  %s57_s19 = int_to_ptr.vmem [resolvable:$true] %s56_s19 }
  0x31   :  { %p6457_p7 = scmp.ne.s32.totalorder %s7916_s1, %s6456_s20  ;;  %p6460_p8 = scmp.lt.u32.totalorder %s6456_s20, %s7916_s1 }
  0x33   :  { %p6462_p9 = pnand %p6460_p8, %p6457_p7 }
  0x35   :  { %6465 = shalt.err (!%p6462_p9)
}
  0x36   :  { %s6466_s24 = scalar_lea.vmem %s33_s15, 1536  ;;  %p6471_p11 = scmp.lt.s32.totalorder %s33_s15, %s33_s15 }
  0x37   :  { %p6467_p10 = scmp.ne.s32.totalorder %s33_s15, %s6466_s24  ;;  %p6472_p12 = scmp.lt.s32.totalorder %s6466_s24, %s6466_s24 }
  0x39   :  { %p6473_p13 = por %p6472_p12, %p6471_p11 }
  0x3b   :  { %p6474_p0 = pnand %p6473_p13, %p6467_p10 }
  0x3d   :  { %6477 = shalt.err (!%p6474_p0)
}
  0x3e   :  { %38 = dma.hbm_to_vmem [thread:$0]  %s7916_s1, 1536, %s33_s15, [#allocation4], %s6532_s17, %s6532_s17, %s6533_s18  }
  0x3f   :  { %s6478_s2 = scalar_lea.hbm %s7918_s3, 8192 }
  0x40   :  { %p6479_p1 = scmp.ne.s32.totalorder %s7918_s3, %s6478_s2  ;;  %p6482_p2 = scmp.lt.u32.totalorder %s6478_s2, %s7918_s3 }
  0x42   :  { %p6484_p3 = pnand %p6482_p2, %p6479_p1 }
  0x44   :  { %6487 = shalt.err (!%p6484_p3)
}
  0x45   :  { %s6488_s12 = scalar_lea.vmem %s57_s19, 8192  ;;  %p6493_p5 = scmp.lt.s32.totalorder %s57_s19, %s57_s19 }
  0x46   :  { %p6489_p4 = scmp.ne.s32.totalorder %s57_s19, %s6488_s12  ;;  %p6494_p6 = scmp.lt.s32.totalorder %s6488_s12, %s6488_s12 }
  0x48   :  { %p6495_p7 = por %p6494_p6, %p6493_p5 }
  0x4a   :  { %p6496_p8 = pnand %p6495_p7, %p6489_p4 }
  0x4c   :  { %6499 = shalt.err (!%p6496_p8)
}
  0x4d   :  { %62 = dma.hbm_to_vmem [thread:$0]  %s7918_s3, 8192, %s57_s19, [#allocation8], %s6532_s17, %s6532_s17, %s6533_s18  }
  0x4e   :  { %s6537_s14 = smov [#allocation12]   ;;  %s6500_s30 = scalar_lea.hbm %s7921_s6, 2048 }
  0x4f   :  { %s82_s15 = sshll.u32 %s6537_s14, 4  ;;  %p6501_p9 = scmp.ne.s32.totalorder %s7921_s6, %s6500_s30  ;;  %s83_s15 = int_to_ptr.vmem [resolvable:$true] %s82_s15 }
  0x50   :  { %p6504_p10 = scmp.lt.u32.totalorder %s6500_s30, %s7921_s6 }
  0x52   :  { %p6506_p11 = pnand %p6504_p10, %p6501_p9 }
  0x54   :  { %6509 = shalt.err (!%p6506_p11)
}
  0x55   :  { %s6510_s23 = scalar_lea.vmem %s83_s15, 2048  ;;  %p6515_p13 = scmp.lt.s32.totalorder %s83_s15, %s83_s15 }
  0x56   :  { %p6511_p12 = scmp.ne.s32.totalorder %s83_s15, %s6510_s23  ;;  %p6516_p0 = scmp.lt.s32.totalorder %s6510_s23, %s6510_s23 }
  0x58   :  { %p6517_p1 = por %p6516_p0, %p6515_p13 }
  0x5a   :  { %p6518_p2 = pnand %p6517_p1, %p6511_p12 }
  0x5c   :  { %6521 = shalt.err (!%p6518_p2)
}
  0x5d   :  { %s6538_s3 = smov 128   ;;  %s6539_s17 = smov 8  }
  0x5e   :  { %88 = dma.hbm_to_vmem [thread:$0]  %s7921_s6, 2048, %s83_s15, [#allocation11], %s6538_s3, %s6538_s3, %s6539_s17  }
  0x5f   :  { %6522 = dma.done.wait [#allocation5], 16  }
  0x60   :  { %6523 = vsyncadd [#allocation5], 4294967280 }
  0x61   :  { %6524 = dma.done.wait [#allocation4], 1536  }
  0x62   :  { %6525 = vsyncadd [#allocation4], 4294965760 }
  0x63   :  { %6526 = dma.done.wait [#allocation8], 16384  }
  0x64   :  { %6527 = vsyncadd [#allocation8], 4294950912 }
  0x65   :  { %6528 = dma.done.wait [#allocation11], 10240  }
  0x66   :  { %6529 = vsyncadd [#allocation11], 4294957056 }
  0x67   :  { %109 = sfence }
  0x68   :  { %v482_v0 = vld [vmem:[#allocation10 + $0x8] sm:$0xff]  ;;  %v481_v2 = vld [vmem:[#allocation10] sm:$0xff]  ;;  %v7925_v7 = vmov 0.0   ;;  %v484_v12 = vld [vmem:[#allocation10 + $0x18] sm:$0xff]  ;;  %s6772_s6 = sld [smem:[#allocation3]]  ;;  %s4519_s1 = sld [smem:[#allocation3 + $0x1]] }
  0x69   :  { %v486_v1 = vld [vmem:[#allocation10 + $0x28] sm:$0xff]  ;;  %v485_v4 = vld [vmem:[#allocation10 + $0x20] sm:$0xff]  ;;  %631 = vmatprep.mubr.f32.mxu0 %v7925_v7  ;;  %110 = vst [vmem:[#allocation2] sm:$0xff] %v7925_v7  ;;  %111 = vst [vmem:[#allocation2 + $0x8] sm:$0xff] %v7925_v7  ;;  %702 = vmatprep.mubr.f32.mxu1 %v7925_v7  ;;  %s6777_s24 = sld [smem:[#allocation3 + $0x8]]  ;;  %s4543_s13 = sld [smem:[#allocation3 + $0x9]] }
  0x6a   :  { %v6670_v3 = vpack.c.bf16 %v486_v1, %v482_v0  ;;  %v490_v5 = vld [vmem:[#allocation10 + $0x48] sm:$0xff]  ;;  %112 = vst [vmem:[#allocation2 + $0x10] sm:$0xff] %v7925_v7  ;;  %113 = vst [vmem:[#allocation2 + $0x18] sm:$0xff] %v7925_v7  ;;  %v6706_v8 = vpack.c.bf16 %v485_v4, %v481_v2  ;;  %v489_v10 = vld [vmem:[#allocation10 + $0x40] sm:$0xff]  ;;  %s4546_s18 = sld [smem:[#allocation3 + $0xa]]  ;;  %vm6542_vm1 = vmmov 0  }
  0x6b   :  { %v494_v6 = vld [vmem:[#allocation10 + $0x68] sm:$0xff]  ;;  %114 = vst [vmem:[#allocation2 + $0x20] sm:$0xff] %v7925_v7  ;;  %115 = vst [vmem:[#allocation2 + $0x28] sm:$0xff] %v7925_v7  ;;  %v493_v11 = vld [vmem:[#allocation10 + $0x60] sm:$0xff] }
  0x6c   :  { %8055 = vst [vmem:[#allocation17_spill] sm:$0xff] %v6670_v3  ;;  %116 = vst [vmem:[#allocation2 + $0x30] sm:$0xff] %v7925_v7  ;;  %v6708_v9 = vpack.c.bf16 %v494_v6, %v490_v5  ;;  %4634 = vmatprep.subr.bf16.mxu0 %v6670_v3  ;;  %v488_v13 = vld [vmem:[#allocation10 + $0x38] sm:$0xff]  ;;  %v483_v14 = vld [vmem:[#allocation10 + $0x10] sm:$0xff]  ;;  %v6712_v16 = vpack.c.bf16 %v493_v11, %v489_v10 }
  0x6d   :  { %117 = vst [vmem:[#allocation2 + $0x38] sm:$0xff] %v7925_v7  ;;  %118 = vst [vmem:[#allocation2 + $0x40] sm:$0xff] %v7925_v7  ;;  %v487_v15 = vld [vmem:[#allocation10 + $0x30] sm:$0xff]  ;;  %4636 = vmatpush1.bf16.msra.mxu0 %v6706_v8  ;;  %v6714_v17 = vpack.c.bf16 %v488_v13, %v484_v12  ;;  %v498_v19 = vld [vmem:[#allocation10 + $0x88] sm:$0xff] }
  0x6e   :  { %119 = vst [vmem:[#allocation2 + $0x48] sm:$0xff] %v7925_v7  ;;  %120 = vst [vmem:[#allocation2 + $0x50] sm:$0xff] %v7925_v7  ;;  %v6716_v18 = vpack.c.bf16 %v487_v15, %v483_v14  ;;  %v502_v20 = vld [vmem:[#allocation10 + $0xa8] sm:$0xff]  ;;  %v497_v21 = vld [vmem:[#allocation10 + $0x80] sm:$0xff]  ;;  %4638 = vmatprep.subr.bf16.mxu0 %v6708_v9  ;;  %s143_s25 = sshra.s32 %s6772_s6, 3  ;;  %s146_s27 = sand.u32 7, %s6772_s6 }
  0x6f   :  { %121 = vst [vmem:[#allocation2 + $0x58] sm:$0xff] %v7925_v7  ;;  %122 = vst [vmem:[#allocation2 + $0x60] sm:$0xff] %v7925_v7  ;;  %v6719_v22 = vpack.c.bf16 %v502_v20, %v498_v19  ;;  %v501_v23 = vld [vmem:[#allocation10 + $0xa0] sm:$0xff]  ;;  %v492_v24 = vld [vmem:[#allocation10 + $0x58] sm:$0xff]  ;;  %4666 = vmatprep.subr.bf16.mxu1 %v6714_v17  ;;  %s250_s26 = sshra.s32 %s6777_s24, 3  ;;  %s4565_s29 = sshll.u32 %s143_s25, 5 }
  0x70   :  { %123 = vst [vmem:[#allocation2 + $0x68] sm:$0xff] %v7925_v7  ;;  %124 = vst [vmem:[#allocation2 + $0x70] sm:$0xff] %v7925_v7  ;;  %v496_v25 = vld [vmem:[#allocation10 + $0x78] sm:$0xff]  ;;  %v491_v27 = vld [vmem:[#allocation10 + $0x50] sm:$0xff]  ;;  %4668 = vmatpush1.bf16.msra.mxu1 %v6716_v18  ;;  %v6728_v32 = vpack.c.bf16 %v501_v23, %v497_v21  ;;  %s253_s2 = sand.u32 7, %s6777_s24  ;;  %s4573_s28 = sshll.u32 %s250_s26, 5 }
  0x71   :  { %125 = vst [vmem:[#allocation2 + $0x78] sm:$0xff] %v7925_v7  ;;  %126 = vst [vmem:[#allocation2 + $0x80] sm:$0xff] %v7925_v7  ;;  %v6722_v26 = vpack.c.bf16 %v496_v25, %v492_v24  ;;  %v495_v28 = vld [vmem:[#allocation10 + $0x70] sm:$0xff]  ;;  %v506_v29 = vld [vmem:[#allocation10 + $0xc8] sm:$0xff]  ;;  %4640 = vmatpush1.bf16.msra.mxu0 %v6712_v16  ;;  %s6826_s9 = sadd.s32 %s4565_s29, %s146_s27  ;;  %s256_s10 = sadd.s32 %s4573_s28, %s253_s2 }
  0x72   :  { %127 = vst [vmem:[#allocation2 + $0x88] sm:$0xff] %v7925_v7  ;;  %128 = vst [vmem:[#allocation2 + $0x90] sm:$0xff] %v7925_v7  ;;  %v6725_v30 = vpack.c.bf16 %v495_v28, %v491_v27  ;;  %v510_v31 = vld [vmem:[#allocation10 + $0xe8] sm:$0xff]  ;;  %v500_v33 = vld [vmem:[#allocation10 + $0x98] sm:$0xff]  ;;  %4642 = vmatprep.subr.bf16.mxu0 %v6719_v22  ;;  %s150_s11 = scalar_lea.vmem [#allocation6], %s6826_s9  ;;  %s257_s12 = scalar_lea.vmem [#allocation6], %s256_s10 }
  0x73   :  { %129 = vst [vmem:[#allocation2 + $0x98] sm:$0xff] %v7925_v7  ;;  %130 = vst [vmem:[#allocation2 + $0xa0] sm:$0xff] %v7925_v7  ;;  %4670 = vmatprep.subr.bf16.mxu1 %v6722_v26  ;;  %v504_v34 = vld [vmem:[#allocation10 + $0xb8] sm:$0xff]  ;;  %v499_v35 = vld [vmem:[#allocation10 + $0x90] sm:$0xff]  ;;  %v6732_v36 = vpack.c.bf16 %v510_v31, %v506_v29  ;;  %s159_s14 = sshra.s32 %s4519_s1, 3  ;;  %s162_s15 = sand.u32 7, %s4519_s1 }
  0x74   :  { %131 = vst [vmem:[#allocation2 + $0xa8] sm:$0xff] %v7925_v7  ;;  %132 = vst [vmem:[#allocation2 + $0xb0] sm:$0xff] %v7925_v7  ;;  %v505_v37 = vld [vmem:[#allocation10 + $0xc0] sm:$0xff]  ;;  %v6734_v39 = vpack.c.bf16 %v504_v34, %v500_v33  ;;  %v503_v40 = vld [vmem:[#allocation10 + $0xb0] sm:$0xff]  ;;  %4672 = vmatpush1.bf16.msra.mxu1 %v6725_v30  ;;  %s4566_s16 = sshll.u32 %s159_s14, 5  ;;  %s263_s4 = sshra.s32 %s4543_s13, 3 }
  0x75   :  { %133 = vst [vmem:[#allocation2 + $0xb8] sm:$0xff] %v7925_v7  ;;  %134 = vst [vmem:[#allocation2 + $0xc0] sm:$0xff] %v7925_v7  ;;  %v509_v38 = vld [vmem:[#allocation10 + $0xe0] sm:$0xff]  ;;  %v514_v41 = vld [vmem:[#allocation10 + $0x108] sm:$0xff]  ;;  %v6737_v44 = vpack.c.bf16 %v503_v40, %v499_v35  ;;  %4644 = vmatpush1.bf16.msra.mxu0 %v6728_v32  ;;  %s165_s30 = sadd.s32 %s4566_s16, %s162_s15  ;;  %s266_s20 = sand.u32 7, %s4543_s13 }
  0x76   :  { %135 = vst [vmem:[#allocation2 + $0xc8] sm:$0xff] %v7925_v7  ;;  %136 = vst [vmem:[#allocation2 + $0xd0] sm:$0xff] %v7925_v7  ;;  %v518_v42 = vld [vmem:[#allocation10 + $0x128] sm:$0xff]  ;;  %v508_v43 = vld [vmem:[#allocation10 + $0xd8] sm:$0xff]  ;;  %v6740_v46 = vpack.c.bf16 %v509_v38, %v505_v37  ;;  %4674 = vmatprep.subr.bf16.mxu1 %v6734_v39  ;;  %4646 = vmatprep.subr.bf16.mxu0 %v6732_v36  ;;  %s4574_s0 = sshll.u32 %s263_s4, 5  ;;  %s166_s21 = scalar_lea.vmem [#allocation6], %s165_s30 }
  0x77   :  { %137 = vst [vmem:[#allocation2 + $0xd8] sm:$0xff] %v7925_v7  ;;  %138 = vst [vmem:[#allocation2 + $0xe0] sm:$0xff] %v7925_v7  ;;  %v512_v45 = vld [vmem:[#allocation10 + $0xf8] sm:$0xff]  ;;  %v513_v47 = vld [vmem:[#allocation10 + $0x100] sm:$0xff]  ;;  %v6746_v51 = vpack.c.bf16 %v518_v42, %v514_v41  ;;  %s269_s22 = sadd.s32 %s4574_s0, %s266_s20  ;;  %s276_s25 = sshra.s32 %s4546_s18, 3 }
  0x78   :  { %139 = vst [vmem:[#allocation2 + $0xe8] sm:$0xff] %v7925_v7  ;;  %140 = vst [vmem:[#allocation2 + $0xf0] sm:$0xff] %v7925_v7  ;;  %v6743_v48 = vpack.c.bf16 %v512_v45, %v508_v43  ;;  %v507_v49 = vld [vmem:[#allocation10 + $0xd0] sm:$0xff]  ;;  %v517_v52 = vld [vmem:[#allocation10 + $0x120] sm:$0xff]  ;;  %4676 = vmatpush1.bf16.msra.mxu1 %v6737_v44  ;;  %s270_s23 = scalar_lea.vmem [#allocation6], %s269_s22  ;;  %s279_s27 = sand.u32 7, %s4546_s18 }
  0x79   :  { %141 = vst [vmem:[#allocation2 + $0xf8] sm:$0xff] %v7925_v7  ;;  %8056 = vst [vmem:[#allocation18_spill] sm:$0xff] %v6714_v17  ;;  %v511_v50 = vld [vmem:[#allocation10 + $0xf0] sm:$0xff]  ;;  %v516_v53 = vld [vmem:[#allocation10 + $0x118] sm:$0xff]  ;;  %4648 = vmatpush1.bf16.msra.mxu0 %v6740_v46  ;;  %v6752_v58 = vpack.c.bf16 %v517_v52, %v513_v47  ;;  %s4575_s29 = sshll.u32 %s276_s25, 5  ;;  %s4525_s10 = sld [smem:[#allocation3 + $0x3]] }
  0x7a   :  { %v520_v54 = vld [vmem:[#allocation10 + $0x138] sm:$0xff]  ;;  %v522_v55 = vld [vmem:[#allocation10 + $0x148] sm:$0xff]  ;;  %v6749_v57 = vpack.c.bf16 %v511_v50, %v507_v49  ;;  %4678 = vmatprep.subr.bf16.mxu1 %v6743_v48  ;;  %v521_v59 = vld [vmem:[#allocation10 + $0x140] sm:$0xff]  ;;  %4650 = vmatprep.subr.bf16.mxu0 %v6746_v51  ;;  %s282_s28 = sadd.s32 %s4575_s29, %s279_s27  ;;  %s4552_s22 = sld [smem:[#allocation3 + $0xc]] }
  0x7b   :  { %v526_v56 = vld [vmem:[#allocation10 + $0x168] sm:$0xff]  ;;  %v6755_v60 = vpack.c.bf16 %v520_v54, %v516_v53  ;;  %v515_v61 = vld [vmem:[#allocation10 + $0x110] sm:$0xff]  ;;  %v525_v0 = vld [vmem:[#allocation10 + $0x160] sm:$0xff]  ;;  %s283_s9 = scalar_lea.vmem [#allocation6], %s282_s28  ;;  %s4531_s27 = sld [smem:[#allocation3 + $0x5]] }
  0x7c   :  { %v519_v62 = vld [vmem:[#allocation10 + $0x130] sm:$0xff]  ;;  %v6758_v63 = vpack.c.bf16 %v526_v56, %v522_v55  ;;  %v524_v1 = vld [vmem:[#allocation10 + $0x158] sm:$0xff]  ;;  %v530_v4 = vld [vmem:[#allocation10 + $0x188] sm:$0xff]  ;;  %4680 = vmatpush1.bf16.msra.mxu1 %v6749_v57  ;;  %v6764_v10 = vpack.c.bf16 %v525_v0, %v521_v59  ;;  %s4555_s29 = sld [smem:[#allocation3 + $0xd]] }
  0x7d   :  { %v528_v2 = vld [vmem:[#allocation10 + $0x178] sm:$0xff]  ;;  %v534_v5 = vld [vmem:[#allocation10 + $0x1a8] sm:$0xff]  ;;  %v6761_v6 = vpack.c.bf16 %v519_v62, %v515_v61  ;;  %4652 = vmatpush1.bf16.msra.mxu0 %v6752_v58  ;;  %4682 = vmatprep.subr.bf16.mxu1 %v6755_v60  ;;  %v529_v11 = vld [vmem:[#allocation10 + $0x180] sm:$0xff] }
  0x7e   :  { %v6767_v12 = vpack.c.bf16 %v528_v2, %v524_v1  ;;  %v523_v13 = vld [vmem:[#allocation10 + $0x150] sm:$0xff]  ;;  %4654 = vmatprep.subr.bf16.mxu0 %v6758_v63  ;;  %v6770_v15 = vpack.c.bf16 %v534_v5, %v530_v4  ;;  %v533_v19 = vld [vmem:[#allocation10 + $0x1a0] sm:$0xff]  ;;  %v532_v20 = vld [vmem:[#allocation10 + $0x198] sm:$0xff] }
  0x7f   :  { %v527_v14 = vld [vmem:[#allocation10 + $0x170] sm:$0xff]  ;;  %v536_v21 = vld [vmem:[#allocation10 + $0x1b8] sm:$0xff]  ;;  %v538_v23 = vld [vmem:[#allocation10 + $0x1c8] sm:$0xff]  ;;  %v6780_v27 = vpack.c.bf16 %v533_v19, %v529_v11  ;;  %s188_s1 = sand.u32 7, %s4525_s10 }
  0x80   :  { %v542_v24 = vld [vmem:[#allocation10 + $0x1e8] sm:$0xff]  ;;  %4684 = vmatpush1.bf16.msra.mxu1 %v6761_v6  ;;  %v6775_v25 = vpack.c.bf16 %v527_v14, %v523_v13  ;;  %v537_v28 = vld [vmem:[#allocation10 + $0x1c0] sm:$0xff]  ;;  %v6783_v29 = vpack.c.bf16 %v536_v21, %v532_v20  ;;  %v531_v31 = vld [vmem:[#allocation10 + $0x190] sm:$0xff] }
  0x81   :  { %4656 = vmatpush1.bf16.msra.mxu0 %v6764_v10  ;;  %4686 = vmatprep.subr.bf16.mxu1 %v6767_v12  ;;  %v535_v33 = vld [vmem:[#allocation10 + $0x1b0] sm:$0xff]  ;;  %v6786_v34 = vpack.c.bf16 %v542_v24, %v538_v23  ;;  %v541_v35 = vld [vmem:[#allocation10 + $0x1e0] sm:$0xff]  ;;  %v540_v37 = vld [vmem:[#allocation10 + $0x1d8] sm:$0xff]  ;;  %s214_s28 = sand.u32 7, %s4531_s27 }
  0x82   :  { %4658 = vmatprep.subr.bf16.mxu0 %v6770_v15  ;;  %v544_v38 = vld [vmem:[#allocation10 + $0x1f8] sm:$0xff]  ;;  %v354_v40 = vld [vmem:[#allocation7 + $0x8] sm:$0xff]  ;;  %v6789_v42 = vpack.c.bf16 %v535_v33, %v531_v31  ;;  %v6792_v43 = vpack.c.bf16 %v541_v35, %v537_v28  ;;  %v353_v47 = vld [vmem:[#allocation7] sm:$0xff]  ;;  %v7924_v35 = vlaneseq }
  0x83   :  { %v358_v41 = vld [vmem:[#allocation7 + $0x28] sm:$0xff]  ;;  %v6795_v45 = vpack.c.bf16 %v544_v38, %v540_v37  ;;  %v539_v49 = vld [vmem:[#allocation10 + $0x1d0] sm:$0xff]  ;;  %v357_v53 = vld [vmem:[#allocation7 + $0x20] sm:$0xff] }
  0x84   :  { %4688 = vmatpush1.bf16.msra.mxu1 %v6775_v25  ;;  %v543_v50 = vld [vmem:[#allocation10 + $0x1f0] sm:$0xff]  ;;  %v6798_v52 = vpack.c.bf16 %v358_v41, %v354_v40  ;;  %v356_v54 = vld [vmem:[#allocation7 + $0x18] sm:$0xff]  ;;  %v362_v56 = vld [vmem:[#allocation7 + $0x48] sm:$0xff]  ;;  %v6807_v62 = vpack.c.bf16 %v357_v53, %v353_v47  ;;  %vm6844_vm0 = vcmp.lt.s32.totalorder %v7924_v35, 512 }
  0x85   :  { %4660 = vmatpush1.bf16.msra.mxu0 %v6780_v27  ;;  %4690 = vmatprep.subr.bf16.mxu1 %v6783_v29  ;;  %v360_v55 = vld [vmem:[#allocation7 + $0x38] sm:$0xff]  ;;  %v366_v59 = vld [vmem:[#allocation7 + $0x68] sm:$0xff]  ;;  %v6802_v61 = vpack.c.bf16 %v543_v50, %v539_v49  ;;  %v361_v0 = vld [vmem:[#allocation7 + $0x40] sm:$0xff] }
  0x86   :  { %4662 = vmatprep.subr.bf16.mxu0 %v6786_v34  ;;  %v6809_v1 = vpack.c.bf16 %v360_v55, %v356_v54  ;;  %v355_v2 = vld [vmem:[#allocation7 + $0x10] sm:$0xff]  ;;  %v6812_v5 = vpack.c.bf16 %v366_v59, %v362_v56  ;;  %v365_v11 = vld [vmem:[#allocation7 + $0x60] sm:$0xff]  ;;  %v364_v13 = vld [vmem:[#allocation7 + $0x58] sm:$0xff] }
  0x87   :  { %v359_v4 = vld [vmem:[#allocation7 + $0x30] sm:$0xff]  ;;  %v368_v14 = vld [vmem:[#allocation7 + $0x78] sm:$0xff]  ;;  %v370_v19 = vld [vmem:[#allocation7 + $0x88] sm:$0xff]  ;;  %v6821_v23 = vpack.c.bf16 %v365_v11, %v361_v0  ;;  %v8064_v0 = vmov 0 }
  0x88   :  { %4692 = vmatpush1.bf16.msra.mxu1 %v6789_v42  ;;  %8057 = vst [vmem:[#allocation19_spill] sm:$0xff] %v6809_v1  ;;  %v374_v20 = vld [vmem:[#allocation7 + $0xa8] sm:$0xff]  ;;  %v6818_v21 = vpack.c.bf16 %v359_v4, %v355_v2  ;;  %v369_v24 = vld [vmem:[#allocation7 + $0x80] sm:$0xff]  ;;  %v6824_v28 = vpack.c.bf16 %v368_v14, %v364_v13  ;;  %v363_v31 = vld [vmem:[#allocation7 + $0x50] sm:$0xff]  ;;  %v8065_v0 = vsel %vm6844_vm0, 4294967295, %v8064_v0 }
  0x89   :  { %4664 = vmatpush1.bf16.msra.mxu0 %v6792_v43  ;;  %4694 = vmatprep.subr.bf16.mxu1 %v6795_v45  ;;  %8058 = vst [vmem:[#allocation20_spill] sm:$0xff] %v6821_v23  ;;  %v367_v33 = vld [vmem:[#allocation7 + $0x70] sm:$0xff]  ;;  %v6829_v37 = vpack.c.bf16 %v374_v20, %v370_v19  ;;  %v373_v38 = vld [vmem:[#allocation7 + $0xa0] sm:$0xff]  ;;  %v372_v40 = vld [vmem:[#allocation7 + $0x98] sm:$0xff] }
  0x8a   :  { %4698 = vmatprep.subr.bf16.mxu0 %v6798_v52  ;;  %8059 = vst [vmem:[#allocation21_spill] sm:$0xff] %v6824_v28  ;;  %v376_v41 = vld [vmem:[#allocation7 + $0xb8] sm:$0xff]  ;;  %v378_v47 = vld [vmem:[#allocation7 + $0xc8] sm:$0xff]  ;;  %v6834_v50 = vpack.c.bf16 %v367_v33, %v363_v31  ;;  %v6838_v53 = vpack.c.bf16 %v373_v38, %v369_v24  ;;  %v377_v54 = vld [vmem:[#allocation7 + $0xc0] sm:$0xff] }
  0x8b   :  { %8060 = vst [vmem:[#allocation22_spill] sm:$0xff] %v6829_v37  ;;  %v382_v49 = vld [vmem:[#allocation7 + $0xe8] sm:$0xff]  ;;  %v6841_v55 = vpack.c.bf16 %v376_v41, %v372_v40  ;;  %v371_v56 = vld [vmem:[#allocation7 + $0x90] sm:$0xff]  ;;  %8066 = vst [vmem:[#allocation26_spill] sm:$0xff] %v8065_v0 }
  0x8c   :  { %632 = vmatmul.mubr.f32.vlgmr.msra.gmra.mrb[0].mxu0 %v7925_v7  ;;  %4696 = vmatpush1.bf16.msra.mxu1 %v6802_v61  ;;  %8061 = vst [vmem:[#allocation23_spill] sm:$0xff] %v6834_v50  ;;  %8062 = vst [vmem:[#allocation24_spill] sm:$0xff] %v6838_v53  ;;  %v375_v59 = vld [vmem:[#allocation7 + $0xb0] sm:$0xff]  ;;  %v6849_v2 = vpack.c.bf16 %v382_v49, %v378_v47  ;;  %v381_v4 = vld [vmem:[#allocation7 + $0xe0] sm:$0xff] }
  0x8d   :  { %4700 = vmatpush1.bf16.msra.mxu0 %v6807_v62  ;;  %4730 = vmatprep.subr.bf16.mxu1 %v6809_v1  ;;  %8063 = vst [vmem:[#allocation25_spill] sm:$0xff] %v6841_v55  ;;  %v380_v11 = vld [vmem:[#allocation7 + $0xd8] sm:$0xff]  ;;  %v386_v14 = vld [vmem:[#allocation7 + $0x108] sm:$0xff]  ;;  %v6853_v24 = vpack.c.bf16 %v375_v59, %v371_v56  ;;  %v6858_v33 = vpack.c.bf16 %v381_v4, %v377_v54  ;;  %v385_v38 = vld [vmem:[#allocation7 + $0x100] sm:$0xff] }
  0x8e   :  { %4702 = vmatprep.subr.bf16.mxu0 %v6812_v5  ;;  %777 = vmatprep.mubr.f32.mxu0 %v7925_v7  ;;  %8067 = vst [vmem:[#allocation27_spill] sm:$0xff] %v6849_v2  ;;  %v384_v13 = vld [vmem:[#allocation7 + $0xf8] sm:$0xff]  ;;  %v390_v19 = vld [vmem:[#allocation7 + $0x128] sm:$0xff]  ;;  %v379_v41 = vld [vmem:[#allocation7 + $0xd0] sm:$0xff] }
  0x8f   :  { %703 = vmatmul.mubr.f32.vlgmr.msra.gmra.mrb[0].mxu1 %v7925_v7  ;;  %v151_v20 = vld [vmem:[%s150_s11] ss:$8 sm:$0xf]  ;;  %8068 = vst [vmem:[#allocation28_spill] sm:$0xff] %v6853_v24  ;;  %8069 = vst [vmem:[#allocation29_spill] sm:$0xff] %v6858_v33  ;;  %v6861_v40 = vpack.c.bf16 %v384_v13, %v380_v11  ;;  %v6866_v49 = vpack.c.bf16 %v390_v19, %v386_v14  ;;  %s4549_s11 = sld [smem:[#allocation3 + $0xb]] }
  0x90   :  { %4732 = vmatpush1.bf16.msra.mxu1 %v6818_v21  ;;  %848 = vmatprep.mubr.f32.mxu1 %v7925_v7  ;;  %156 = vst.msk [vmem:[#allocation2] ss:$8 sm:$0xf] %vm6844_vm0, %v151_v20  ;;  %v258_v31 = vld [vmem:[%s257_s12] ss:$8 sm:$0xf] }
  0x91   :  { %4704 = vmatpush1.bf16.msra.mxu0 %v6821_v23  ;;  %4734 = vmatprep.subr.bf16.mxu1 %v6824_v28  ;;  %8070 = vst [vmem:[#allocation30_spill] sm:$0xff] %v6861_v40  ;;  %v383_v47 = vld [vmem:[#allocation7 + $0xf0] sm:$0xff]  ;;  %260 = vst.msk [vmem:[#allocation2 + $0x1] ss:$8 sm:$0xf] %vm6844_vm0, %v258_v31  ;;  %v389_v56 = vld [vmem:[#allocation7 + $0x120] sm:$0xff] }
  0x92   :  { %4706 = vmatprep.subr.bf16.mxu0 %v6829_v37  ;;  %8071 = vst [vmem:[#allocation31_spill] sm:$0xff] %v6866_v49  ;;  %v388_v59 = vld [vmem:[#allocation7 + $0x118] sm:$0xff]  ;;  %v394_v35 = vld [vmem:[#allocation7 + $0x148] sm:$0xff]  ;;  %v6869_v4 = vpack.c.bf16 %v383_v47, %v379_v41  ;;  %v6872_v11 = vpack.c.bf16 %v389_v56, %v385_v38  ;;  %v393_v13 = vld [vmem:[#allocation7 + $0x140] sm:$0xff]  ;;  %s185_s12 = sshra.s32 %s4525_s10, 3  ;;  %s315_s10 = sshra.s32 %s4555_s29, 3 }
  0x93   :  { %v392_v20 = vld [vmem:[#allocation7 + $0x138] sm:$0xff]  ;;  %v398_v54 = vld [vmem:[#allocation7 + $0x168] sm:$0xff]  ;;  %v387_v14 = vld [vmem:[#allocation7 + $0x110] sm:$0xff]  ;;  %s4568_s13 = sshll.u32 %s185_s12, 5  ;;  %s318_s12 = sand.u32 7, %s4555_s29 }
  0x94   :  { %4736 = vmatpush1.bf16.msra.mxu1 %v6834_v50  ;;  %8072 = vst [vmem:[#allocation32_spill] sm:$0xff] %v6869_v4  ;;  %8073 = vst [vmem:[#allocation33_spill] sm:$0xff] %v6872_v11  ;;  %v6875_v31 = vpack.c.bf16 %v392_v20, %v388_v59  ;;  %v391_v19 = vld [vmem:[#allocation7 + $0x130] sm:$0xff]  ;;  %v6878_v7 = vpack.c.bf16 %v398_v54, %v394_v35  ;;  %v402_v41 = vld [vmem:[#allocation7 + $0x188] sm:$0xff]  ;;  %s191_s15 = sadd.s32 %s4568_s13, %s188_s1  ;;  %s4578_s1 = sshll.u32 %s315_s10, 5 }
  0x95   :  { %4708 = vmatpush1.bf16.msra.mxu0 %v6838_v53  ;;  %4738 = vmatprep.subr.bf16.mxu1 %v6841_v55  ;;  %v396_v53 = vld [vmem:[#allocation7 + $0x158] sm:$0xff]  ;;  %v406_v47 = vld [vmem:[#allocation7 + $0x1a8] sm:$0xff]  ;;  %v6881_v38 = vpack.c.bf16 %v391_v19, %v387_v14  ;;  %v401_v59 = vld [vmem:[#allocation7 + $0x180] sm:$0xff]  ;;  %s289_s14 = sshra.s32 %s4549_s11, 3  ;;  %s292_s16 = sand.u32 7, %s4549_s11 }
  0x96   :  { %4710 = vmatprep.subr.bf16.mxu0 %v6849_v2  ;;  %8074 = vst [vmem:[#allocation34_spill] sm:$0xff] %v6875_v31  ;;  %8075 = vst [vmem:[#allocation35_spill] sm:$0xff] %v6878_v7  ;;  %v397_v2 = vld [vmem:[#allocation7 + $0x160] sm:$0xff]  ;;  %v395_v35 = vld [vmem:[#allocation7 + $0x150] sm:$0xff]  ;;  %s4576_s4 = sshll.u32 %s289_s14, 5  ;;  %s192_s30 = scalar_lea.vmem [#allocation6], %s191_s15 }
  0x97   :  { %8076 = vst [vmem:[#allocation36_spill] sm:$0xff] %v6881_v38  ;;  %v6884_v56 = vpack.c.bf16 %v397_v2, %v393_v13  ;;  %v399_v54 = vld [vmem:[#allocation7 + $0x170] sm:$0xff]  ;;  %v410_v14 = vld [vmem:[#allocation7 + $0x1c8] sm:$0xff]  ;;  %s295_s20 = sadd.s32 %s4576_s4, %s292_s16  ;;  %s321_s14 = sadd.s32 %s4578_s1, %s318_s12 }
  0x98   :  { %4740 = vmatpush1.bf16.msra.mxu1 %v6853_v24  ;;  %v400_v24 = vld [vmem:[#allocation7 + $0x178] sm:$0xff]  ;;  %v414_v19 = vld [vmem:[#allocation7 + $0x1e8] sm:$0xff]  ;;  %v6893_v2 = vpack.c.bf16 %v399_v54, %v395_v35  ;;  %s296_s0 = scalar_lea.vmem [#allocation6], %s295_s20  ;;  %s322_s15 = scalar_lea.vmem [#allocation6], %s321_s14 }
  0x99   :  { %4712 = vmatpush1.bf16.msra.mxu0 %v6858_v33  ;;  %4742 = vmatprep.subr.bf16.mxu1 %v6861_v40  ;;  %8077 = vst [vmem:[#allocation37_spill] sm:$0xff] %v6884_v56  ;;  %v6887_v20 = vpack.c.bf16 %v400_v24, %v396_v53  ;;  %v405_v33 = vld [vmem:[#allocation7 + $0x1a0] sm:$0xff]  ;;  %v404_v40 = vld [vmem:[#allocation7 + $0x198] sm:$0xff]  ;;  %s4534_s16 = sld [smem:[#allocation3 + $0x6]] }
  0x9a   :  { %4714 = vmatprep.subr.bf16.mxu0 %v6866_v49  ;;  %v6890_v49 = vpack.c.bf16 %v406_v47, %v402_v41  ;;  %8080 = vst [vmem:[#allocation40_spill] sm:$0xff] %v6893_v2  ;;  %v6896_v13 = vpack.c.bf16 %v405_v33, %v401_v59  ;;  %v409_v53 = vld [vmem:[#allocation7 + $0x1c0] sm:$0xff]  ;;  %v403_v41 = vld [vmem:[#allocation7 + $0x190] sm:$0xff]  ;;  %s4558_s4 = sld [smem:[#allocation3 + $0xe]] }
  0x9b   :  { %8078 = vst [vmem:[#allocation38_spill] sm:$0xff] %v6887_v20  ;;  %v407_v47 = vld [vmem:[#allocation7 + $0x1b0] sm:$0xff] }
  0x9c   :  { %4744 = vmatpush1.bf16.msra.mxu1 %v6869_v4  ;;  %8079 = vst [vmem:[#allocation39_spill] sm:$0xff] %v6890_v49  ;;  %v408_v4 = vld [vmem:[#allocation7 + $0x1b8] sm:$0xff]  ;;  %8081 = vst [vmem:[#allocation41_spill] sm:$0xff] %v6896_v13  ;;  %v6905_v35 = vpack.c.bf16 %v407_v47, %v403_v41  ;;  %v415_v59 = vld [vmem:[#allocation7 + $0x1f0] sm:$0xff] }
  0x9d   :  { %4716 = vmatpush1.bf16.msra.mxu0 %v6872_v11  ;;  %4746 = vmatprep.subr.bf16.mxu1 %v6875_v31  ;;  %v6899_v24 = vpack.c.bf16 %v408_v4, %v404_v40  ;;  %v413_v11 = vld [vmem:[#allocation7 + $0x1e0] sm:$0xff]  ;;  %v412_v31 = vld [vmem:[#allocation7 + $0x1d8] sm:$0xff]  ;;  %v411_v4 = vld [vmem:[#allocation7 + $0x1d0] sm:$0xff] }
  0x9e   :  { %4718 = vmatprep.subr.bf16.mxu0 %v6878_v7  ;;  %v6902_v7 = vpack.c.bf16 %v414_v19, %v410_v14  ;;  %8084 = vst [vmem:[#allocation44_spill] sm:$0xff] %v6905_v35  ;;  %v6908_v33 = vpack.c.bf16 %v413_v11, %v409_v53  ;;  %v6915_v54 = vpack.c.bf16 %v415_v59, %v411_v4  ;;  %v8088_v14 = vmov 0.0   ;;  %v418_v11 = vld [vmem:[#allocation9 + $0x8] sm:$0xff]  ;;  %v424_v53 = vld [vmem:[#allocation9 + $0x38] sm:$0xff]  ;;  %v417_v41 = vld [vmem:[#allocation9] sm:$0xff] }
  0x9f   :  { %8082 = vst [vmem:[#allocation42_spill] sm:$0xff] %v6899_v24  ;;  %v421_v47 = vld [vmem:[#allocation9 + $0x20] sm:$0xff]  ;;  %s227_s20 = sand.u32 7, %s4534_s16 }
  0xa0   :  { %4748 = vmatpush1.bf16.msra.mxu1 %v6881_v38  ;;  %8083 = vst [vmem:[#allocation43_spill] sm:$0xff] %v6902_v7  ;;  %v416_v38 = vld [vmem:[#allocation7 + $0x1f8] sm:$0xff]  ;;  %8085 = vst [vmem:[#allocation45_spill] sm:$0xff] %v6908_v33  ;;  %v6928_v59 = vpack.c.bf16 %v421_v47, %v417_v41  ;;  %v429_v41 = vld [vmem:[#allocation9 + $0x60] sm:$0xff] }
  0xa1   :  { %4720 = vmatpush1.bf16.msra.mxu0 %v6884_v56  ;;  %4750 = vmatprep.subr.bf16.mxu1 %v6887_v20  ;;  %v6911_v40 = vpack.c.bf16 %v416_v38, %v412_v31  ;;  %8087 = vst [vmem:[#allocation47_spill] sm:$0xff] %v6915_v54  ;;  %v422_v31 = vld [vmem:[#allocation9 + $0x28] sm:$0xff]  ;;  %v420_v38 = vld [vmem:[#allocation9 + $0x18] sm:$0xff] }
  0xa2   :  { %4722 = vmatprep.subr.bf16.mxu0 %v6890_v49  ;;  %v6924_v19 = vpack.c.bf16 %v422_v31, %v418_v11  ;;  %v6926_v4 = vpack.c.bf16 %v424_v53, %v420_v38  ;;  %8091 = vst [vmem:[#allocation50_spill] sm:$0xff] %v6928_v59  ;;  %v430_v11 = vld [vmem:[#allocation9 + $0x68] sm:$0xff]  ;;  %v428_v31 = vld [vmem:[#allocation9 + $0x58] sm:$0xff]  ;;  %v425_v53 = vld [vmem:[#allocation9 + $0x40] sm:$0xff] }
  0xa3   :  { %8086 = vst [vmem:[#allocation46_spill] sm:$0xff] %v6911_v40  ;;  %v432_v38 = vld [vmem:[#allocation9 + $0x78] sm:$0xff] }
  0xa4   :  { %4752 = vmatpush1.bf16.msra.mxu1 %v6893_v2  ;;  %8089 = vst [vmem:[#allocation48_spill] sm:$0xff] %v6924_v19  ;;  %8090 = vst [vmem:[#allocation49_spill] sm:$0xff] %v6926_v4  ;;  %v6938_v47 = vpack.c.bf16 %v432_v38, %v428_v31  ;;  %v440_v31 = vld [vmem:[#allocation9 + $0xb8] sm:$0xff]  ;;  %v433_v38 = vld [vmem:[#allocation9 + $0x80] sm:$0xff] }
  0xa5   :  { %4724 = vmatpush1.bf16.msra.mxu0 %v6896_v13  ;;  %4754 = vmatprep.subr.bf16.mxu1 %v6899_v24  ;;  %v6940_v13 = vpack.c.bf16 %v429_v41, %v425_v53  ;;  %v437_v53 = vld [vmem:[#allocation9 + $0xa0] sm:$0xff]  ;;  %v468_v24 = vld [vmem:[#allocation9 + $0x198] sm:$0xff] }
  0xa6   :  { %4726 = vmatprep.subr.bf16.mxu0 %v6902_v7  ;;  %v426_v7 = vld [vmem:[#allocation9 + $0x48] sm:$0xff]  ;;  %8094 = vst [vmem:[#allocation53_spill] sm:$0xff] %v6938_v47  ;;  %v472_v49 = vld [vmem:[#allocation9 + $0x1b8] sm:$0xff] }
  0xa7   :  { %8095 = vst [vmem:[#allocation54_spill] sm:$0xff] %v6940_v13 }
  0xa8   :  { %4756 = vmatpush1.bf16.msra.mxu1 %v6905_v35  ;;  %v6936_v35 = vpack.c.bf16 %v430_v11, %v426_v7  ;;  %v438_v7 = vld [vmem:[#allocation9 + $0xa8] sm:$0xff]  ;;  %v436_v11 = vld [vmem:[#allocation9 + $0x98] sm:$0xff] }
  0xa9   :  { %4728 = vmatpush1.bf16.msra.mxu0 %v6908_v33  ;;  %4758 = vmatprep.subr.bf16.mxu1 %v6911_v40  ;;  %v419_v33 = vld [vmem:[#allocation9 + $0x10] sm:$0xff]  ;;  %v6950_v41 = vpack.c.bf16 %v440_v31, %v436_v11  ;;  %v448_v11 = vld [vmem:[#allocation9 + $0xf8] sm:$0xff]  ;;  %v441_v31 = vld [vmem:[#allocation9 + $0xc0] sm:$0xff] }
  0xaa   :  { %4762 = vmatprep.subr.bf16.mxu0 %v6924_v19  ;;  %8093 = vst [vmem:[#allocation52_spill] sm:$0xff] %v6936_v35  ;;  %v6952_v19 = vpack.c.bf16 %v437_v53, %v433_v38  ;;  %v445_v38 = vld [vmem:[#allocation9 + $0xe0] sm:$0xff] }
  0xab   :  { %8098 = vst [vmem:[#allocation57_spill] sm:$0xff] %v6950_v41 }
  0xac   :  { %778 = vmatmul.mubr.f32.vlgmr.msra.gmra.mrb[2].mxu0 %v8088_v14  ;;  %4760 = vmatpush1.bf16.msra.mxu1 %v6915_v54  ;;  %v423_v54 = vld [vmem:[#allocation9 + $0x30] sm:$0xff]  ;;  %8099 = vst [vmem:[#allocation58_spill] sm:$0xff] %v6952_v19 }
  0xad   :  { %941 = vmatprep.mubr.f32.mxu0 %v8088_v14  ;;  %v6931_v40 = vpack.c.bf16 %v423_v54, %v419_v33  ;;  %4794 = vmatprep.subr.bf16.mxu1 %v6926_v4  ;;  %v427_v33 = vld [vmem:[#allocation9 + $0x50] sm:$0xff] }
  0xae   :  { %4764 = vmatpush1.bf16.msra.mxu0 %v6928_v59  ;;  %v431_v54 = vld [vmem:[#allocation9 + $0x70] sm:$0xff] }
  0xaf   :  { %849 = vmatmul.mubr.f32.vlgmr.msra.gmra.mrb[2].mxu1 %v8088_v14  ;;  %8092 = vst [vmem:[#allocation51_spill] sm:$0xff] %v6931_v40  ;;  %4766 = vmatprep.subr.bf16.mxu0 %v6936_v35  ;;  %v6943_v4 = vpack.c.bf16 %v431_v54, %v427_v33  ;;  %v435_v33 = vld [vmem:[#allocation9 + $0x90] sm:$0xff]  ;;  %v6964_v35 = vpack.c.bf16 %v445_v38, %v441_v31  ;;  %v453_v31 = vld [vmem:[#allocation9 + $0x120] sm:$0xff] }
  0xb0   :  { %1012 = vmatprep.mubr.f32.mxu1 %v8088_v14  ;;  %4796 = vmatpush1.bf16.msra.mxu1 %v6931_v40  ;;  %v434_v40 = vld [vmem:[#allocation9 + $0x88] sm:$0xff]  ;;  %v439_v54 = vld [vmem:[#allocation9 + $0xb0] sm:$0xff] }
  0xb1   :  { %8096 = vst [vmem:[#allocation55_spill] sm:$0xff] %v6943_v4  ;;  %4798 = vmatprep.subr.bf16.mxu1 %v6938_v47  ;;  %v6948_v59 = vpack.c.bf16 %v438_v7, %v434_v40  ;;  %v6955_v47 = vpack.c.bf16 %v439_v54, %v435_v33  ;;  %v446_v40 = vld [vmem:[#allocation9 + $0xe8] sm:$0xff]  ;;  %v444_v7 = vld [vmem:[#allocation9 + $0xd8] sm:$0xff]  ;;  %8103 = vst [vmem:[#allocation62_spill] sm:$0xff] %v6964_v35 }
  0xb2   :  { %4768 = vmatpush1.bf16.msra.mxu0 %v6940_v13  ;;  %v6962_v53 = vpack.c.bf16 %v448_v11, %v444_v7  ;;  %v443_v33 = vld [vmem:[#allocation9 + $0xd0] sm:$0xff]  ;;  %v456_v7 = vld [vmem:[#allocation9 + $0x138] sm:$0xff]  ;;  %v449_v11 = vld [vmem:[#allocation9 + $0x100] sm:$0xff] }
  0xb3   :  { %8097 = vst [vmem:[#allocation56_spill] sm:$0xff] %v6948_v59  ;;  %4770 = vmatprep.subr.bf16.mxu0 %v6948_v59  ;;  %8100 = vst [vmem:[#allocation59_spill] sm:$0xff] %v6955_v47  ;;  %v447_v54 = vld [vmem:[#allocation9 + $0xf0] sm:$0xff]  ;;  %v6976_v59 = vpack.c.bf16 %v453_v31, %v449_v11  ;;  %v461_v11 = vld [vmem:[#allocation9 + $0x160] sm:$0xff] }
  0xb4   :  { %4800 = vmatpush1.bf16.msra.mxu1 %v6943_v4  ;;  %v442_v4 = vld [vmem:[#allocation9 + $0xc8] sm:$0xff]  ;;  %8102 = vst [vmem:[#allocation61_spill] sm:$0xff] %v6962_v53 }
  0xb5   :  { %4802 = vmatprep.subr.bf16.mxu1 %v6950_v41  ;;  %v6960_v13 = vpack.c.bf16 %v446_v40, %v442_v4  ;;  %v6967_v41 = vpack.c.bf16 %v447_v54, %v443_v33  ;;  %v454_v4 = vld [vmem:[#allocation9 + $0x128] sm:$0xff]  ;;  %v452_v40 = vld [vmem:[#allocation9 + $0x118] sm:$0xff]  ;;  %8107 = vst [vmem:[#allocation66_spill] sm:$0xff] %v6976_v59  ;;  %v451_v33 = vld [vmem:[#allocation9 + $0x110] sm:$0xff] }
  0xb6   :  { %4772 = vmatpush1.bf16.msra.mxu0 %v6952_v19  ;;  %v6974_v38 = vpack.c.bf16 %v456_v7, %v452_v40  ;;  %v455_v54 = vld [vmem:[#allocation9 + $0x130] sm:$0xff]  ;;  %v464_v40 = vld [vmem:[#allocation9 + $0x178] sm:$0xff]  ;;  %v457_v7 = vld [vmem:[#allocation9 + $0x140] sm:$0xff] }
  0xb7   :  { %8101 = vst [vmem:[#allocation60_spill] sm:$0xff] %v6960_v13  ;;  %4774 = vmatprep.subr.bf16.mxu0 %v6960_v13  ;;  %8104 = vst [vmem:[#allocation63_spill] sm:$0xff] %v6967_v41  ;;  %v6988_v13 = vpack.c.bf16 %v461_v11, %v457_v7  ;;  %v467_v7 = vld [vmem:[#allocation9 + $0x190] sm:$0xff] }
  0xb8   :  { %4804 = vmatpush1.bf16.msra.mxu1 %v6955_v47  ;;  %v450_v47 = vld [vmem:[#allocation9 + $0x108] sm:$0xff]  ;;  %8106 = vst [vmem:[#allocation65_spill] sm:$0xff] %v6974_v38 }
  0xb9   :  { %4806 = vmatprep.subr.bf16.mxu1 %v6962_v53  ;;  %v6972_v19 = vpack.c.bf16 %v454_v4, %v450_v47  ;;  %v6979_v53 = vpack.c.bf16 %v455_v54, %v451_v33  ;;  %v462_v47 = vld [vmem:[#allocation9 + $0x168] sm:$0xff]  ;;  %v460_v4 = vld [vmem:[#allocation9 + $0x158] sm:$0xff]  ;;  %8111 = vst [vmem:[#allocation70_spill] sm:$0xff] %v6988_v13  ;;  %v459_v33 = vld [vmem:[#allocation9 + $0x150] sm:$0xff] }
  0xba   :  { %4776 = vmatpush1.bf16.msra.mxu0 %v6964_v35  ;;  %v6986_v31 = vpack.c.bf16 %v464_v40, %v460_v4  ;;  %v463_v54 = vld [vmem:[#allocation9 + $0x170] sm:$0xff]  ;;  %v465_v4 = vld [vmem:[#allocation9 + $0x180] sm:$0xff] }
  0xbb   :  { %8105 = vst [vmem:[#allocation64_spill] sm:$0xff] %v6972_v19  ;;  %4778 = vmatprep.subr.bf16.mxu0 %v6972_v19  ;;  %8108 = vst [vmem:[#allocation67_spill] sm:$0xff] %v6979_v53  ;;  %v466_v19 = vld [vmem:[#allocation9 + $0x188] sm:$0xff]  ;;  %v469_v40 = vld [vmem:[#allocation9 + $0x1a0] sm:$0xff] }
  0xbc   :  { %4808 = vmatpush1.bf16.msra.mxu1 %v6967_v41  ;;  %v458_v41 = vld [vmem:[#allocation9 + $0x148] sm:$0xff]  ;;  %8110 = vst [vmem:[#allocation69_spill] sm:$0xff] %v6986_v31  ;;  %v7000_v11 = vpack.c.bf16 %v469_v40, %v465_v4  ;;  %v479_v4 = vld [vmem:[#allocation9 + $0x1f0] sm:$0xff] }
  0xbd   :  { %4810 = vmatprep.subr.bf16.mxu1 %v6974_v38  ;;  %v6984_v35 = vpack.c.bf16 %v462_v47, %v458_v41  ;;  %v470_v38 = vld [vmem:[#allocation9 + $0x1a8] sm:$0xff]  ;;  %v6997_v47 = vpack.c.bf16 %v472_v49, %v468_v24  ;;  %v476_v49 = vld [vmem:[#allocation9 + $0x1d8] sm:$0xff] }
  0xbe   :  { %4780 = vmatpush1.bf16.msra.mxu0 %v6976_v59  ;;  %v6991_v59 = vpack.c.bf16 %v463_v54, %v459_v33  ;;  %v6995_v41 = vpack.c.bf16 %v470_v38, %v466_v19  ;;  %8115 = vst [vmem:[#allocation74_spill] sm:$0xff] %v7000_v11  ;;  %v471_v33 = vld [vmem:[#allocation9 + $0x1b0] sm:$0xff]  ;;  %v474_v54 = vld [vmem:[#allocation9 + $0x1c8] sm:$0xff]  ;;  %v480_v24 = vld [vmem:[#allocation9 + $0x1f8] sm:$0xff] }
  0xbf   :  { %8109 = vst [vmem:[#allocation68_spill] sm:$0xff] %v6984_v35  ;;  %4782 = vmatprep.subr.bf16.mxu0 %v6984_v35  ;;  %8114 = vst [vmem:[#allocation73_spill] sm:$0xff] %v6997_v47  ;;  %v478_v35 = vld [vmem:[#allocation9 + $0x1e8] sm:$0xff]  ;;  %v473_v38 = vld [vmem:[#allocation9 + $0x1c0] sm:$0xff] }
  0xc0   :  { %4812 = vmatpush1.bf16.msra.mxu1 %v6979_v53  ;;  %8112 = vst [vmem:[#allocation71_spill] sm:$0xff] %v6991_v59  ;;  %8113 = vst [vmem:[#allocation72_spill] sm:$0xff] %v6995_v41  ;;  %v7006_v19 = vpack.c.bf16 %v478_v35, %v474_v54  ;;  %v477_v53 = vld [vmem:[#allocation9 + $0x1e0] sm:$0xff] }
  0xc1   :  { %4814 = vmatprep.subr.bf16.mxu1 %v6986_v31  ;;  %v7004_v31 = vpack.c.bf16 %v471_v33, %v467_v7  ;;  %v7011_v40 = vpack.c.bf16 %v477_v53, %v473_v38  ;;  %v709_v35 = vld [vmem:[#allocation2] sm:$0xff]  ;;  %v710_v33 = vld [vmem:[#allocation2 + $0x8] sm:$0xff]  ;;  %v712_v38 = vld [vmem:[#allocation2 + $0x18] sm:$0xff] }
  0xc2   :  { %4784 = vmatpush1.bf16.msra.mxu0 %v6988_v13  ;;  %8117 = vst [vmem:[#allocation76_spill] sm:$0xff] %v7006_v19  ;;  %v7008_v13 = vpack.c.bf16 %v480_v24, %v476_v49 }
  0xc3   :  { %4786 = vmatprep.subr.bf16.mxu0 %v6995_v41  ;;  %8116 = vst [vmem:[#allocation75_spill] sm:$0xff] %v7004_v31  ;;  %8119 = vst [vmem:[#allocation78_spill] sm:$0xff] %v7011_v40 }
  0xc4   :  { %4816 = vmatpush1.bf16.msra.mxu1 %v6991_v59  ;;  %8118 = vst [vmem:[#allocation77_spill] sm:$0xff] %v7008_v13  ;;  %v475_v59 = vld [vmem:[#allocation9 + $0x1d0] sm:$0xff] }
  0xc5   :  { %4818 = vmatprep.subr.bf16.mxu1 %v6997_v47  ;;  %v7015_v7 = vpack.c.bf16 %v479_v4, %v475_v59 }
  0xc6   :  { %4788 = vmatpush1.bf16.msra.mxu0 %v7000_v11 }
  0xc7   :  { %4790 = vmatprep.subr.bf16.mxu0 %v7006_v19  ;;  %8120 = vst [vmem:[#allocation79_spill] sm:$0xff] %v7015_v7 }
  0xc8   :  { %4820 = vmatpush1.bf16.msra.mxu1 %v7004_v31 }
  0xc9   :  { %4822 = vmatprep.subr.bf16.mxu1 %v7008_v13 }
  0xca   :  { %4792 = vmatpush1.bf16.msra.mxu0 %v7011_v40  ;;  %v711_v40 = vld [vmem:[#allocation2 + $0x10] sm:$0xff] }
  0xcb   :  { %4826 = vmatprep.subr.bf16.mxu0 %v6670_v3 }
  0xcc   :  { %4824 = vmatpush1.bf16.msra.mxu1 %v7015_v7 }
  0xcd   :  { %4858 = vmatprep.subr.bf16.mxu1 %v6714_v17 }
 0x17f   :  { %v779_v53 = vpop.f32.mrb[2].mxu0 }
 0x180   :  { %v855_v54 = vadd.f32 %v779_v53, %v709_v35  ;;  %v781_v49 = vpop.f32.mrb[3].mxu0 }
 0x181   :  { %v856_v24 = vadd.f32 %v781_v49, %v710_v33 }
 0x182   :  { %v859_v19 = vmul.f32 0.5, %v855_v54  ;;  %v850_v59 = vpop.f32.mrb[2].mxu1 }
 0x183   :  { %v860_v4 = vmul.f32 0.5, %v856_v24  ;;  %v852_v31 = vpop.f32.mrb[3].mxu1  ;;  %v857_v7 = vadd.f32 %v850_v59, %v711_v40 }
 0x184   :  { %6238 = vtanh.f32 %v859_v19  ;;  %v858_v13 = vadd.f32 %v852_v31, %v712_v38 }
 0x185   :  { %6240 = vtanh.f32 %v860_v4  ;;  %v861_v3 = vmul.f32 0.5, %v857_v7 }
 0x186   :  { %6242 = vtanh.f32 %v858_v13 }
 0x187   :  { %6244 = vtanh.f32 %v861_v3  ;;  %v167_v3 = vld [vmem:[%s166_s21] ss:$8 sm:$0xf]  ;;  %s4528_s21 = sld [smem:[#allocation3 + $0x4]] }
 0x188   :  { %169 = vst.msk [vmem:[#allocation2 + $0x20] ss:$8 sm:$0xf] %vm6844_vm0, %v167_v3 }
 0x18d   :  { %s201_s3 = sand.u32 7, %s4528_s21 }
 0x18e   :  { %v6239_v11 = vpop.eup %6238 }
 0x18f   :  { %v6241_v17 = vpop.eup %6240  ;;  %v865_v47 = vmul.f32 0.5, %v6239_v11 }
 0x190   :  { %v6243_v41 = vpop.eup %6242  ;;  %v866_v2 = vmul.f32 0.5, %v6241_v17  ;;  %v271_v17 = vld [vmem:[%s270_s23] ss:$8 sm:$0xf]  ;;  %s198_s23 = sshra.s32 %s4528_s21, 3  ;;  %s328_s21 = sshra.s32 %s4558_s4, 3 }
 0x191   :  { %v868_v35 = vadd.f32 0.5, %v865_v47  ;;  %v6245_v31 = vpop.eup %6244  ;;  %273 = vst.msk [vmem:[#allocation2 + $0x21] ss:$8 sm:$0xf] %vm6844_vm0, %v271_v17  ;;  %v545_v47 = vld [vmem:[%s7920_s5] sm:$0xf] }
 0x192   :  { %v869_v33 = vadd.f32 0.5, %v866_v2  ;;  %v867_v19 = vmul.f32 0.5, %v6245_v31  ;;  %v8121_v2 = vlaneseq  ;;  %s4522_s5 = sld [smem:[#allocation3 + $0x2]]  ;;  %s4569_s17 = sshll.u32 %s198_s23, 5 }
 0x193   :  { %v873_v53 = vmul.f32 %v6243_v41, %v868_v35  ;;  %s204_s18 = sadd.s32 %s4569_s17, %s201_s3  ;;  %s331_s23 = sand.u32 7, %s4558_s4 }
 0x194   :  { %v872_v54 = vmul.f32 0.0, %v869_v33  ;;  %v870_v24 = vadd.f32 0.5, %v867_v19  ;;  %s4579_s3 = sshll.u32 %s328_s21, 5 }
 0x196   :  { %v7022_v49 = vadd.f32 %v873_v53, %v872_v54 }
 0x198   :  { %6246 = vtanh.f32 %v7022_v49  ;;  %s172_s19 = sshra.s32 %s4522_s5, 3  ;;  %s175_s6 = sand.u32 7, %s4522_s5 }
 0x199   :  { %s4567_s24 = sshll.u32 %s172_s19, 5  ;;  %s302_s5 = sshra.s32 %s4552_s22, 3 }
 0x19a   :  { %s178_s26 = sadd.s32 %s4567_s24, %s175_s6  ;;  %s305_s19 = sand.u32 7, %s4552_s22 }
 0x19b   :  { %s179_s2 = scalar_lea.vmem [#allocation6], %s178_s26  ;;  %s4577_s6 = sshll.u32 %s302_s5, 5 }
 0x19c   :  { %s205_s24 = scalar_lea.vmem [#allocation6], %s204_s18  ;;  %s308_s25 = sadd.s32 %s4577_s6, %s305_s19 }
 0x19d   :  { %s309_s26 = scalar_lea.vmem [#allocation6], %s308_s25  ;;  %s334_s5 = sadd.s32 %s4579_s3, %s331_s23 }
 0x19e   :  { %s335_s18 = scalar_lea.vmem [#allocation6], %s334_s5  ;;  %s4537_s19 = sld [smem:[#allocation3 + $0x7]] }
 0x19f   :  { %s4561_s6 = sld [smem:[#allocation3 + $0xf]] }
 0x1a2   :  { %v6247_v13 = vpop.eup %6246 }
 0x1a3   :  { %v7025_v40 = vmul.f32 %v6247_v13, %v870_v24 }
 0x1a4   :  { %s240_s25 = sand.u32 7, %s4537_s19 }
 0x1a5   :  { %942 = vmatmul.mubr.f32.vlgmr.msra.gmra.mrb[0].mxu0 %v7025_v40  ;;  %1013 = vmatmul.mubr.f32.vlgmr.msra.gmra.mrb[0].mxu1 %v7025_v40 }
 0x1a6   :  { %4828 = vmatpush1.bf16.msra.mxu0 %v6706_v8  ;;  %4860 = vmatpush1.bf16.msra.mxu1 %v6716_v18 }
 0x1a7   :  { %4830 = vmatprep.subr.bf16.mxu0 %v6708_v9  ;;  %4862 = vmatprep.subr.bf16.mxu1 %v6722_v26 }
 0x1a8   :  { %1105 = vmatprep.mubr.f32.mxu0 %v8088_v14  ;;  %1176 = vmatprep.mubr.f32.mxu1 %v8088_v14  ;;  %v548_v14 = vshrl.u32 %v8121_v2, 7 }
 0x1aa   :  { %4832 = vmatpush1.bf16.msra.mxu0 %v6712_v16  ;;  %4864 = vmatpush1.bf16.msra.mxu1 %v6725_v30  ;;  %v549_v41 = vsub.s32 0, %v548_v14  ;;  %v553_v11 = vsub.s32 1, %v548_v14  ;;  %v561_v38 = vsub.s32 3, %v548_v14  ;;  %v557_v19 = vsub.s32 2, %v548_v14 }
 0x1ab   :  { %4834 = vmatprep.subr.bf16.mxu0 %v6719_v22  ;;  %4866 = vmatprep.subr.bf16.mxu1 %v6734_v39 }
 0x1ac   :  { %v7071_v7 = vrot.slane %v545_v47, %v549_v41  ;;  %v7073_v59 = vrot.slane %v545_v47, %v553_v11  ;;  %v7076_v54 = vrot.slane %v545_v47, %v561_v38  ;;  %v7080_v2 = vrot.slane %v545_v47, %v557_v19 }
 0x1ae   :  { %4836 = vmatpush1.bf16.msra.mxu0 %v6728_v32  ;;  %4868 = vmatpush1.bf16.msra.mxu1 %v6737_v44  ;;  %8122 = vst [vmem:[#allocation80_spill] sm:$0xff] %v7071_v7 }
 0x1af   :  { %4838 = vmatprep.subr.bf16.mxu0 %v6732_v36  ;;  %4870 = vmatprep.subr.bf16.mxu1 %v6743_v48 }
 0x1b2   :  { %4840 = vmatpush1.bf16.msra.mxu0 %v6740_v46  ;;  %4872 = vmatpush1.bf16.msra.mxu1 %v6749_v57 }
 0x1b3   :  { %4842 = vmatprep.subr.bf16.mxu0 %v6746_v51  ;;  %4874 = vmatprep.subr.bf16.mxu1 %v6755_v60 }
 0x1b6   :  { %4844 = vmatpush1.bf16.msra.mxu0 %v6752_v58  ;;  %4876 = vmatpush1.bf16.msra.mxu1 %v6761_v6 }
 0x1b7   :  { %4846 = vmatprep.subr.bf16.mxu0 %v6758_v63  ;;  %4878 = vmatprep.subr.bf16.mxu1 %v6767_v12 }
 0x1ba   :  { %4848 = vmatpush1.bf16.msra.mxu0 %v6764_v10  ;;  %4880 = vmatpush1.bf16.msra.mxu1 %v6775_v25 }
 0x1bb   :  { %4850 = vmatprep.subr.bf16.mxu0 %v6770_v15  ;;  %4882 = vmatprep.subr.bf16.mxu1 %v6783_v29 }
 0x1be   :  { %4852 = vmatpush1.bf16.msra.mxu0 %v6780_v27  ;;  %4884 = vmatpush1.bf16.msra.mxu1 %v6789_v42 }
 0x1bf   :  { %4854 = vmatprep.subr.bf16.mxu0 %v6786_v34  ;;  %4886 = vmatprep.subr.bf16.mxu1 %v6795_v45 }
 0x1c2   :  { %4856 = vmatpush1.bf16.msra.mxu0 %v6792_v43  ;;  %4888 = vmatpush1.bf16.msra.mxu1 %v6802_v61 }
 0x1c3   :  { %4890 = vmatprep.subr.bf16.mxu0 %v6798_v52  ;;  %4922 = vmatprep.subr.bf16.mxu1 %v6809_v1 }
 0x278   :  { %v943_v4 = vpop.f32.mrb[0].mxu0  ;;  %v1014_v35 = vpop.f32.mrb[0].mxu1 }
 0x279   :  { %v1019_v33 = vadd.f32 %v943_v4, %v7071_v7  ;;  %v945_v53 = vpop.f32.mrb[1].mxu0  ;;  %v1016_v31 = vpop.f32.mrb[1].mxu1  ;;  %v1021_v41 = vadd.f32 %v1014_v35, %v7080_v2 }
 0x27a   :  { %v1020_v24 = vadd.f32 %v945_v53, %v7073_v59  ;;  %v1022_v17 = vadd.f32 %v1016_v31, %v7076_v54 }
 0x27b   :  { %v1023_v13 = vmul.f32 0.5, %v1019_v33  ;;  %v1025_v11 = vmul.f32 0.5, %v1021_v41  ;;  %v8126_v41 = vld [vmem:[#allocation30_spill] sm:$0xff] }
 0x27c   :  { %v1024_v3 = vmul.f32 0.5, %v1020_v24 }
 0x27d   :  { %6248 = vtanh.f32 %v1023_v13 }
 0x27e   :  { %6250 = vtanh.f32 %v1024_v3 }
 0x27f   :  { %6252 = vtanh.f32 %v1022_v17  ;;  %v8125_v17 = vld [vmem:[#allocation27_spill] sm:$0xff] }
 0x280   :  { %6254 = vtanh.f32 %v1025_v11  ;;  %v8127_v11 = vld [vmem:[#allocation29_spill] sm:$0xff] }
 0x287   :  { %v6249_v4 = vpop.eup %6248 }
 0x288   :  { %v1029_v7 = vmul.f32 0.5, %v6249_v4  ;;  %v6251_v38 = vpop.eup %6250  ;;  %v8128_v4 = vld [vmem:[#allocation32_spill] sm:$0xff] }
 0x289   :  { %v1030_v14 = vmul.f32 0.5, %v6251_v38  ;;  %v6253_v1 = vpop.eup %6252  ;;  %v8129_v38 = vld [vmem:[#allocation31_spill] sm:$0xff] }
 0x28a   :  { %v1032_v0 = vadd.f32 0.5, %v1029_v7  ;;  %v6255_v47 = vpop.eup %6254  ;;  %v8124_v7 = vld [vmem:[#allocation28_spill] sm:$0xff] }
 0x28b   :  { %v1033_v53 = vadd.f32 0.5, %v1030_v14  ;;  %v1031_v31 = vmul.f32 0.5, %v6255_v47  ;;  %v8130_v14 = vld [vmem:[#allocation34_spill] sm:$0xff]  ;;  %v8134_v47 = vld [vmem:[#allocation40_spill] sm:$0xff] }
 0x28c   :  { %v1037_v33 = vmul.f32 %v6253_v1, %v1032_v0  ;;  %v7090_v1 = vld [vmem:[#allocation2 + $0x40] sm:$0xff]  ;;  %v8123_v0 = vld [vmem:[#allocation24_spill] sm:$0xff] }
 0x28d   :  { %v1036_v24 = vmul.f32 0.0, %v1033_v53  ;;  %v1034_v19 = vadd.f32 0.5, %v1031_v31  ;;  %v8131_v53 = vld [vmem:[#allocation33_spill] sm:$0xff]  ;;  %v8135_v31 = vld [vmem:[#allocation39_spill] sm:$0xff] }
 0x28f   :  { %v7083_v13 = vadd.f32 %v1037_v33, %v1036_v24  ;;  %v8132_v33 = vld [vmem:[#allocation36_spill] sm:$0xff]  ;;  %v8133_v24 = vld [vmem:[#allocation35_spill] sm:$0xff] }
 0x291   :  { %6256 = vtanh.f32 %v7083_v13 }
 0x29b   :  { %v6257_v3 = vpop.eup %6256 }
 0x29c   :  { %v1040_v35 = vmul.f32 %v6257_v3, %v1034_v19  ;;  %v8136_v19 = vld [vmem:[#allocation42_spill] sm:$0xff]  ;;  %v8137_v3 = vld [vmem:[#allocation41_spill] sm:$0xff] }
 0x29e   :  { %1106 = vmatmul.mubr.f32.vlgmr.msra.gmra.mrb[4].mxu0 %v1040_v35  ;;  %1177 = vmatmul.mubr.f32.vlgmr.msra.gmra.mrb[4].mxu1 %v1040_v35  ;;  %v8138_v35 = vld [vmem:[#allocation44_spill] sm:$0xff] }
 0x29f   :  { %4892 = vmatpush1.bf16.msra.mxu0 %v6807_v62  ;;  %4924 = vmatpush1.bf16.msra.mxu1 %v6818_v21 }
 0x2a0   :  { %4894 = vmatprep.subr.bf16.mxu0 %v6812_v5  ;;  %4926 = vmatprep.subr.bf16.mxu1 %v6824_v28 }
 0x2a1   :  { %1251 = vmatprep.mubr.f32.mxu0 %v7090_v1  ;;  %1322 = vmatprep.mubr.f32.mxu1 %v7090_v1 }
 0x2a3   :  { %4896 = vmatpush1.bf16.msra.mxu0 %v6821_v23  ;;  %4928 = vmatpush1.bf16.msra.mxu1 %v6834_v50 }
 0x2a4   :  { %4898 = vmatprep.subr.bf16.mxu0 %v6829_v37  ;;  %4930 = vmatprep.subr.bf16.mxu1 %v6841_v55 }
 0x2a7   :  { %4900 = vmatpush1.bf16.msra.mxu0 %v8123_v0  ;;  %4932 = vmatpush1.bf16.msra.mxu1 %v8124_v7 }
 0x2a8   :  { %4902 = vmatprep.subr.bf16.mxu0 %v8125_v17  ;;  %4934 = vmatprep.subr.bf16.mxu1 %v8126_v41 }
 0x2ab   :  { %4904 = vmatpush1.bf16.msra.mxu0 %v8127_v11  ;;  %4936 = vmatpush1.bf16.msra.mxu1 %v8128_v4  ;;  %v1186_v11 = vld [vmem:[#allocation2 + $0x38] sm:$0xff] }
 0x2ac   :  { %4906 = vmatprep.subr.bf16.mxu0 %v8129_v38  ;;  %4938 = vmatprep.subr.bf16.mxu1 %v8130_v14  ;;  %v8139_v14 = vld [vmem:[#allocation43_spill] sm:$0xff] }
 0x2af   :  { %4908 = vmatpush1.bf16.msra.mxu0 %v8131_v53  ;;  %4940 = vmatpush1.bf16.msra.mxu1 %v8132_v33  ;;  %v8140_v53 = vld [vmem:[#allocation46_spill] sm:$0xff]  ;;  %v8141_v33 = vld [vmem:[#allocation45_spill] sm:$0xff] }
 0x2b0   :  { %4910 = vmatprep.subr.bf16.mxu0 %v8133_v24  ;;  %4942 = vmatprep.subr.bf16.mxu1 %v6887_v20  ;;  %v8142_v24 = vld [vmem:[#allocation47_spill] sm:$0xff]  ;;  %v8143_v20 = vld [vmem:[#allocation48_spill] sm:$0xff] }
 0x2b3   :  { %4912 = vmatpush1.bf16.msra.mxu0 %v6884_v56  ;;  %4944 = vmatpush1.bf16.msra.mxu1 %v8134_v47  ;;  %v8144_v56 = vld [vmem:[#allocation49_spill] sm:$0xff] }
 0x2b4   :  { %4914 = vmatprep.subr.bf16.mxu0 %v8135_v31  ;;  %4946 = vmatprep.subr.bf16.mxu1 %v8136_v19  ;;  %v8145_v19 = vld [vmem:[#allocation50_spill] sm:$0xff]  ;;  %v8159_v31 = vld [vmem:[#allocation64_spill] sm:$0xff] }
 0x2b7   :  { %4916 = vmatpush1.bf16.msra.mxu0 %v8137_v3  ;;  %4948 = vmatpush1.bf16.msra.mxu1 %v8138_v35  ;;  %v8146_v3 = vld [vmem:[#allocation51_spill] sm:$0xff]  ;;  %v8147_v35 = vld [vmem:[#allocation52_spill] sm:$0xff] }
 0x2b8   :  { %4918 = vmatprep.subr.bf16.mxu0 %v8139_v14  ;;  %4950 = vmatprep.subr.bf16.mxu1 %v8140_v53  ;;  %v8148_v14 = vld [vmem:[#allocation53_spill] sm:$0xff]  ;;  %v8158_v53 = vld [vmem:[#allocation63_spill] sm:$0xff] }
 0x2bb   :  { %4920 = vmatpush1.bf16.msra.mxu0 %v8141_v33  ;;  %4952 = vmatpush1.bf16.msra.mxu1 %v8142_v24  ;;  %v8149_v24 = vld [vmem:[#allocation54_spill] sm:$0xff]  ;;  %v8152_v33 = vld [vmem:[#allocation57_spill] sm:$0xff] }
 0x2bc   :  { %4954 = vmatprep.subr.bf16.mxu0 %v8143_v20  ;;  %4986 = vmatprep.subr.bf16.mxu1 %v8144_v56  ;;  %v8150_v20 = vld [vmem:[#allocation55_spill] sm:$0xff]  ;;  %v8151_v56 = vld [vmem:[#allocation56_spill] sm:$0xff] }
 0x2be   :  { %1252 = vmatmul.mubr.f32.vlgmr.msra.gmra.mrb[6].mxu0 %v7025_v40  ;;  %1323 = vmatmul.mubr.f32.vlgmr.msra.gmra.mrb[6].mxu1 %v7025_v40  ;;  %v8153_v40 = vld [vmem:[#allocation58_spill] sm:$0xff] }
 0x2bf   :  { %4956 = vmatpush1.bf16.msra.mxu0 %v8145_v19  ;;  %4988 = vmatpush1.bf16.msra.mxu1 %v8146_v3  ;;  %v8154_v19 = vld [vmem:[#allocation59_spill] sm:$0xff]  ;;  %v8155_v3 = vld [vmem:[#allocation60_spill] sm:$0xff] }
 0x2c0   :  { %4958 = vmatprep.subr.bf16.mxu0 %v8147_v35  ;;  %4990 = vmatprep.subr.bf16.mxu1 %v8148_v14  ;;  %v8156_v35 = vld [vmem:[#allocation61_spill] sm:$0xff]  ;;  %v8157_v14 = vld [vmem:[#allocation62_spill] sm:$0xff] }
 0x2c1   :  { %1415 = vmatprep.mubr.f32.mxu0 %v7090_v1  ;;  %1486 = vmatprep.mubr.f32.mxu1 %v7090_v1 }
 0x2c3   :  { %4960 = vmatpush1.bf16.msra.mxu0 %v8149_v24  ;;  %4992 = vmatpush1.bf16.msra.mxu1 %v8150_v20  ;;  %v8160_v24 = vld [vmem:[#allocation65_spill] sm:$0xff]  ;;  %v8161_v20 = vld [vmem:[#allocation66_spill] sm:$0xff] }
 0x2c4   :  { %4962 = vmatprep.subr.bf16.mxu0 %v8151_v56  ;;  %4994 = vmatprep.subr.bf16.mxu1 %v8152_v33  ;;  %v8162_v56 = vld [vmem:[#allocation67_spill] sm:$0xff]  ;;  %v8163_v33 = vld [vmem:[#allocation68_spill] sm:$0xff] }
 0x2c7   :  { %4964 = vmatpush1.bf16.msra.mxu0 %v8153_v40  ;;  %4996 = vmatpush1.bf16.msra.mxu1 %v8154_v19  ;;  %v8164_v40 = vld [vmem:[#allocation69_spill] sm:$0xff]  ;;  %v8165_v19 = vld [vmem:[#allocation70_spill] sm:$0xff] }
 0x2c8   :  { %4966 = vmatprep.subr.bf16.mxu0 %v8155_v3  ;;  %4998 = vmatprep.subr.bf16.mxu1 %v8156_v35  ;;  %v8166_v3 = vld [vmem:[#allocation71_spill] sm:$0xff]  ;;  %v8167_v35 = vld [vmem:[#allocation72_spill] sm:$0xff] }
 0x2cb   :  { %4968 = vmatpush1.bf16.msra.mxu0 %v8157_v14  ;;  %5000 = vmatpush1.bf16.msra.mxu1 %v8158_v53  ;;  %v8168_v14 = vld [vmem:[#allocation73_spill] sm:$0xff]  ;;  %v8169_v53 = vld [vmem:[#allocation74_spill] sm:$0xff] }
 0x2cc   :  { %4970 = vmatprep.subr.bf16.mxu0 %v8159_v31  ;;  %5002 = vmatprep.subr.bf16.mxu1 %v8160_v24  ;;  %v8170_v31 = vld [vmem:[#allocation75_spill] sm:$0xff]  ;;  %v8171_v24 = vld [vmem:[#allocation76_spill] sm:$0xff] }
 0x2cf   :  { %4972 = vmatpush1.bf16.msra.mxu0 %v8161_v20  ;;  %5004 = vmatpush1.bf16.msra.mxu1 %v8162_v56  ;;  %v8172_v20 = vld [vmem:[#allocation77_spill] sm:$0xff]  ;;  %v8173_v56 = vld [vmem:[#allocation78_spill] sm:$0xff] }
 0x2d0   :  { %4974 = vmatprep.subr.bf16.mxu0 %v8163_v33  ;;  %5006 = vmatprep.subr.bf16.mxu1 %v8164_v40  ;;  %v8174_v33 = vld [vmem:[#allocation79_spill] sm:$0xff]  ;;  %v8175_v40 = vld [vmem:[#allocation17_spill] sm:$0xff] }
 0x2d3   :  { %4976 = vmatpush1.bf16.msra.mxu0 %v8165_v19  ;;  %5008 = vmatpush1.bf16.msra.mxu1 %v8166_v3  ;;  %v8176_v19 = vld [vmem:[#allocation18_spill] sm:$0xff]  ;;  %v1183_v3 = vld [vmem:[#allocation2 + $0x20] sm:$0xff] }
 0x2d4   :  { %4978 = vmatprep.subr.bf16.mxu0 %v8167_v35  ;;  %5010 = vmatprep.subr.bf16.mxu1 %v8168_v14  ;;  %v1184_v35 = vld [vmem:[#allocation2 + $0x28] sm:$0xff] }
 0x2d7   :  { %4980 = vmatpush1.bf16.msra.mxu0 %v8169_v53  ;;  %5012 = vmatpush1.bf16.msra.mxu1 %v8170_v31 }
 0x2d8   :  { %4982 = vmatprep.subr.bf16.mxu0 %v8171_v24  ;;  %5014 = vmatprep.subr.bf16.mxu1 %v8172_v20 }
 0x2db   :  { %4984 = vmatpush1.bf16.msra.mxu0 %v8173_v56  ;;  %5016 = vmatpush1.bf16.msra.mxu1 %v8174_v33  ;;  %v1185_v56 = vld [vmem:[#allocation2 + $0x30] sm:$0xff] }
 0x2dc   :  { %5018 = vmatprep.subr.bf16.mxu0 %v8175_v40  ;;  %5050 = vmatprep.subr.bf16.mxu1 %v8176_v19 }
 0x391   :  { %v1253_v47 = vpop.f32.mrb[6].mxu0  ;;  %v1324_v14 = vpop.f32.mrb[6].mxu1 }
 0x392   :  { %v1329_v38 = vadd.f32 %v1253_v47, %v1183_v3  ;;  %v1255_v53 = vpop.f32.mrb[7].mxu0  ;;  %v1326_v4 = vpop.f32.mrb[7].mxu1  ;;  %v1331_v33 = vadd.f32 %v1324_v14, %v1185_v56  ;;  %v8179_v14 = vld [vmem:[#allocation80_spill] sm:$0xff] }
 0x393   :  { %v1330_v31 = vadd.f32 %v1255_v53, %v1184_v35  ;;  %v1332_v20 = vadd.f32 %v1326_v4, %v1186_v11 }
 0x394   :  { %v1333_v24 = vmul.f32 0.5, %v1329_v38  ;;  %v1335_v40 = vmul.f32 0.5, %v1331_v33 }
 0x395   :  { %v1334_v41 = vmul.f32 0.5, %v1330_v31 }
 0x396   :  { %6258 = vtanh.f32 %v1333_v24 }
 0x397   :  { %6260 = vtanh.f32 %v1334_v41 }
 0x398   :  { %6262 = vtanh.f32 %v1332_v20 }
 0x399   :  { %6264 = vtanh.f32 %v1335_v40 }
 0x3a0   :  { %v6259_v17 = vpop.eup %6258 }
 0x3a1   :  { %v1339_v19 = vmul.f32 0.5, %v6259_v17  ;;  %v6261_v7 = vpop.eup %6260 }
 0x3a2   :  { %v1340_v55 = vmul.f32 0.5, %v6261_v7  ;;  %v6263_v47 = vpop.eup %6262 }
 0x3a3   :  { %v1342_v0 = vadd.f32 0.5, %v1339_v19  ;;  %v6265_v11 = vpop.eup %6264 }
 0x3a4   :  { %v1343_v3 = vadd.f32 0.5, %v1340_v55  ;;  %v1341_v41 = vmul.f32 0.5, %v6265_v11  ;;  %v180_v55 = vld [vmem:[%s179_s2] ss:$8 sm:$0xf]  ;;  %s211_s2 = sshra.s32 %s4531_s27, 3 }
 0x3a5   :  { %v1347_v37 = vmul.f32 %v6263_v47, %v1342_v0  ;;  %182 = vst.msk [vmem:[#allocation2 + $0x40] ss:$8 sm:$0xf] %vm6844_vm0, %v180_v55  ;;  %v284_v0 = vld [vmem:[%s283_s9] ss:$8 sm:$0xf] }
 0x3a6   :  { %v1346_v53 = vmul.f32 %v1343_v3, %v7022_v49  ;;  %v1344_v20 = vadd.f32 0.5, %v1341_v41  ;;  %286 = vst.msk [vmem:[#allocation2 + $0x41] ss:$8 sm:$0xf] %vm6844_vm0, %v284_v0  ;;  %s4570_s9 = sshll.u32 %s211_s2, 5  ;;  %s341_s27 = sshra.s32 %s4561_s6, 3 }
 0x3a7   :  { %s217_s11 = sadd.s32 %s4570_s9, %s214_s28  ;;  %s344_s2 = sand.u32 7, %s4561_s6  ;;  %v8486_v49 = vld [vmem:[#allocation25_spill] sm:$0xff] }
 0x3a8   :  { %v7159_v38 = vadd.f32 %v1347_v37, %v1346_v53  ;;  %v8177_v37 = vld [vmem:[#allocation19_spill] sm:$0xff]  ;;  %s218_s13 = scalar_lea.vmem [#allocation6], %s217_s11  ;;  %s4580_s28 = sshll.u32 %s341_s27, 5 }
 0x3a9   :  { %s347_s10 = sadd.s32 %s4580_s28, %s344_s2 }
 0x3aa   :  { %6266 = vtanh.f32 %v7159_v38  ;;  %s348_s11 = scalar_lea.vmem [#allocation6], %s347_s10 }
 0x3b4   :  { %v6267_v56 = vpop.eup %6266 }
 0x3b5   :  { %v7162_v4 = vmul.f32 %v6267_v56, %v1344_v20 }
 0x3b7   :  { %1416 = vmatmul.mubr.f32.vlgmr.msra.gmra.mrb[4].mxu0 %v7162_v4  ;;  %1487 = vmatmul.mubr.f32.vlgmr.msra.gmra.mrb[4].mxu1 %v7162_v4 }
 0x3b8   :  { %5020 = vmatpush1.bf16.msra.mxu0 %v6706_v8  ;;  %5052 = vmatpush1.bf16.msra.mxu1 %v6716_v18 }
 0x3b9   :  { %5022 = vmatprep.subr.bf16.mxu0 %v6708_v9  ;;  %5054 = vmatprep.subr.bf16.mxu1 %v6722_v26 }
 0x3ba   :  { %1579 = vmatprep.mubr.f32.mxu0 %v7090_v1  ;;  %1650 = vmatprep.mubr.f32.mxu1 %v7090_v1 }
 0x3bc   :  { %5024 = vmatpush1.bf16.msra.mxu0 %v6712_v16  ;;  %5056 = vmatpush1.bf16.msra.mxu1 %v6725_v30 }
 0x3bd   :  { %5026 = vmatprep.subr.bf16.mxu0 %v6719_v22  ;;  %5058 = vmatprep.subr.bf16.mxu1 %v6734_v39 }
 0x3c0   :  { %5028 = vmatpush1.bf16.msra.mxu0 %v6728_v32  ;;  %5060 = vmatpush1.bf16.msra.mxu1 %v6737_v44 }
 0x3c1   :  { %5030 = vmatprep.subr.bf16.mxu0 %v6732_v36  ;;  %5062 = vmatprep.subr.bf16.mxu1 %v6743_v48 }
 0x3c4   :  { %5032 = vmatpush1.bf16.msra.mxu0 %v6740_v46  ;;  %5064 = vmatpush1.bf16.msra.mxu1 %v6749_v57 }
 0x3c5   :  { %5034 = vmatprep.subr.bf16.mxu0 %v6746_v51  ;;  %5066 = vmatprep.subr.bf16.mxu1 %v6755_v60 }
 0x3c8   :  { %5036 = vmatpush1.bf16.msra.mxu0 %v6752_v58  ;;  %5068 = vmatpush1.bf16.msra.mxu1 %v6761_v6 }
 0x3c9   :  { %5038 = vmatprep.subr.bf16.mxu0 %v6758_v63  ;;  %5070 = vmatprep.subr.bf16.mxu1 %v6767_v12 }
 0x3cc   :  { %5040 = vmatpush1.bf16.msra.mxu0 %v6764_v10  ;;  %5072 = vmatpush1.bf16.msra.mxu1 %v6775_v25 }
 0x3cd   :  { %5042 = vmatprep.subr.bf16.mxu0 %v6770_v15  ;;  %5074 = vmatprep.subr.bf16.mxu1 %v6783_v29 }
 0x3d0   :  { %5044 = vmatpush1.bf16.msra.mxu0 %v6780_v27  ;;  %5076 = vmatpush1.bf16.msra.mxu1 %v6789_v42 }
 0x3d1   :  { %5046 = vmatprep.subr.bf16.mxu0 %v6786_v34  ;;  %5078 = vmatprep.subr.bf16.mxu1 %v6795_v45 }
 0x3d4   :  { %5048 = vmatpush1.bf16.msra.mxu0 %v6792_v43  ;;  %5080 = vmatpush1.bf16.msra.mxu1 %v6802_v61 }
 0x3d5   :  { %5082 = vmatprep.subr.bf16.mxu0 %v6798_v52  ;;  %5114 = vmatprep.subr.bf16.mxu1 %v8177_v37 }
 0x48a   :  { %v1417_v7 = vpop.f32.mrb[4].mxu0  ;;  %v1488_v17 = vpop.f32.mrb[4].mxu1 }
 0x48b   :  { %v1493_v33 = vadd.f32 %v1417_v7, %v8179_v14  ;;  %v1419_v24 = vpop.f32.mrb[5].mxu0  ;;  %v1490_v31 = vpop.f32.mrb[5].mxu1  ;;  %v1495_v3 = vadd.f32 %v1488_v17, %v7080_v2 }
 0x48c   :  { %v1494_v19 = vadd.f32 %v1419_v24, %v7073_v59  ;;  %v1496_v47 = vadd.f32 %v1490_v31, %v7076_v54 }
 0x48d   :  { %v1497_v35 = vmul.f32 0.5, %v1493_v33  ;;  %v1499_v53 = vmul.f32 0.5, %v1495_v3  ;;  %v8183_v3 = vld [vmem:[#allocation28_spill] sm:$0xff] }
 0x48e   :  { %v1498_v40 = vmul.f32 0.5, %v1494_v19 }
 0x48f   :  { %6268 = vtanh.f32 %v1497_v35 }
 0x490   :  { %6270 = vtanh.f32 %v1498_v40 }
 0x491   :  { %6272 = vtanh.f32 %v1496_v47  ;;  %v8182_v47 = vld [vmem:[#allocation24_spill] sm:$0xff] }
 0x492   :  { %6274 = vtanh.f32 %v1499_v53  ;;  %v8184_v53 = vld [vmem:[#allocation27_spill] sm:$0xff] }
 0x499   :  { %v6269_v11 = vpop.eup %6268 }
 0x49a   :  { %v1503_v41 = vmul.f32 0.5, %v6269_v11  ;;  %v6271_v20 = vpop.eup %6270  ;;  %v8185_v11 = vld [vmem:[#allocation30_spill] sm:$0xff] }
 0x49b   :  { %v1504_v55 = vmul.f32 0.5, %v6271_v20  ;;  %v6273_v0 = vpop.eup %6272  ;;  %v8187_v20 = vld [vmem:[#allocation32_spill] sm:$0xff] }
 0x49c   :  { %v1506_v56 = vadd.f32 0.5, %v1503_v41  ;;  %v6275_v31 = vpop.eup %6274  ;;  %v8186_v41 = vld [vmem:[#allocation29_spill] sm:$0xff] }
 0x49d   :  { %v1507_v7 = vadd.f32 0.5, %v1504_v55  ;;  %v1505_v19 = vmul.f32 0.5, %v6275_v31  ;;  %v8189_v55 = vld [vmem:[#allocation34_spill] sm:$0xff] }
 0x49e   :  { %v1511_v14 = vmul.f32 %v6273_v0, %v1506_v56  ;;  %v8188_v56 = vld [vmem:[#allocation31_spill] sm:$0xff]  ;;  %v8190_v0 = vld [vmem:[#allocation33_spill] sm:$0xff]  ;;  %v8193_v31 = vld [vmem:[#allocation38_spill] sm:$0xff] }
 0x49f   :  { %v1510_v33 = vmul.f32 %v1507_v7, %v7083_v13  ;;  %v1508_v35 = vadd.f32 0.5, %v1505_v19  ;;  %v8180_v13 = vld [vmem:[#allocation22_spill] sm:$0xff]  ;;  %v8191_v7 = vld [vmem:[#allocation36_spill] sm:$0xff]  ;;  %v8194_v19 = vld [vmem:[#allocation37_spill] sm:$0xff] }
 0x4a1   :  { %v7209_v24 = vadd.f32 %v1511_v14, %v1510_v33  ;;  %v8181_v14 = vld [vmem:[#allocation25_spill] sm:$0xff]  ;;  %v8192_v33 = vld [vmem:[#allocation35_spill] sm:$0xff] }
 0x4a3   :  { %6276 = vtanh.f32 %v7209_v24 }
 0x4ad   :  { %v6277_v17 = vpop.eup %6276 }
 0x4ae   :  { %v1514_v40 = vmul.f32 %v6277_v17, %v1508_v35  ;;  %v8195_v35 = vld [vmem:[#allocation40_spill] sm:$0xff]  ;;  %v8196_v17 = vld [vmem:[#allocation39_spill] sm:$0xff] }
 0x4b0   :  { %1580 = vmatmul.mubr.f32.vlgmr.msra.gmra.mrb[8].mxu0 %v1514_v40  ;;  %1651 = vmatmul.mubr.f32.vlgmr.msra.gmra.mrb[8].mxu1 %v1514_v40  ;;  %v8197_v40 = vld [vmem:[#allocation42_spill] sm:$0xff] }
 0x4b1   :  { %5084 = vmatpush1.bf16.msra.mxu0 %v6807_v62  ;;  %5116 = vmatpush1.bf16.msra.mxu1 %v6818_v21 }
 0x4b2   :  { %5086 = vmatprep.subr.bf16.mxu0 %v6812_v5  ;;  %5118 = vmatprep.subr.bf16.mxu1 %v6824_v28 }
 0x4b3   :  { %1725 = vmatprep.mubr.f32.mxu0 %v7090_v1  ;;  %1796 = vmatprep.mubr.f32.mxu1 %v7090_v1 }
 0x4b5   :  { %5088 = vmatpush1.bf16.msra.mxu0 %v6821_v23  ;;  %5120 = vmatpush1.bf16.msra.mxu1 %v6834_v50 }
 0x4b6   :  { %5090 = vmatprep.subr.bf16.mxu0 %v8180_v13  ;;  %5122 = vmatprep.subr.bf16.mxu1 %v8181_v14 }
 0x4b9   :  { %5092 = vmatpush1.bf16.msra.mxu0 %v8182_v47  ;;  %5124 = vmatpush1.bf16.msra.mxu1 %v8183_v3 }
 0x4ba   :  { %5094 = vmatprep.subr.bf16.mxu0 %v8184_v53  ;;  %5126 = vmatprep.subr.bf16.mxu1 %v8185_v11  ;;  %v1660_v53 = vld [vmem:[#allocation2 + $0x58] sm:$0xff] }
 0x4bd   :  { %5096 = vmatpush1.bf16.msra.mxu0 %v8186_v41  ;;  %5128 = vmatpush1.bf16.msra.mxu1 %v8187_v20  ;;  %v8198_v20 = vld [vmem:[#allocation41_spill] sm:$0xff] }
 0x4be   :  { %5098 = vmatprep.subr.bf16.mxu0 %v8188_v56  ;;  %5130 = vmatprep.subr.bf16.mxu1 %v8189_v55  ;;  %v8199_v56 = vld [vmem:[#allocation44_spill] sm:$0xff]  ;;  %v8200_v55 = vld [vmem:[#allocation43_spill] sm:$0xff] }
 0x4c1   :  { %5100 = vmatpush1.bf16.msra.mxu0 %v8190_v0  ;;  %5132 = vmatpush1.bf16.msra.mxu1 %v8191_v7  ;;  %v8201_v0 = vld [vmem:[#allocation46_spill] sm:$0xff]  ;;  %v8202_v7 = vld [vmem:[#allocation45_spill] sm:$0xff] }
 0x4c2   :  { %5102 = vmatprep.subr.bf16.mxu0 %v8192_v33  ;;  %5134 = vmatprep.subr.bf16.mxu1 %v8193_v31  ;;  %v8203_v33 = vld [vmem:[#allocation47_spill] sm:$0xff]  ;;  %v8204_v31 = vld [vmem:[#allocation48_spill] sm:$0xff] }
 0x4c5   :  { %5104 = vmatpush1.bf16.msra.mxu0 %v8194_v19  ;;  %5136 = vmatpush1.bf16.msra.mxu1 %v8195_v35  ;;  %v8205_v19 = vld [vmem:[#allocation49_spill] sm:$0xff] }
 0x4c6   :  { %5106 = vmatprep.subr.bf16.mxu0 %v8196_v17  ;;  %5138 = vmatprep.subr.bf16.mxu1 %v8197_v40  ;;  %v8206_v40 = vld [vmem:[#allocation50_spill] sm:$0xff]  ;;  %v8220_v17 = vld [vmem:[#allocation64_spill] sm:$0xff] }
 0x4c9   :  { %5108 = vmatpush1.bf16.msra.mxu0 %v8198_v20  ;;  %5140 = vmatpush1.bf16.msra.mxu1 %v8199_v56  ;;  %v8207_v20 = vld [vmem:[#allocation51_spill] sm:$0xff]  ;;  %v8208_v56 = vld [vmem:[#allocation52_spill] sm:$0xff] }
 0x4ca   :  { %5110 = vmatprep.subr.bf16.mxu0 %v8200_v55  ;;  %5142 = vmatprep.subr.bf16.mxu1 %v8201_v0  ;;  %v8209_v55 = vld [vmem:[#allocation53_spill] sm:$0xff]  ;;  %v8219_v0 = vld [vmem:[#allocation63_spill] sm:$0xff] }
 0x4cd   :  { %5112 = vmatpush1.bf16.msra.mxu0 %v8202_v7  ;;  %5144 = vmatpush1.bf16.msra.mxu1 %v8203_v33  ;;  %v8210_v33 = vld [vmem:[#allocation54_spill] sm:$0xff]  ;;  %v8213_v7 = vld [vmem:[#allocation57_spill] sm:$0xff] }
 0x4ce   :  { %5146 = vmatprep.subr.bf16.mxu0 %v8204_v31  ;;  %5178 = vmatprep.subr.bf16.mxu1 %v8205_v19  ;;  %v8211_v31 = vld [vmem:[#allocation55_spill] sm:$0xff]  ;;  %v8212_v19 = vld [vmem:[#allocation56_spill] sm:$0xff] }
 0x4d0   :  { %1726 = vmatmul.mubr.f32.vlgmr.msra.gmra.mrb[10].mxu0 %v7162_v4  ;;  %1797 = vmatmul.mubr.f32.vlgmr.msra.gmra.mrb[10].mxu1 %v7162_v4  ;;  %v8214_v4 = vld [vmem:[#allocation58_spill] sm:$0xff] }
 0x4d1   :  { %5148 = vmatpush1.bf16.msra.mxu0 %v8206_v40  ;;  %5180 = vmatpush1.bf16.msra.mxu1 %v8207_v20  ;;  %v8215_v40 = vld [vmem:[#allocation59_spill] sm:$0xff]  ;;  %v8216_v20 = vld [vmem:[#allocation60_spill] sm:$0xff] }
 0x4d2   :  { %5150 = vmatprep.subr.bf16.mxu0 %v8208_v56  ;;  %5182 = vmatprep.subr.bf16.mxu1 %v8209_v55  ;;  %v8217_v56 = vld [vmem:[#allocation61_spill] sm:$0xff]  ;;  %v8218_v55 = vld [vmem:[#allocation62_spill] sm:$0xff] }
 0x4d3   :  { %1889 = vmatprep.mubr.f32.mxu0 %v7090_v1  ;;  %1960 = vmatprep.mubr.f32.mxu1 %v7090_v1 }
 0x4d5   :  { %5152 = vmatpush1.bf16.msra.mxu0 %v8210_v33  ;;  %5184 = vmatpush1.bf16.msra.mxu1 %v8211_v31  ;;  %v8221_v33 = vld [vmem:[#allocation65_spill] sm:$0xff]  ;;  %v8222_v31 = vld [vmem:[#allocation66_spill] sm:$0xff] }
 0x4d6   :  { %5154 = vmatprep.subr.bf16.mxu0 %v8212_v19  ;;  %5186 = vmatprep.subr.bf16.mxu1 %v8213_v7  ;;  %v8223_v19 = vld [vmem:[#allocation67_spill] sm:$0xff]  ;;  %v8224_v7 = vld [vmem:[#allocation68_spill] sm:$0xff] }
 0x4d9   :  { %5156 = vmatpush1.bf16.msra.mxu0 %v8214_v4  ;;  %5188 = vmatpush1.bf16.msra.mxu1 %v8215_v40  ;;  %v8225_v4 = vld [vmem:[#allocation69_spill] sm:$0xff]  ;;  %v8226_v40 = vld [vmem:[#allocation70_spill] sm:$0xff] }
 0x4da   :  { %5158 = vmatprep.subr.bf16.mxu0 %v8216_v20  ;;  %5190 = vmatprep.subr.bf16.mxu1 %v8217_v56  ;;  %v8227_v20 = vld [vmem:[#allocation71_spill] sm:$0xff]  ;;  %v8228_v56 = vld [vmem:[#allocation72_spill] sm:$0xff] }
 0x4dd   :  { %5160 = vmatpush1.bf16.msra.mxu0 %v8218_v55  ;;  %5192 = vmatpush1.bf16.msra.mxu1 %v8219_v0  ;;  %v8229_v55 = vld [vmem:[#allocation73_spill] sm:$0xff]  ;;  %v8230_v0 = vld [vmem:[#allocation74_spill] sm:$0xff] }
 0x4de   :  { %5162 = vmatprep.subr.bf16.mxu0 %v8220_v17  ;;  %5194 = vmatprep.subr.bf16.mxu1 %v8221_v33  ;;  %v8231_v17 = vld [vmem:[#allocation75_spill] sm:$0xff]  ;;  %v8232_v33 = vld [vmem:[#allocation76_spill] sm:$0xff] }
 0x4e1   :  { %5164 = vmatpush1.bf16.msra.mxu0 %v8222_v31  ;;  %5196 = vmatpush1.bf16.msra.mxu1 %v8223_v19  ;;  %v8233_v31 = vld [vmem:[#allocation77_spill] sm:$0xff]  ;;  %v8234_v19 = vld [vmem:[#allocation78_spill] sm:$0xff] }
 0x4e2   :  { %5166 = vmatprep.subr.bf16.mxu0 %v8224_v7  ;;  %5198 = vmatprep.subr.bf16.mxu1 %v8225_v4  ;;  %v8235_v7 = vld [vmem:[#allocation79_spill] sm:$0xff]  ;;  %v8236_v4 = vld [vmem:[#allocation17_spill] sm:$0xff] }
 0x4e5   :  { %5168 = vmatpush1.bf16.msra.mxu0 %v8226_v40  ;;  %5200 = vmatpush1.bf16.msra.mxu1 %v8227_v20  ;;  %v8237_v40 = vld [vmem:[#allocation18_spill] sm:$0xff]  ;;  %v1657_v20 = vld [vmem:[#allocation2 + $0x40] sm:$0xff] }
 0x4e6   :  { %5170 = vmatprep.subr.bf16.mxu0 %v8228_v56  ;;  %5202 = vmatprep.subr.bf16.mxu1 %v8229_v55  ;;  %v1658_v56 = vld [vmem:[#allocation2 + $0x48] sm:$0xff] }
 0x4e9   :  { %5172 = vmatpush1.bf16.msra.mxu0 %v8230_v0  ;;  %5204 = vmatpush1.bf16.msra.mxu1 %v8231_v17 }
 0x4ea   :  { %5174 = vmatprep.subr.bf16.mxu0 %v8232_v33  ;;  %5206 = vmatprep.subr.bf16.mxu1 %v8233_v31 }
 0x4ed   :  { %5176 = vmatpush1.bf16.msra.mxu0 %v8234_v19  ;;  %5208 = vmatpush1.bf16.msra.mxu1 %v8235_v7  ;;  %v1659_v19 = vld [vmem:[#allocation2 + $0x50] sm:$0xff] }
 0x4ee   :  { %5210 = vmatprep.subr.bf16.mxu0 %v8236_v4  ;;  %5242 = vmatprep.subr.bf16.mxu1 %v8237_v40 }
 0x5a3   :  { %v1727_v35 = vpop.f32.mrb[10].mxu0  ;;  %v1798_v55 = vpop.f32.mrb[10].mxu1 }
 0x5a4   :  { %v1803_v41 = vadd.f32 %v1727_v35, %v1657_v20  ;;  %v1729_v0 = vpop.f32.mrb[11].mxu0  ;;  %v1800_v11 = vpop.f32.mrb[11].mxu1  ;;  %v1805_v7 = vadd.f32 %v1798_v55, %v1659_v19 }
 0x5a5   :  { %v1804_v17 = vadd.f32 %v1729_v0, %v1658_v56  ;;  %v1806_v31 = vadd.f32 %v1800_v11, %v1660_v53 }
 0x5a6   :  { %v1807_v33 = vmul.f32 0.5, %v1803_v41  ;;  %v1809_v4 = vmul.f32 0.5, %v1805_v7 }
 0x5a7   :  { %v1808_v3 = vmul.f32 0.5, %v1804_v17 }
 0x5a8   :  { %6278 = vtanh.f32 %v1807_v33 }
 0x5a9   :  { %6280 = vtanh.f32 %v1808_v3 }
 0x5aa   :  { %6282 = vtanh.f32 %v1806_v31 }
 0x5ab   :  { %6284 = vtanh.f32 %v1809_v4 }
 0x5b2   :  { %v6279_v47 = vpop.eup %6278 }
 0x5b3   :  { %v1813_v40 = vmul.f32 0.5, %v6279_v47  ;;  %v6281_v14 = vpop.eup %6280 }
 0x5b4   :  { %v1814_v50 = vmul.f32 0.5, %v6281_v14  ;;  %v6283_v20 = vpop.eup %6282  ;;  %v8238_v14 = vld [vmem:[#allocation80_spill] sm:$0xff] }
 0x5b5   :  { %v1816_v13 = vadd.f32 0.5, %v1813_v40  ;;  %v6285_v53 = vpop.eup %6284 }
 0x5b6   :  { %v1817_v35 = vadd.f32 0.5, %v1814_v50  ;;  %v1815_v3 = vmul.f32 0.5, %v6285_v53  ;;  %v297_v50 = vld [vmem:[%s296_s0] ss:$8 sm:$0xf] }
 0x5b7   :  { %v1821_v23 = vmul.f32 %v6283_v20, %v1816_v13  ;;  %299 = vst.msk [vmem:[#allocation2 + $0x61] ss:$8 sm:$0xf] %vm6844_vm0, %v297_v50 }
 0x5b8   :  { %v1820_v56 = vmul.f32 %v1817_v35, %v7159_v38  ;;  %v1818_v11 = vadd.f32 0.5, %v1815_v3 }
 0x5ba   :  { %v7283_v41 = vadd.f32 %v1821_v23, %v1820_v56  ;;  %v193_v23 = vld [vmem:[%s192_s30] ss:$8 sm:$0xf]  ;;  %s224_s30 = sshra.s32 %s4534_s16, 3 }
 0x5bb   :  { %195 = vst.msk [vmem:[#allocation2 + $0x60] ss:$8 sm:$0xf] %vm6844_vm0, %v193_v23  ;;  %s4571_s0 = sshll.u32 %s224_s30, 5 }
 0x5bc   :  { %6286 = vtanh.f32 %v7283_v41  ;;  %s230_s22 = sadd.s32 %s4571_s0, %s227_s20 }
 0x5bd   :  { %s231_s17 = scalar_lea.vmem [#allocation6], %s230_s22 }
 0x5c6   :  { %v6287_v55 = vpop.eup %6286 }
 0x5c7   :  { %v7286_v0 = vmul.f32 %v6287_v55, %v1818_v11 }
 0x5c9   :  { %1890 = vmatmul.mubr.f32.vlgmr.msra.gmra.mrb[8].mxu0 %v7286_v0  ;;  %1961 = vmatmul.mubr.f32.vlgmr.msra.gmra.mrb[8].mxu1 %v7286_v0 }
 0x5ca   :  { %5212 = vmatpush1.bf16.msra.mxu0 %v6706_v8  ;;  %5244 = vmatpush1.bf16.msra.mxu1 %v6716_v18 }
 0x5cb   :  { %5214 = vmatprep.subr.bf16.mxu0 %v6708_v9  ;;  %5246 = vmatprep.subr.bf16.mxu1 %v6722_v26 }
 0x5cc   :  { %2053 = vmatprep.mubr.f32.mxu0 %v7090_v1  ;;  %2124 = vmatprep.mubr.f32.mxu1 %v7090_v1 }
 0x5ce   :  { %5216 = vmatpush1.bf16.msra.mxu0 %v6712_v16  ;;  %5248 = vmatpush1.bf16.msra.mxu1 %v6725_v30 }
 0x5cf   :  { %5218 = vmatprep.subr.bf16.mxu0 %v6719_v22  ;;  %5250 = vmatprep.subr.bf16.mxu1 %v6734_v39 }
 0x5d2   :  { %5220 = vmatpush1.bf16.msra.mxu0 %v6728_v32  ;;  %5252 = vmatpush1.bf16.msra.mxu1 %v6737_v44 }
 0x5d3   :  { %5222 = vmatprep.subr.bf16.mxu0 %v6732_v36  ;;  %5254 = vmatprep.subr.bf16.mxu1 %v6743_v48 }
 0x5d6   :  { %5224 = vmatpush1.bf16.msra.mxu0 %v6740_v46  ;;  %5256 = vmatpush1.bf16.msra.mxu1 %v6749_v57 }
 0x5d7   :  { %5226 = vmatprep.subr.bf16.mxu0 %v6746_v51  ;;  %5258 = vmatprep.subr.bf16.mxu1 %v6755_v60 }
 0x5da   :  { %5228 = vmatpush1.bf16.msra.mxu0 %v6752_v58  ;;  %5260 = vmatpush1.bf16.msra.mxu1 %v6761_v6 }
 0x5db   :  { %5230 = vmatprep.subr.bf16.mxu0 %v6758_v63  ;;  %5262 = vmatprep.subr.bf16.mxu1 %v6767_v12 }
 0x5de   :  { %5232 = vmatpush1.bf16.msra.mxu0 %v6764_v10  ;;  %5264 = vmatpush1.bf16.msra.mxu1 %v6775_v25 }
 0x5df   :  { %5234 = vmatprep.subr.bf16.mxu0 %v6770_v15  ;;  %5266 = vmatprep.subr.bf16.mxu1 %v6783_v29 }
 0x5e2   :  { %5236 = vmatpush1.bf16.msra.mxu0 %v6780_v27  ;;  %5268 = vmatpush1.bf16.msra.mxu1 %v6789_v42 }
 0x5e3   :  { %5238 = vmatprep.subr.bf16.mxu0 %v6786_v34  ;;  %5270 = vmatprep.subr.bf16.mxu1 %v6795_v45 }
 0x5e6   :  { %5240 = vmatpush1.bf16.msra.mxu0 %v6792_v43  ;;  %5272 = vmatpush1.bf16.msra.mxu1 %v6802_v61 }
 0x5e7   :  { %5274 = vmatprep.subr.bf16.mxu0 %v6798_v52  ;;  %5306 = vmatprep.subr.bf16.mxu1 %v8177_v37 }
 0x69c   :  { %v1891_v38 = vpop.f32.mrb[8].mxu0  ;;  %v1962_v13 = vpop.f32.mrb[8].mxu1 }
 0x69d   :  { %v1967_v47 = vadd.f32 %v1891_v38, %v8238_v14  ;;  %v1893_v7 = vpop.f32.mrb[9].mxu0  ;;  %v1964_v33 = vpop.f32.mrb[9].mxu1  ;;  %v1969_v4 = vadd.f32 %v1962_v13, %v7080_v2 }
 0x69e   :  { %v1968_v31 = vadd.f32 %v1893_v7, %v7073_v59  ;;  %v1970_v40 = vadd.f32 %v1964_v33, %v7076_v54 }
 0x69f   :  { %v1971_v19 = vmul.f32 0.5, %v1967_v47  ;;  %v1973_v20 = vmul.f32 0.5, %v1969_v4  ;;  %v8242_v4 = vld [vmem:[#allocation25_spill] sm:$0xff] }
 0x6a0   :  { %v1972_v17 = vmul.f32 0.5, %v1968_v31 }
 0x6a1   :  { %6288 = vtanh.f32 %v1971_v19 }
 0x6a2   :  { %6290 = vtanh.f32 %v1972_v17  ;;  %v8240_v17 = vld [vmem:[#allocation23_spill] sm:$0xff] }
 0x6a3   :  { %6292 = vtanh.f32 %v1970_v40  ;;  %v8241_v40 = vld [vmem:[#allocation22_spill] sm:$0xff] }
 0x6a4   :  { %6294 = vtanh.f32 %v1973_v20  ;;  %v8243_v20 = vld [vmem:[#allocation24_spill] sm:$0xff] }
 0x6ab   :  { %v6289_v35 = vpop.eup %6288 }
 0x6ac   :  { %v1977_v56 = vmul.f32 0.5, %v6289_v35  ;;  %v6291_v53 = vpop.eup %6290  ;;  %v8244_v35 = vld [vmem:[#allocation28_spill] sm:$0xff] }
 0x6ad   :  { %v1978_v11 = vmul.f32 0.5, %v6291_v53  ;;  %v6293_v55 = vpop.eup %6292  ;;  %v8246_v53 = vld [vmem:[#allocation30_spill] sm:$0xff] }
 0x6ae   :  { %v1980_v3 = vadd.f32 0.5, %v1977_v56  ;;  %v6295_v7 = vpop.eup %6294  ;;  %v8245_v56 = vld [vmem:[#allocation27_spill] sm:$0xff] }
 0x6af   :  { %v1981_v23 = vadd.f32 0.5, %v1978_v11  ;;  %v1979_v33 = vmul.f32 0.5, %v6295_v7  ;;  %v8248_v11 = vld [vmem:[#allocation32_spill] sm:$0xff]  ;;  %v8253_v7 = vld [vmem:[#allocation35_spill] sm:$0xff] }
 0x6b0   :  { %v1985_v50 = vmul.f32 %v6293_v55, %v1980_v3  ;;  %v8247_v3 = vld [vmem:[#allocation29_spill] sm:$0xff]  ;;  %v8249_v55 = vld [vmem:[#allocation31_spill] sm:$0xff] }
 0x6b1   :  { %v1984_v38 = vmul.f32 %v1981_v23, %v7209_v24  ;;  %v1982_v31 = vadd.f32 0.5, %v1979_v33  ;;  %v8239_v24 = vld [vmem:[#allocation20_spill] sm:$0xff]  ;;  %v8250_v23 = vld [vmem:[#allocation34_spill] sm:$0xff] }
 0x6b2   :  { %v8254_v33 = vld [vmem:[#allocation38_spill] sm:$0xff] }
 0x6b3   :  { %v7333_v47 = vadd.f32 %v1985_v50, %v1984_v38  ;;  %v8251_v50 = vld [vmem:[#allocation33_spill] sm:$0xff]  ;;  %v8252_v38 = vld [vmem:[#allocation36_spill] sm:$0xff] }
 0x6b5   :  { %6296 = vtanh.f32 %v7333_v47 }
 0x6bf   :  { %v6297_v13 = vpop.eup %6296 }
 0x6c0   :  { %v1988_v19 = vmul.f32 %v6297_v13, %v1982_v31  ;;  %v8255_v31 = vld [vmem:[#allocation37_spill] sm:$0xff]  ;;  %v8256_v13 = vld [vmem:[#allocation40_spill] sm:$0xff] }
 0x6c2   :  { %2054 = vmatmul.mubr.f32.vlgmr.msra.gmra.mrb[12].mxu0 %v1988_v19  ;;  %2125 = vmatmul.mubr.f32.vlgmr.msra.gmra.mrb[12].mxu1 %v1988_v19  ;;  %v8257_v19 = vld [vmem:[#allocation39_spill] sm:$0xff] }
 0x6c3   :  { %5276 = vmatpush1.bf16.msra.mxu0 %v6807_v62  ;;  %5308 = vmatpush1.bf16.msra.mxu1 %v6818_v21 }
 0x6c4   :  { %5278 = vmatprep.subr.bf16.mxu0 %v6812_v5  ;;  %5310 = vmatprep.subr.bf16.mxu1 %v6824_v28 }
 0x6c5   :  { %2199 = vmatprep.mubr.f32.mxu0 %v7090_v1  ;;  %2270 = vmatprep.mubr.f32.mxu1 %v7090_v1 }
 0x6c7   :  { %5280 = vmatpush1.bf16.msra.mxu0 %v8239_v24  ;;  %5312 = vmatpush1.bf16.msra.mxu1 %v8240_v17 }
 0x6c8   :  { %5282 = vmatprep.subr.bf16.mxu0 %v8241_v40  ;;  %5314 = vmatprep.subr.bf16.mxu1 %v8242_v4 }
 0x6cb   :  { %5284 = vmatpush1.bf16.msra.mxu0 %v8243_v20  ;;  %5316 = vmatpush1.bf16.msra.mxu1 %v8244_v35  ;;  %v2134_v35 = vld [vmem:[#allocation2 + $0x78] sm:$0xff] }
 0x6cc   :  { %5286 = vmatprep.subr.bf16.mxu0 %v8245_v56  ;;  %5318 = vmatprep.subr.bf16.mxu1 %v8246_v53 }
 0x6cf   :  { %5288 = vmatpush1.bf16.msra.mxu0 %v8247_v3  ;;  %5320 = vmatpush1.bf16.msra.mxu1 %v8248_v11  ;;  %v8258_v3 = vld [vmem:[#allocation42_spill] sm:$0xff]  ;;  %v8259_v11 = vld [vmem:[#allocation41_spill] sm:$0xff] }
 0x6d0   :  { %5290 = vmatprep.subr.bf16.mxu0 %v8249_v55  ;;  %5322 = vmatprep.subr.bf16.mxu1 %v8250_v23  ;;  %v8260_v55 = vld [vmem:[#allocation44_spill] sm:$0xff]  ;;  %v8261_v23 = vld [vmem:[#allocation43_spill] sm:$0xff] }
 0x6d3   :  { %5292 = vmatpush1.bf16.msra.mxu0 %v8251_v50  ;;  %5324 = vmatpush1.bf16.msra.mxu1 %v8252_v38  ;;  %v8262_v50 = vld [vmem:[#allocation46_spill] sm:$0xff]  ;;  %v8263_v38 = vld [vmem:[#allocation45_spill] sm:$0xff] }
 0x6d4   :  { %5294 = vmatprep.subr.bf16.mxu0 %v8253_v7  ;;  %5326 = vmatprep.subr.bf16.mxu1 %v8254_v33  ;;  %v8264_v7 = vld [vmem:[#allocation47_spill] sm:$0xff]  ;;  %v8265_v33 = vld [vmem:[#allocation48_spill] sm:$0xff] }
 0x6d7   :  { %5296 = vmatpush1.bf16.msra.mxu0 %v8255_v31  ;;  %5328 = vmatpush1.bf16.msra.mxu1 %v8256_v13  ;;  %v8266_v31 = vld [vmem:[#allocation49_spill] sm:$0xff] }
 0x6d8   :  { %5298 = vmatprep.subr.bf16.mxu0 %v8257_v19  ;;  %5330 = vmatprep.subr.bf16.mxu1 %v8258_v3  ;;  %v8267_v3 = vld [vmem:[#allocation50_spill] sm:$0xff]  ;;  %v8281_v19 = vld [vmem:[#allocation64_spill] sm:$0xff] }
 0x6db   :  { %5300 = vmatpush1.bf16.msra.mxu0 %v8259_v11  ;;  %5332 = vmatpush1.bf16.msra.mxu1 %v8260_v55  ;;  %v8268_v11 = vld [vmem:[#allocation51_spill] sm:$0xff]  ;;  %v8269_v55 = vld [vmem:[#allocation52_spill] sm:$0xff] }
 0x6dc   :  { %5302 = vmatprep.subr.bf16.mxu0 %v8261_v23  ;;  %5334 = vmatprep.subr.bf16.mxu1 %v8262_v50  ;;  %v8270_v23 = vld [vmem:[#allocation53_spill] sm:$0xff]  ;;  %v8280_v50 = vld [vmem:[#allocation63_spill] sm:$0xff] }
 0x6df   :  { %5304 = vmatpush1.bf16.msra.mxu0 %v8263_v38  ;;  %5336 = vmatpush1.bf16.msra.mxu1 %v8264_v7  ;;  %v8271_v7 = vld [vmem:[#allocation54_spill] sm:$0xff]  ;;  %v8274_v38 = vld [vmem:[#allocation57_spill] sm:$0xff] }
 0x6e0   :  { %5338 = vmatprep.subr.bf16.mxu0 %v8265_v33  ;;  %5370 = vmatprep.subr.bf16.mxu1 %v8266_v31  ;;  %v8272_v33 = vld [vmem:[#allocation55_spill] sm:$0xff]  ;;  %v8273_v31 = vld [vmem:[#allocation56_spill] sm:$0xff] }
 0x6e2   :  { %2200 = vmatmul.mubr.f32.vlgmr.msra.gmra.mrb[14].mxu0 %v7286_v0  ;;  %2271 = vmatmul.mubr.f32.vlgmr.msra.gmra.mrb[14].mxu1 %v7286_v0  ;;  %v8275_v0 = vld [vmem:[#allocation58_spill] sm:$0xff] }
 0x6e3   :  { %5340 = vmatpush1.bf16.msra.mxu0 %v8267_v3  ;;  %5372 = vmatpush1.bf16.msra.mxu1 %v8268_v11  ;;  %v8276_v3 = vld [vmem:[#allocation59_spill] sm:$0xff]  ;;  %v8277_v11 = vld [vmem:[#allocation60_spill] sm:$0xff] }
 0x6e4   :  { %5342 = vmatprep.subr.bf16.mxu0 %v8269_v55  ;;  %5374 = vmatprep.subr.bf16.mxu1 %v8270_v23  ;;  %v8278_v55 = vld [vmem:[#allocation61_spill] sm:$0xff]  ;;  %v8279_v23 = vld [vmem:[#allocation62_spill] sm:$0xff] }
 0x6e5   :  { %2363 = vmatprep.mubr.f32.mxu0 %v7090_v1  ;;  %2434 = vmatprep.mubr.f32.mxu1 %v7090_v1 }
 0x6e7   :  { %5344 = vmatpush1.bf16.msra.mxu0 %v8271_v7  ;;  %5376 = vmatpush1.bf16.msra.mxu1 %v8272_v33  ;;  %v8282_v7 = vld [vmem:[#allocation65_spill] sm:$0xff]  ;;  %v8283_v33 = vld [vmem:[#allocation66_spill] sm:$0xff] }
 0x6e8   :  { %5346 = vmatprep.subr.bf16.mxu0 %v8273_v31  ;;  %5378 = vmatprep.subr.bf16.mxu1 %v8274_v38  ;;  %v8284_v31 = vld [vmem:[#allocation67_spill] sm:$0xff]  ;;  %v8285_v38 = vld [vmem:[#allocation68_spill] sm:$0xff] }
 0x6eb   :  { %5348 = vmatpush1.bf16.msra.mxu0 %v8275_v0  ;;  %5380 = vmatpush1.bf16.msra.mxu1 %v8276_v3  ;;  %v8286_v0 = vld [vmem:[#allocation69_spill] sm:$0xff]  ;;  %v8287_v3 = vld [vmem:[#allocation70_spill] sm:$0xff] }
 0x6ec   :  { %5350 = vmatprep.subr.bf16.mxu0 %v8277_v11  ;;  %5382 = vmatprep.subr.bf16.mxu1 %v8278_v55  ;;  %v8288_v11 = vld [vmem:[#allocation71_spill] sm:$0xff]  ;;  %v8289_v55 = vld [vmem:[#allocation72_spill] sm:$0xff] }
 0x6ef   :  { %5352 = vmatpush1.bf16.msra.mxu0 %v8279_v23  ;;  %5384 = vmatpush1.bf16.msra.mxu1 %v8280_v50  ;;  %v8290_v23 = vld [vmem:[#allocation73_spill] sm:$0xff]  ;;  %v8291_v50 = vld [vmem:[#allocation74_spill] sm:$0xff] }
 0x6f0   :  { %5354 = vmatprep.subr.bf16.mxu0 %v8281_v19  ;;  %5386 = vmatprep.subr.bf16.mxu1 %v8282_v7  ;;  %v8292_v19 = vld [vmem:[#allocation75_spill] sm:$0xff]  ;;  %v8293_v7 = vld [vmem:[#allocation76_spill] sm:$0xff] }
 0x6f3   :  { %5356 = vmatpush1.bf16.msra.mxu0 %v8283_v33  ;;  %5388 = vmatpush1.bf16.msra.mxu1 %v8284_v31  ;;  %v8294_v33 = vld [vmem:[#allocation77_spill] sm:$0xff]  ;;  %v8295_v31 = vld [vmem:[#allocation78_spill] sm:$0xff] }
 0x6f4   :  { %5358 = vmatprep.subr.bf16.mxu0 %v8285_v38  ;;  %5390 = vmatprep.subr.bf16.mxu1 %v8286_v0  ;;  %v8296_v38 = vld [vmem:[#allocation79_spill] sm:$0xff]  ;;  %v8297_v0 = vld [vmem:[#allocation17_spill] sm:$0xff] }
 0x6f7   :  { %5360 = vmatpush1.bf16.msra.mxu0 %v8287_v3  ;;  %5392 = vmatpush1.bf16.msra.mxu1 %v8288_v11  ;;  %v8298_v3 = vld [vmem:[#allocation18_spill] sm:$0xff]  ;;  %v2131_v11 = vld [vmem:[#allocation2 + $0x60] sm:$0xff] }
 0x6f8   :  { %5362 = vmatprep.subr.bf16.mxu0 %v8289_v55  ;;  %5394 = vmatprep.subr.bf16.mxu1 %v8290_v23  ;;  %v2132_v55 = vld [vmem:[#allocation2 + $0x68] sm:$0xff] }
 0x6fb   :  { %5364 = vmatpush1.bf16.msra.mxu0 %v8291_v50  ;;  %5396 = vmatpush1.bf16.msra.mxu1 %v8292_v19 }
 0x6fc   :  { %5366 = vmatprep.subr.bf16.mxu0 %v8293_v7  ;;  %5398 = vmatprep.subr.bf16.mxu1 %v8294_v33 }
 0x6ff   :  { %5368 = vmatpush1.bf16.msra.mxu0 %v8295_v31  ;;  %5400 = vmatpush1.bf16.msra.mxu1 %v8296_v38  ;;  %v2133_v31 = vld [vmem:[#allocation2 + $0x70] sm:$0xff] }
 0x700   :  { %5402 = vmatprep.subr.bf16.mxu0 %v8297_v0  ;;  %5434 = vmatprep.subr.bf16.mxu1 %v8298_v3 }
 0x7b5   :  { %v2201_v13 = vpop.f32.mrb[14].mxu0  ;;  %v2272_v23 = vpop.f32.mrb[14].mxu1 }
 0x7b6   :  { %v2277_v53 = vadd.f32 %v2201_v13, %v2131_v11  ;;  %v2203_v50 = vpop.f32.mrb[15].mxu0  ;;  %v2274_v56 = vpop.f32.mrb[15].mxu1  ;;  %v2279_v38 = vadd.f32 %v2272_v23, %v2133_v31 }
 0x7b7   :  { %v2278_v19 = vadd.f32 %v2203_v50, %v2132_v55  ;;  %v2280_v33 = vadd.f32 %v2274_v56, %v2134_v35 }
 0x7b8   :  { %v2281_v7 = vmul.f32 0.5, %v2277_v53  ;;  %v2283_v0 = vmul.f32 0.5, %v2279_v38 }
 0x7b9   :  { %v2282_v20 = vmul.f32 0.5, %v2278_v19 }
 0x7ba   :  { %6298 = vtanh.f32 %v2281_v7 }
 0x7bb   :  { %6300 = vtanh.f32 %v2282_v20 }
 0x7bc   :  { %6302 = vtanh.f32 %v2280_v33 }
 0x7bd   :  { %6304 = vtanh.f32 %v2283_v0 }
 0x7c4   :  { %v6299_v4 = vpop.eup %6298 }
 0x7c5   :  { %v2287_v3 = vmul.f32 0.5, %v6299_v4  ;;  %v6301_v40 = vpop.eup %6300 }
 0x7c6   :  { %v2288_v24 = vmul.f32 0.5, %v6301_v40  ;;  %v6303_v11 = vpop.eup %6302 }
 0x7c7   :  { %v2290_v17 = vadd.f32 0.5, %v2287_v3  ;;  %v6305_v35 = vpop.eup %6304 }
 0x7c8   :  { %v2291_v13 = vadd.f32 0.5, %v2288_v24  ;;  %v2289_v20 = vmul.f32 0.5, %v6305_v35 }
 0x7c9   :  { %v2295_v28 = vmul.f32 %v6303_v11, %v2290_v17 }
 0x7ca   :  { %v2294_v55 = vmul.f32 %v2291_v13, %v7283_v41  ;;  %v2292_v56 = vadd.f32 0.5, %v2289_v20 }
 0x7cc   :  { %v7407_v53 = vadd.f32 %v2295_v28, %v2294_v55  ;;  %v206_v28 = vld [vmem:[%s205_s24] ss:$8 sm:$0xf]  ;;  %s237_s24 = sshra.s32 %s4537_s19, 3 }
 0x7cd   :  { %208 = vst.msk [vmem:[#allocation2 + $0x80] ss:$8 sm:$0xf] %vm6844_vm0, %v206_v28 }
 0x7ce   :  { %6306 = vtanh.f32 %v7407_v53 }
 0x7d8   :  { %v6307_v23 = vpop.eup %6306 }
 0x7d9   :  { %v7410_v50 = vmul.f32 %v6307_v23, %v2292_v56 }
 0x7db   :  { %2364 = vmatmul.mubr.f32.vlgmr.msra.gmra.mrb[12].mxu0 %v7410_v50  ;;  %2435 = vmatmul.mubr.f32.vlgmr.msra.gmra.mrb[12].mxu1 %v7410_v50 }
 0x7dc   :  { %5404 = vmatpush1.bf16.msra.mxu0 %v6706_v8  ;;  %5436 = vmatpush1.bf16.msra.mxu1 %v6716_v18 }
 0x7dd   :  { %5406 = vmatprep.subr.bf16.mxu0 %v6708_v9  ;;  %5438 = vmatprep.subr.bf16.mxu1 %v6722_v26 }
 0x7de   :  { %2527 = vmatprep.mubr.f32.mxu0 %v7090_v1  ;;  %2598 = vmatprep.mubr.f32.mxu1 %v7090_v1  ;;  %v310_v1 = vld [vmem:[%s309_s26] ss:$8 sm:$0xf]  ;;  %s4572_s26 = sshll.u32 %s237_s24, 5 }
 0x7df   :  { %312 = vst.msk [vmem:[#allocation2 + $0x81] ss:$8 sm:$0xf] %vm6844_vm0, %v310_v1  ;;  %s243_s29 = sadd.s32 %s4572_s26, %s240_s25 }
 0x7e0   :  { %5408 = vmatpush1.bf16.msra.mxu0 %v6712_v16  ;;  %5440 = vmatpush1.bf16.msra.mxu1 %v6725_v30  ;;  %s244_s9 = scalar_lea.vmem [#allocation6], %s243_s29 }
 0x7e1   :  { %5410 = vmatprep.subr.bf16.mxu0 %v6719_v22  ;;  %5442 = vmatprep.subr.bf16.mxu1 %v6734_v39 }
 0x7e4   :  { %5412 = vmatpush1.bf16.msra.mxu0 %v6728_v32  ;;  %5444 = vmatpush1.bf16.msra.mxu1 %v6737_v44 }
 0x7e5   :  { %5414 = vmatprep.subr.bf16.mxu0 %v6732_v36  ;;  %5446 = vmatprep.subr.bf16.mxu1 %v6743_v48 }
 0x7e8   :  { %5416 = vmatpush1.bf16.msra.mxu0 %v6740_v46  ;;  %5448 = vmatpush1.bf16.msra.mxu1 %v6749_v57 }
 0x7e9   :  { %5418 = vmatprep.subr.bf16.mxu0 %v6746_v51  ;;  %5450 = vmatprep.subr.bf16.mxu1 %v6755_v60 }
 0x7ec   :  { %5420 = vmatpush1.bf16.msra.mxu0 %v6752_v58  ;;  %5452 = vmatpush1.bf16.msra.mxu1 %v6761_v6 }
 0x7ed   :  { %5422 = vmatprep.subr.bf16.mxu0 %v6758_v63  ;;  %5454 = vmatprep.subr.bf16.mxu1 %v6767_v12 }
 0x7f0   :  { %5424 = vmatpush1.bf16.msra.mxu0 %v6764_v10  ;;  %5456 = vmatpush1.bf16.msra.mxu1 %v6775_v25 }
 0x7f1   :  { %5426 = vmatprep.subr.bf16.mxu0 %v6770_v15  ;;  %5458 = vmatprep.subr.bf16.mxu1 %v6783_v29 }
 0x7f4   :  { %5428 = vmatpush1.bf16.msra.mxu0 %v6780_v27  ;;  %5460 = vmatpush1.bf16.msra.mxu1 %v6789_v42 }
 0x7f5   :  { %5430 = vmatprep.subr.bf16.mxu0 %v6786_v34  ;;  %5462 = vmatprep.subr.bf16.mxu1 %v6795_v45 }
 0x7f8   :  { %5432 = vmatpush1.bf16.msra.mxu0 %v6792_v43  ;;  %5464 = vmatpush1.bf16.msra.mxu1 %v6802_v61 }
 0x7f9   :  { %5466 = vmatprep.subr.bf16.mxu0 %v6798_v52  ;;  %5498 = vmatprep.subr.bf16.mxu1 %v8177_v37 }
 0x8ae   :  { %v2365_v41 = vpop.f32.mrb[12].mxu0  ;;  %v2436_v24 = vpop.f32.mrb[12].mxu1 }
 0x8af   :  { %v2441_v17 = vadd.f32 %v2365_v41, %v8238_v14  ;;  %v2367_v40 = vpop.f32.mrb[13].mxu0  ;;  %v2438_v4 = vpop.f32.mrb[13].mxu1  ;;  %v2443_v31 = vadd.f32 %v2436_v24, %v7080_v2 }
 0x8b0   :  { %v2442_v3 = vadd.f32 %v2367_v40, %v7073_v59  ;;  %v2444_v33 = vadd.f32 %v2438_v4, %v7076_v54 }
 0x8b1   :  { %v2445_v38 = vmul.f32 0.5, %v2441_v17  ;;  %v2447_v19 = vmul.f32 0.5, %v2443_v31  ;;  %v8303_v31 = vld [vmem:[#allocation25_spill] sm:$0xff] }
 0x8b2   :  { %v2446_v7 = vmul.f32 0.5, %v2442_v3  ;;  %v8299_v3 = vld [vmem:[#allocation21_spill] sm:$0xff] }
 0x8b3   :  { %6308 = vtanh.f32 %v2445_v38  ;;  %v8300_v38 = vld [vmem:[#allocation20_spill] sm:$0xff] }
 0x8b4   :  { %6310 = vtanh.f32 %v2446_v7  ;;  %v8301_v7 = vld [vmem:[#allocation23_spill] sm:$0xff] }
 0x8b5   :  { %6312 = vtanh.f32 %v2444_v33  ;;  %v8302_v33 = vld [vmem:[#allocation22_spill] sm:$0xff] }
 0x8b6   :  { %6314 = vtanh.f32 %v2447_v19  ;;  %v8304_v19 = vld [vmem:[#allocation24_spill] sm:$0xff] }
 0x8bd   :  { %v6309_v0 = vpop.eup %6308 }
 0x8be   :  { %v2451_v11 = vmul.f32 0.5, %v6309_v0  ;;  %v6311_v13 = vpop.eup %6310  ;;  %v8305_v0 = vld [vmem:[#allocation28_spill] sm:$0xff] }
 0x8bf   :  { %v2452_v35 = vmul.f32 0.5, %v6311_v13  ;;  %v6313_v20 = vpop.eup %6312  ;;  %v8307_v13 = vld [vmem:[#allocation30_spill] sm:$0xff] }
 0x8c0   :  { %v2454_v55 = vadd.f32 0.5, %v2451_v11  ;;  %v6315_v41 = vpop.eup %6314  ;;  %v8306_v11 = vld [vmem:[#allocation27_spill] sm:$0xff] }
 0x8c1   :  { %v2455_v56 = vadd.f32 0.5, %v2452_v35  ;;  %v2453_v17 = vmul.f32 0.5, %v6315_v41  ;;  %v8309_v35 = vld [vmem:[#allocation32_spill] sm:$0xff]  ;;  %v8314_v41 = vld [vmem:[#allocation35_spill] sm:$0xff] }
 0x8c2   :  { %v2459_v23 = vmul.f32 %v6313_v20, %v2454_v55  ;;  %v8308_v55 = vld [vmem:[#allocation29_spill] sm:$0xff]  ;;  %v8310_v20 = vld [vmem:[#allocation31_spill] sm:$0xff] }
 0x8c3   :  { %v2458_v28 = vmul.f32 %v2455_v56, %v7333_v47  ;;  %v2456_v40 = vadd.f32 0.5, %v2453_v17  ;;  %v7464_v47 = vld [vmem:[#allocation2 + $0xa0] sm:$0xff]  ;;  %v8311_v56 = vld [vmem:[#allocation34_spill] sm:$0xff] }
 0x8c4   :  { %v8315_v17 = vld [vmem:[#allocation38_spill] sm:$0xff] }
 0x8c5   :  { %v7457_v1 = vadd.f32 %v2459_v23, %v2458_v28  ;;  %v8312_v23 = vld [vmem:[#allocation33_spill] sm:$0xff]  ;;  %v8313_v28 = vld [vmem:[#allocation36_spill] sm:$0xff] }
 0x8c7   :  { %6316 = vtanh.f32 %v7457_v1 }
 0x8d1   :  { %v6317_v24 = vpop.eup %6316 }
 0x8d2   :  { %v2462_v4 = vmul.f32 %v6317_v24, %v2456_v40  ;;  %v8316_v40 = vld [vmem:[#allocation37_spill] sm:$0xff]  ;;  %v8317_v24 = vld [vmem:[#allocation40_spill] sm:$0xff] }
 0x8d4   :  { %2528 = vmatmul.mubr.f32.vlgmr.msra.gmra.mrb[16].mxu0 %v2462_v4  ;;  %2599 = vmatmul.mubr.f32.vlgmr.msra.gmra.mrb[16].mxu1 %v2462_v4  ;;  %v8318_v4 = vld [vmem:[#allocation39_spill] sm:$0xff] }
 0x8d5   :  { %5468 = vmatpush1.bf16.msra.mxu0 %v6807_v62  ;;  %5500 = vmatpush1.bf16.msra.mxu1 %v6818_v21 }
 0x8d6   :  { %5470 = vmatprep.subr.bf16.mxu0 %v6812_v5  ;;  %5502 = vmatprep.subr.bf16.mxu1 %v8299_v3 }
 0x8d7   :  { %2673 = vmatprep.mubr.f32.mxu0 %v7464_v47  ;;  %2744 = vmatprep.mubr.f32.mxu1 %v7464_v47 }
 0x8d9   :  { %5472 = vmatpush1.bf16.msra.mxu0 %v8300_v38  ;;  %5504 = vmatpush1.bf16.msra.mxu1 %v8301_v7 }
 0x8da   :  { %5474 = vmatprep.subr.bf16.mxu0 %v8302_v33  ;;  %5506 = vmatprep.subr.bf16.mxu1 %v8303_v31 }
 0x8dd   :  { %5476 = vmatpush1.bf16.msra.mxu0 %v8304_v19  ;;  %5508 = vmatpush1.bf16.msra.mxu1 %v8305_v0  ;;  %v2608_v0 = vld [vmem:[#allocation2 + $0x98] sm:$0xff] }
 0x8de   :  { %5478 = vmatprep.subr.bf16.mxu0 %v8306_v11  ;;  %5510 = vmatprep.subr.bf16.mxu1 %v8307_v13 }
 0x8e1   :  { %5480 = vmatpush1.bf16.msra.mxu0 %v8308_v55  ;;  %5512 = vmatpush1.bf16.msra.mxu1 %v8309_v35  ;;  %v8319_v55 = vld [vmem:[#allocation42_spill] sm:$0xff]  ;;  %v8320_v35 = vld [vmem:[#allocation41_spill] sm:$0xff] }
 0x8e2   :  { %5482 = vmatprep.subr.bf16.mxu0 %v8310_v20  ;;  %5514 = vmatprep.subr.bf16.mxu1 %v8311_v56  ;;  %v8321_v20 = vld [vmem:[#allocation44_spill] sm:$0xff]  ;;  %v8322_v56 = vld [vmem:[#allocation43_spill] sm:$0xff] }
 0x8e5   :  { %5484 = vmatpush1.bf16.msra.mxu0 %v8312_v23  ;;  %5516 = vmatpush1.bf16.msra.mxu1 %v8313_v28  ;;  %v8323_v23 = vld [vmem:[#allocation46_spill] sm:$0xff]  ;;  %v8324_v28 = vld [vmem:[#allocation45_spill] sm:$0xff] }
 0x8e6   :  { %5486 = vmatprep.subr.bf16.mxu0 %v8314_v41  ;;  %5518 = vmatprep.subr.bf16.mxu1 %v8315_v17  ;;  %v8325_v41 = vld [vmem:[#allocation47_spill] sm:$0xff]  ;;  %v8326_v17 = vld [vmem:[#allocation48_spill] sm:$0xff] }
 0x8e9   :  { %5488 = vmatpush1.bf16.msra.mxu0 %v8316_v40  ;;  %5520 = vmatpush1.bf16.msra.mxu1 %v8317_v24  ;;  %v8327_v40 = vld [vmem:[#allocation49_spill] sm:$0xff] }
 0x8ea   :  { %5490 = vmatprep.subr.bf16.mxu0 %v8318_v4  ;;  %5522 = vmatprep.subr.bf16.mxu1 %v8319_v55  ;;  %v8328_v55 = vld [vmem:[#allocation50_spill] sm:$0xff]  ;;  %v8342_v4 = vld [vmem:[#allocation64_spill] sm:$0xff] }
 0x8ed   :  { %5492 = vmatpush1.bf16.msra.mxu0 %v8320_v35  ;;  %5524 = vmatpush1.bf16.msra.mxu1 %v8321_v20  ;;  %v8329_v35 = vld [vmem:[#allocation51_spill] sm:$0xff]  ;;  %v8330_v20 = vld [vmem:[#allocation52_spill] sm:$0xff] }
 0x8ee   :  { %5494 = vmatprep.subr.bf16.mxu0 %v8322_v56  ;;  %5526 = vmatprep.subr.bf16.mxu1 %v8323_v23  ;;  %v8331_v56 = vld [vmem:[#allocation53_spill] sm:$0xff]  ;;  %v8341_v23 = vld [vmem:[#allocation63_spill] sm:$0xff] }
 0x8f1   :  { %5496 = vmatpush1.bf16.msra.mxu0 %v8324_v28  ;;  %5528 = vmatpush1.bf16.msra.mxu1 %v8325_v41  ;;  %v8332_v41 = vld [vmem:[#allocation54_spill] sm:$0xff]  ;;  %v8335_v28 = vld [vmem:[#allocation57_spill] sm:$0xff] }
 0x8f2   :  { %5530 = vmatprep.subr.bf16.mxu0 %v8326_v17  ;;  %5562 = vmatprep.subr.bf16.mxu1 %v8327_v40  ;;  %v8333_v17 = vld [vmem:[#allocation55_spill] sm:$0xff]  ;;  %v8334_v40 = vld [vmem:[#allocation56_spill] sm:$0xff] }
 0x8f4   :  { %2674 = vmatmul.mubr.f32.vlgmr.msra.gmra.mrb[18].mxu0 %v7410_v50  ;;  %2745 = vmatmul.mubr.f32.vlgmr.msra.gmra.mrb[18].mxu1 %v7410_v50  ;;  %v8336_v50 = vld [vmem:[#allocation58_spill] sm:$0xff] }
 0x8f5   :  { %5532 = vmatpush1.bf16.msra.mxu0 %v8328_v55  ;;  %5564 = vmatpush1.bf16.msra.mxu1 %v8329_v35  ;;  %v8337_v55 = vld [vmem:[#allocation59_spill] sm:$0xff]  ;;  %v8338_v35 = vld [vmem:[#allocation60_spill] sm:$0xff] }
 0x8f6   :  { %5534 = vmatprep.subr.bf16.mxu0 %v8330_v20  ;;  %5566 = vmatprep.subr.bf16.mxu1 %v8331_v56  ;;  %v8339_v20 = vld [vmem:[#allocation61_spill] sm:$0xff]  ;;  %v8340_v56 = vld [vmem:[#allocation62_spill] sm:$0xff] }
 0x8f7   :  { %2837 = vmatprep.mubr.f32.mxu0 %v7464_v47  ;;  %2908 = vmatprep.mubr.f32.mxu1 %v7464_v47 }
 0x8f9   :  { %5536 = vmatpush1.bf16.msra.mxu0 %v8332_v41  ;;  %5568 = vmatpush1.bf16.msra.mxu1 %v8333_v17  ;;  %v8343_v41 = vld [vmem:[#allocation65_spill] sm:$0xff]  ;;  %v8344_v17 = vld [vmem:[#allocation66_spill] sm:$0xff] }
 0x8fa   :  { %5538 = vmatprep.subr.bf16.mxu0 %v8334_v40  ;;  %5570 = vmatprep.subr.bf16.mxu1 %v8335_v28  ;;  %v8345_v40 = vld [vmem:[#allocation67_spill] sm:$0xff]  ;;  %v8346_v28 = vld [vmem:[#allocation68_spill] sm:$0xff] }
 0x8fd   :  { %5540 = vmatpush1.bf16.msra.mxu0 %v8336_v50  ;;  %5572 = vmatpush1.bf16.msra.mxu1 %v8337_v55  ;;  %v8347_v50 = vld [vmem:[#allocation69_spill] sm:$0xff]  ;;  %v8348_v55 = vld [vmem:[#allocation70_spill] sm:$0xff] }
 0x8fe   :  { %5542 = vmatprep.subr.bf16.mxu0 %v8338_v35  ;;  %5574 = vmatprep.subr.bf16.mxu1 %v8339_v20  ;;  %v8349_v35 = vld [vmem:[#allocation71_spill] sm:$0xff]  ;;  %v8350_v20 = vld [vmem:[#allocation72_spill] sm:$0xff] }
 0x901   :  { %5544 = vmatpush1.bf16.msra.mxu0 %v8340_v56  ;;  %5576 = vmatpush1.bf16.msra.mxu1 %v8341_v23  ;;  %v8351_v56 = vld [vmem:[#allocation73_spill] sm:$0xff]  ;;  %v8352_v23 = vld [vmem:[#allocation74_spill] sm:$0xff] }
 0x902   :  { %5546 = vmatprep.subr.bf16.mxu0 %v8342_v4  ;;  %5578 = vmatprep.subr.bf16.mxu1 %v8343_v41  ;;  %v8353_v4 = vld [vmem:[#allocation75_spill] sm:$0xff]  ;;  %v8354_v41 = vld [vmem:[#allocation76_spill] sm:$0xff] }
 0x905   :  { %5548 = vmatpush1.bf16.msra.mxu0 %v8344_v17  ;;  %5580 = vmatpush1.bf16.msra.mxu1 %v8345_v40  ;;  %v8355_v17 = vld [vmem:[#allocation77_spill] sm:$0xff]  ;;  %v8356_v40 = vld [vmem:[#allocation78_spill] sm:$0xff] }
 0x906   :  { %5550 = vmatprep.subr.bf16.mxu0 %v8346_v28  ;;  %5582 = vmatprep.subr.bf16.mxu1 %v8347_v50  ;;  %v8357_v28 = vld [vmem:[#allocation79_spill] sm:$0xff]  ;;  %v8358_v50 = vld [vmem:[#allocation17_spill] sm:$0xff] }
 0x909   :  { %5552 = vmatpush1.bf16.msra.mxu0 %v8348_v55  ;;  %5584 = vmatpush1.bf16.msra.mxu1 %v8349_v35  ;;  %v8359_v55 = vld [vmem:[#allocation18_spill] sm:$0xff]  ;;  %v2605_v35 = vld [vmem:[#allocation2 + $0x80] sm:$0xff] }
 0x90a   :  { %5554 = vmatprep.subr.bf16.mxu0 %v8350_v20  ;;  %5586 = vmatprep.subr.bf16.mxu1 %v8351_v56  ;;  %v2606_v20 = vld [vmem:[#allocation2 + $0x88] sm:$0xff] }
 0x90d   :  { %5556 = vmatpush1.bf16.msra.mxu0 %v8352_v23  ;;  %5588 = vmatpush1.bf16.msra.mxu1 %v8353_v4 }
 0x90e   :  { %5558 = vmatprep.subr.bf16.mxu0 %v8354_v41  ;;  %5590 = vmatprep.subr.bf16.mxu1 %v8355_v17 }
 0x911   :  { %5560 = vmatpush1.bf16.msra.mxu0 %v8356_v40  ;;  %5592 = vmatpush1.bf16.msra.mxu1 %v8357_v28  ;;  %v2607_v40 = vld [vmem:[#allocation2 + $0x90] sm:$0xff] }
 0x912   :  { %5594 = vmatprep.subr.bf16.mxu0 %v8358_v50  ;;  %5626 = vmatprep.subr.bf16.mxu1 %v8359_v55 }
 0x9c7   :  { %v2675_v24 = vpop.f32.mrb[18].mxu0  ;;  %v2746_v56 = vpop.f32.mrb[18].mxu1 }
 0x9c8   :  { %v2751_v13 = vadd.f32 %v2675_v24, %v2605_v35  ;;  %v2677_v23 = vpop.f32.mrb[19].mxu0  ;;  %v2748_v11 = vpop.f32.mrb[19].mxu1  ;;  %v2753_v28 = vadd.f32 %v2746_v56, %v2607_v40 }
 0x9c9   :  { %v2752_v4 = vadd.f32 %v2677_v23, %v2606_v20  ;;  %v2754_v17 = vadd.f32 %v2748_v11, %v2608_v0 }
 0x9ca   :  { %v2755_v41 = vmul.f32 0.5, %v2751_v13  ;;  %v2757_v50 = vmul.f32 0.5, %v2753_v28 }
 0x9cb   :  { %v2756_v19 = vmul.f32 0.5, %v2752_v4 }
 0x9cc   :  { %6318 = vtanh.f32 %v2755_v41 }
 0x9cd   :  { %6320 = vtanh.f32 %v2756_v19 }
 0x9ce   :  { %6322 = vtanh.f32 %v2754_v17 }
 0x9cf   :  { %6324 = vtanh.f32 %v2757_v50 }
 0x9d6   :  { %v6319_v31 = vpop.eup %6318 }
 0x9d7   :  { %v2761_v55 = vmul.f32 0.5, %v6319_v31  ;;  %v6321_v33 = vpop.eup %6320 }
 0x9d8   :  { %v2762_v38 = vmul.f32 0.5, %v6321_v33  ;;  %v6323_v35 = vpop.eup %6322 }
 0x9d9   :  { %v2764_v7 = vadd.f32 0.5, %v2761_v55  ;;  %v6325_v0 = vpop.eup %6324 }
 0x9da   :  { %v2765_v24 = vadd.f32 0.5, %v2762_v38  ;;  %v2763_v19 = vmul.f32 0.5, %v6325_v0 }
 0x9db   :  { %v2769_v3 = vmul.f32 %v6323_v35, %v2764_v7 }
 0x9dc   :  { %v2768_v20 = vmul.f32 %v2765_v24, %v7407_v53  ;;  %v2766_v11 = vadd.f32 0.5, %v2763_v19  ;;  %v219_v53 = vld [vmem:[%s218_s13] ss:$8 sm:$0xf] }
 0x9dd   :  { %221 = vst.msk [vmem:[#allocation2 + $0xa0] ss:$8 sm:$0xf] %vm6844_vm0, %v219_v53 }
 0x9de   :  { %v7533_v13 = vadd.f32 %v2769_v3, %v2768_v20  ;;  %v323_v3 = vld [vmem:[%s322_s15] ss:$8 sm:$0xf] }
 0x9df   :  { %325 = vst.msk [vmem:[#allocation2 + $0xa1] ss:$8 sm:$0xf] %vm6844_vm0, %v323_v3 }
 0x9e0   :  { %6326 = vtanh.f32 %v7533_v13 }
 0x9ea   :  { %v6327_v56 = vpop.eup %6326 }
 0x9eb   :  { %v7536_v23 = vmul.f32 %v6327_v56, %v2766_v11 }
 0x9ed   :  { %2838 = vmatmul.mubr.f32.vlgmr.msra.gmra.mrb[16].mxu0 %v7536_v23  ;;  %2909 = vmatmul.mubr.f32.vlgmr.msra.gmra.mrb[16].mxu1 %v7536_v23 }
 0x9ee   :  { %5596 = vmatpush1.bf16.msra.mxu0 %v6706_v8  ;;  %5628 = vmatpush1.bf16.msra.mxu1 %v6716_v18 }
 0x9ef   :  { %5598 = vmatprep.subr.bf16.mxu0 %v6708_v9  ;;  %5630 = vmatprep.subr.bf16.mxu1 %v6722_v26 }
 0x9f0   :  { %3001 = vmatprep.mubr.f32.mxu0 %v7464_v47  ;;  %3072 = vmatprep.mubr.f32.mxu1 %v7464_v47 }
 0x9f2   :  { %5600 = vmatpush1.bf16.msra.mxu0 %v6712_v16  ;;  %5632 = vmatpush1.bf16.msra.mxu1 %v6725_v30 }
 0x9f3   :  { %5602 = vmatprep.subr.bf16.mxu0 %v6719_v22  ;;  %5634 = vmatprep.subr.bf16.mxu1 %v6734_v39 }
 0x9f6   :  { %5604 = vmatpush1.bf16.msra.mxu0 %v6728_v32  ;;  %5636 = vmatpush1.bf16.msra.mxu1 %v6737_v44 }
 0x9f7   :  { %5606 = vmatprep.subr.bf16.mxu0 %v6732_v36  ;;  %5638 = vmatprep.subr.bf16.mxu1 %v6743_v48 }
 0x9fa   :  { %5608 = vmatpush1.bf16.msra.mxu0 %v6740_v46  ;;  %5640 = vmatpush1.bf16.msra.mxu1 %v6749_v57 }
 0x9fb   :  { %5610 = vmatprep.subr.bf16.mxu0 %v6746_v51  ;;  %5642 = vmatprep.subr.bf16.mxu1 %v6755_v60 }
 0x9fe   :  { %5612 = vmatpush1.bf16.msra.mxu0 %v6752_v58  ;;  %5644 = vmatpush1.bf16.msra.mxu1 %v6761_v6 }
 0x9ff   :  { %5614 = vmatprep.subr.bf16.mxu0 %v6758_v63  ;;  %5646 = vmatprep.subr.bf16.mxu1 %v6767_v12 }
 0xa02   :  { %5616 = vmatpush1.bf16.msra.mxu0 %v6764_v10  ;;  %5648 = vmatpush1.bf16.msra.mxu1 %v6775_v25 }
 0xa03   :  { %5618 = vmatprep.subr.bf16.mxu0 %v6770_v15  ;;  %5650 = vmatprep.subr.bf16.mxu1 %v6783_v29 }
 0xa06   :  { %5620 = vmatpush1.bf16.msra.mxu0 %v6780_v27  ;;  %5652 = vmatpush1.bf16.msra.mxu1 %v6789_v42 }
 0xa07   :  { %5622 = vmatprep.subr.bf16.mxu0 %v6786_v34  ;;  %5654 = vmatprep.subr.bf16.mxu1 %v6795_v45 }
 0xa0a   :  { %5624 = vmatpush1.bf16.msra.mxu0 %v6792_v43  ;;  %5656 = vmatpush1.bf16.msra.mxu1 %v6802_v61 }
 0xa0b   :  { %5658 = vmatprep.subr.bf16.mxu0 %v6798_v52  ;;  %5690 = vmatprep.subr.bf16.mxu1 %v8177_v37 }
 0xac0   :  { %v2839_v38 = vpop.f32.mrb[16].mxu0  ;;  %v2910_v7 = vpop.f32.mrb[16].mxu1 }
 0xac1   :  { %v2915_v33 = vadd.f32 %v2839_v38, %v8238_v14  ;;  %v2841_v31 = vpop.f32.mrb[17].mxu0  ;;  %v2912_v55 = vpop.f32.mrb[17].mxu1  ;;  %v2917_v4 = vadd.f32 %v2910_v7, %v7080_v2 }
 0xac2   :  { %v2916_v28 = vadd.f32 %v2841_v31, %v7073_v59  ;;  %v2918_v40 = vadd.f32 %v2912_v55, %v7076_v54 }
 0xac3   :  { %v2919_v41 = vmul.f32 0.5, %v2915_v33  ;;  %v2921_v50 = vmul.f32 0.5, %v2917_v4  ;;  %v8364_v4 = vld [vmem:[#allocation25_spill] sm:$0xff] }
 0xac4   :  { %v2920_v17 = vmul.f32 0.5, %v2916_v28 }
 0xac5   :  { %6328 = vtanh.f32 %v2919_v41  ;;  %v8360_v41 = vld [vmem:[#allocation21_spill] sm:$0xff] }
 0xac6   :  { %6330 = vtanh.f32 %v2920_v17  ;;  %v8362_v17 = vld [vmem:[#allocation23_spill] sm:$0xff] }
 0xac7   :  { %6332 = vtanh.f32 %v2918_v40  ;;  %v8363_v40 = vld [vmem:[#allocation22_spill] sm:$0xff] }
 0xac8   :  { %6334 = vtanh.f32 %v2921_v50  ;;  %v8365_v50 = vld [vmem:[#allocation24_spill] sm:$0xff] }
 0xacf   :  { %v6329_v35 = vpop.eup %6328 }
 0xad0   :  { %v2925_v24 = vmul.f32 0.5, %v6329_v35  ;;  %v6331_v20 = vpop.eup %6330  ;;  %v8366_v35 = vld [vmem:[#allocation28_spill] sm:$0xff] }
 0xad1   :  { %v2926_v19 = vmul.f32 0.5, %v6331_v20  ;;  %v6333_v11 = vpop.eup %6332  ;;  %v8368_v20 = vld [vmem:[#allocation30_spill] sm:$0xff] }
 0xad2   :  { %v2928_v0 = vadd.f32 0.5, %v2925_v24  ;;  %v6335_v33 = vpop.eup %6334  ;;  %v8367_v24 = vld [vmem:[#allocation27_spill] sm:$0xff] }
 0xad3   :  { %v2929_v56 = vadd.f32 0.5, %v2926_v19  ;;  %v2927_v31 = vmul.f32 0.5, %v6335_v33  ;;  %v8370_v19 = vld [vmem:[#allocation32_spill] sm:$0xff]  ;;  %v8375_v33 = vld [vmem:[#allocation35_spill] sm:$0xff] }
 0xad4   :  { %v2933_v53 = vmul.f32 %v6333_v11, %v2928_v0  ;;  %v8369_v0 = vld [vmem:[#allocation29_spill] sm:$0xff]  ;;  %v8371_v11 = vld [vmem:[#allocation31_spill] sm:$0xff] }
 0xad5   :  { %v2932_v3 = vmul.f32 %v2929_v56, %v7457_v1  ;;  %v2930_v55 = vadd.f32 0.5, %v2927_v31  ;;  %v8361_v1 = vld [vmem:[#allocation20_spill] sm:$0xff]  ;;  %v8372_v56 = vld [vmem:[#allocation34_spill] sm:$0xff] }
 0xad6   :  { %v8376_v31 = vld [vmem:[#allocation38_spill] sm:$0xff] }
 0xad7   :  { %v7583_v38 = vadd.f32 %v2933_v53, %v2932_v3  ;;  %v8373_v53 = vld [vmem:[#allocation33_spill] sm:$0xff]  ;;  %v8374_v3 = vld [vmem:[#allocation36_spill] sm:$0xff] }
 0xad9   :  { %6336 = vtanh.f32 %v7583_v38 }
 0xae3   :  { %v6337_v7 = vpop.eup %6336 }
 0xae4   :  { %v2936_v28 = vmul.f32 %v6337_v7, %v2930_v55  ;;  %v8377_v55 = vld [vmem:[#allocation37_spill] sm:$0xff]  ;;  %v8378_v7 = vld [vmem:[#allocation40_spill] sm:$0xff] }
 0xae6   :  { %3002 = vmatmul.mubr.f32.vlgmr.msra.gmra.mrb[20].mxu0 %v2936_v28  ;;  %3073 = vmatmul.mubr.f32.vlgmr.msra.gmra.mrb[20].mxu1 %v2936_v28  ;;  %v8379_v28 = vld [vmem:[#allocation39_spill] sm:$0xff] }
 0xae7   :  { %5660 = vmatpush1.bf16.msra.mxu0 %v6807_v62  ;;  %5692 = vmatpush1.bf16.msra.mxu1 %v6818_v21 }
 0xae8   :  { %5662 = vmatprep.subr.bf16.mxu0 %v6812_v5  ;;  %5694 = vmatprep.subr.bf16.mxu1 %v8360_v41 }
 0xae9   :  { %3147 = vmatprep.mubr.f32.mxu0 %v7464_v47  ;;  %3218 = vmatprep.mubr.f32.mxu1 %v7464_v47 }
 0xaeb   :  { %5664 = vmatpush1.bf16.msra.mxu0 %v8361_v1  ;;  %5696 = vmatpush1.bf16.msra.mxu1 %v8362_v17 }
 0xaec   :  { %5666 = vmatprep.subr.bf16.mxu0 %v8363_v40  ;;  %5698 = vmatprep.subr.bf16.mxu1 %v8364_v4 }
 0xaef   :  { %5668 = vmatpush1.bf16.msra.mxu0 %v8365_v50  ;;  %5700 = vmatpush1.bf16.msra.mxu1 %v8366_v35  ;;  %v3082_v35 = vld [vmem:[#allocation2 + $0xb8] sm:$0xff] }
 0xaf0   :  { %5670 = vmatprep.subr.bf16.mxu0 %v8367_v24  ;;  %5702 = vmatprep.subr.bf16.mxu1 %v8368_v20 }
 0xaf3   :  { %5672 = vmatpush1.bf16.msra.mxu0 %v8369_v0  ;;  %5704 = vmatpush1.bf16.msra.mxu1 %v8370_v19  ;;  %v8380_v0 = vld [vmem:[#allocation42_spill] sm:$0xff]  ;;  %v8381_v19 = vld [vmem:[#allocation41_spill] sm:$0xff] }
 0xaf4   :  { %5674 = vmatprep.subr.bf16.mxu0 %v8371_v11  ;;  %5706 = vmatprep.subr.bf16.mxu1 %v8372_v56  ;;  %v8382_v11 = vld [vmem:[#allocation44_spill] sm:$0xff]  ;;  %v8383_v56 = vld [vmem:[#allocation43_spill] sm:$0xff] }
 0xaf7   :  { %5676 = vmatpush1.bf16.msra.mxu0 %v8373_v53  ;;  %5708 = vmatpush1.bf16.msra.mxu1 %v8374_v3  ;;  %v8384_v53 = vld [vmem:[#allocation46_spill] sm:$0xff]  ;;  %v8385_v3 = vld [vmem:[#allocation45_spill] sm:$0xff] }
 0xaf8   :  { %5678 = vmatprep.subr.bf16.mxu0 %v8375_v33  ;;  %5710 = vmatprep.subr.bf16.mxu1 %v8376_v31  ;;  %v8386_v33 = vld [vmem:[#allocation47_spill] sm:$0xff]  ;;  %v8387_v31 = vld [vmem:[#allocation48_spill] sm:$0xff] }
 0xafb   :  { %5680 = vmatpush1.bf16.msra.mxu0 %v8377_v55  ;;  %5712 = vmatpush1.bf16.msra.mxu1 %v8378_v7  ;;  %v8388_v55 = vld [vmem:[#allocation49_spill] sm:$0xff] }
 0xafc   :  { %5682 = vmatprep.subr.bf16.mxu0 %v8379_v28  ;;  %5714 = vmatprep.subr.bf16.mxu1 %v8380_v0  ;;  %v8389_v0 = vld [vmem:[#allocation50_spill] sm:$0xff]  ;;  %v8403_v28 = vld [vmem:[#allocation64_spill] sm:$0xff] }
 0xaff   :  { %5684 = vmatpush1.bf16.msra.mxu0 %v8381_v19  ;;  %5716 = vmatpush1.bf16.msra.mxu1 %v8382_v11  ;;  %v8390_v19 = vld [vmem:[#allocation51_spill] sm:$0xff]  ;;  %v8391_v11 = vld [vmem:[#allocation52_spill] sm:$0xff] }
 0xb00   :  { %5686 = vmatprep.subr.bf16.mxu0 %v8383_v56  ;;  %5718 = vmatprep.subr.bf16.mxu1 %v8384_v53  ;;  %v8392_v56 = vld [vmem:[#allocation53_spill] sm:$0xff]  ;;  %v8402_v53 = vld [vmem:[#allocation63_spill] sm:$0xff] }
 0xb03   :  { %5688 = vmatpush1.bf16.msra.mxu0 %v8385_v3  ;;  %5720 = vmatpush1.bf16.msra.mxu1 %v8386_v33  ;;  %v8393_v33 = vld [vmem:[#allocation54_spill] sm:$0xff]  ;;  %v8396_v3 = vld [vmem:[#allocation57_spill] sm:$0xff] }
 0xb04   :  { %5722 = vmatprep.subr.bf16.mxu0 %v8387_v31  ;;  %5754 = vmatprep.subr.bf16.mxu1 %v8388_v55  ;;  %v8394_v31 = vld [vmem:[#allocation55_spill] sm:$0xff]  ;;  %v8395_v55 = vld [vmem:[#allocation56_spill] sm:$0xff] }
 0xb06   :  { %3148 = vmatmul.mubr.f32.vlgmr.msra.gmra.mrb[22].mxu0 %v7536_v23  ;;  %3219 = vmatmul.mubr.f32.vlgmr.msra.gmra.mrb[22].mxu1 %v7536_v23  ;;  %v8397_v23 = vld [vmem:[#allocation58_spill] sm:$0xff] }
 0xb07   :  { %5724 = vmatpush1.bf16.msra.mxu0 %v8389_v0  ;;  %5756 = vmatpush1.bf16.msra.mxu1 %v8390_v19  ;;  %v8398_v0 = vld [vmem:[#allocation59_spill] sm:$0xff]  ;;  %v8399_v19 = vld [vmem:[#allocation60_spill] sm:$0xff] }
 0xb08   :  { %5726 = vmatprep.subr.bf16.mxu0 %v8391_v11  ;;  %5758 = vmatprep.subr.bf16.mxu1 %v8392_v56  ;;  %v8400_v11 = vld [vmem:[#allocation61_spill] sm:$0xff]  ;;  %v8401_v56 = vld [vmem:[#allocation62_spill] sm:$0xff] }
 0xb09   :  { %3311 = vmatprep.mubr.f32.mxu0 %v7464_v47  ;;  %3382 = vmatprep.mubr.f32.mxu1 %v7464_v47 }
 0xb0b   :  { %5728 = vmatpush1.bf16.msra.mxu0 %v8393_v33  ;;  %5760 = vmatpush1.bf16.msra.mxu1 %v8394_v31  ;;  %v8404_v33 = vld [vmem:[#allocation65_spill] sm:$0xff]  ;;  %v8405_v31 = vld [vmem:[#allocation66_spill] sm:$0xff] }
 0xb0c   :  { %5730 = vmatprep.subr.bf16.mxu0 %v8395_v55  ;;  %5762 = vmatprep.subr.bf16.mxu1 %v8396_v3  ;;  %v8406_v55 = vld [vmem:[#allocation67_spill] sm:$0xff]  ;;  %v8407_v3 = vld [vmem:[#allocation68_spill] sm:$0xff] }
 0xb0f   :  { %5732 = vmatpush1.bf16.msra.mxu0 %v8397_v23  ;;  %5764 = vmatpush1.bf16.msra.mxu1 %v8398_v0  ;;  %v8408_v23 = vld [vmem:[#allocation69_spill] sm:$0xff]  ;;  %v8409_v0 = vld [vmem:[#allocation70_spill] sm:$0xff] }
 0xb10   :  { %5734 = vmatprep.subr.bf16.mxu0 %v8399_v19  ;;  %5766 = vmatprep.subr.bf16.mxu1 %v8400_v11  ;;  %v8410_v19 = vld [vmem:[#allocation71_spill] sm:$0xff]  ;;  %v8411_v11 = vld [vmem:[#allocation72_spill] sm:$0xff] }
 0xb13   :  { %5736 = vmatpush1.bf16.msra.mxu0 %v8401_v56  ;;  %5768 = vmatpush1.bf16.msra.mxu1 %v8402_v53  ;;  %v8412_v56 = vld [vmem:[#allocation73_spill] sm:$0xff]  ;;  %v8413_v53 = vld [vmem:[#allocation74_spill] sm:$0xff] }
 0xb14   :  { %5738 = vmatprep.subr.bf16.mxu0 %v8403_v28  ;;  %5770 = vmatprep.subr.bf16.mxu1 %v8404_v33  ;;  %v8414_v28 = vld [vmem:[#allocation75_spill] sm:$0xff]  ;;  %v8415_v33 = vld [vmem:[#allocation76_spill] sm:$0xff] }
 0xb17   :  { %5740 = vmatpush1.bf16.msra.mxu0 %v8405_v31  ;;  %5772 = vmatpush1.bf16.msra.mxu1 %v8406_v55  ;;  %v8416_v31 = vld [vmem:[#allocation77_spill] sm:$0xff]  ;;  %v8417_v55 = vld [vmem:[#allocation78_spill] sm:$0xff] }
 0xb18   :  { %5742 = vmatprep.subr.bf16.mxu0 %v8407_v3  ;;  %5774 = vmatprep.subr.bf16.mxu1 %v8408_v23  ;;  %v8418_v3 = vld [vmem:[#allocation79_spill] sm:$0xff]  ;;  %v8419_v23 = vld [vmem:[#allocation17_spill] sm:$0xff] }
 0xb1b   :  { %5744 = vmatpush1.bf16.msra.mxu0 %v8409_v0  ;;  %5776 = vmatpush1.bf16.msra.mxu1 %v8410_v19  ;;  %v8420_v0 = vld [vmem:[#allocation18_spill] sm:$0xff]  ;;  %v3079_v19 = vld [vmem:[#allocation2 + $0xa0] sm:$0xff] }
 0xb1c   :  { %5746 = vmatprep.subr.bf16.mxu0 %v8411_v11  ;;  %5778 = vmatprep.subr.bf16.mxu1 %v8412_v56  ;;  %v3080_v11 = vld [vmem:[#allocation2 + $0xa8] sm:$0xff] }
 0xb1f   :  { %5748 = vmatpush1.bf16.msra.mxu0 %v8413_v53  ;;  %5780 = vmatpush1.bf16.msra.mxu1 %v8414_v28 }
 0xb20   :  { %5750 = vmatprep.subr.bf16.mxu0 %v8415_v33  ;;  %5782 = vmatprep.subr.bf16.mxu1 %v8416_v31 }
 0xb23   :  { %5752 = vmatpush1.bf16.msra.mxu0 %v8417_v55  ;;  %5784 = vmatpush1.bf16.msra.mxu1 %v8418_v3  ;;  %v3081_v55 = vld [vmem:[#allocation2 + $0xb0] sm:$0xff] }
 0xb24   :  { %5786 = vmatprep.subr.bf16.mxu0 %v8419_v23  ;;  %5818 = vmatprep.subr.bf16.mxu1 %v8420_v0 }
 0xbd9   :  { %v3149_v7 = vpop.f32.mrb[22].mxu0  ;;  %v3220_v56 = vpop.f32.mrb[22].mxu1 }
 0xbda   :  { %v3225_v20 = vadd.f32 %v3149_v7, %v3079_v19  ;;  %v3151_v53 = vpop.f32.mrb[23].mxu0  ;;  %v3222_v24 = vpop.f32.mrb[23].mxu1  ;;  %v3227_v3 = vadd.f32 %v3220_v56, %v3081_v55 }
 0xbdb   :  { %v3226_v28 = vadd.f32 %v3151_v53, %v3080_v11  ;;  %v3228_v31 = vadd.f32 %v3222_v24, %v3082_v35 }
 0xbdc   :  { %v3229_v33 = vmul.f32 0.5, %v3225_v20  ;;  %v3231_v23 = vmul.f32 0.5, %v3227_v3 }
 0xbdd   :  { %v3230_v50 = vmul.f32 0.5, %v3226_v28 }
 0xbde   :  { %6338 = vtanh.f32 %v3229_v33 }
 0xbdf   :  { %6340 = vtanh.f32 %v3230_v50 }
 0xbe0   :  { %6342 = vtanh.f32 %v3228_v31 }
 0xbe1   :  { %6344 = vtanh.f32 %v3231_v23 }
 0xbe8   :  { %v6339_v4 = vpop.eup %6338 }
 0xbe9   :  { %v3235_v0 = vmul.f32 0.5, %v6339_v4  ;;  %v6341_v40 = vpop.eup %6340 }
 0xbea   :  { %v3236_v1 = vmul.f32 0.5, %v6341_v40  ;;  %v6343_v19 = vpop.eup %6342 }
 0xbeb   :  { %v3238_v17 = vadd.f32 0.5, %v3235_v0  ;;  %v6345_v35 = vpop.eup %6344 }
 0xbec   :  { %v3239_v7 = vadd.f32 0.5, %v3236_v1  ;;  %v3237_v50 = vmul.f32 0.5, %v6345_v35 }
 0xbed   :  { %v3243_v41 = vmul.f32 %v6343_v19, %v3238_v17 }
 0xbee   :  { %v3242_v11 = vmul.f32 %v3239_v7, %v7533_v13  ;;  %v3240_v24 = vadd.f32 0.5, %v3237_v50  ;;  %v232_v13 = vld [vmem:[%s231_s17] ss:$8 sm:$0xf] }
 0xbef   :  { %234 = vst.msk [vmem:[#allocation2 + $0xc0] ss:$8 sm:$0xf] %vm6844_vm0, %v232_v13 }
 0xbf0   :  { %v7657_v20 = vadd.f32 %v3243_v41, %v3242_v11  ;;  %v336_v41 = vld [vmem:[%s335_s18] ss:$8 sm:$0xf] }
 0xbf1   :  { %338 = vst.msk [vmem:[#allocation2 + $0xc1] ss:$8 sm:$0xf] %vm6844_vm0, %v336_v41 }
 0xbf2   :  { %6346 = vtanh.f32 %v7657_v20 }
 0xbfc   :  { %v6347_v56 = vpop.eup %6346 }
 0xbfd   :  { %v7660_v53 = vmul.f32 %v6347_v56, %v3240_v24 }
 0xbff   :  { %3312 = vmatmul.mubr.f32.vlgmr.msra.gmra.mrb[20].mxu0 %v7660_v53  ;;  %3383 = vmatmul.mubr.f32.vlgmr.msra.gmra.mrb[20].mxu1 %v7660_v53 }
 0xc00   :  { %5788 = vmatpush1.bf16.msra.mxu0 %v6706_v8  ;;  %5820 = vmatpush1.bf16.msra.mxu1 %v6716_v18 }
 0xc01   :  { %5790 = vmatprep.subr.bf16.mxu0 %v6708_v9  ;;  %5822 = vmatprep.subr.bf16.mxu1 %v6722_v26 }
 0xc02   :  { %3475 = vmatprep.mubr.f32.mxu0 %v7464_v47  ;;  %3546 = vmatprep.mubr.f32.mxu1 %v7464_v47 }
 0xc04   :  { %5792 = vmatpush1.bf16.msra.mxu0 %v6712_v16  ;;  %5824 = vmatpush1.bf16.msra.mxu1 %v6725_v30 }
 0xc05   :  { %5794 = vmatprep.subr.bf16.mxu0 %v6719_v22  ;;  %5826 = vmatprep.subr.bf16.mxu1 %v6734_v39 }
 0xc08   :  { %5796 = vmatpush1.bf16.msra.mxu0 %v6728_v32  ;;  %5828 = vmatpush1.bf16.msra.mxu1 %v6737_v44 }
 0xc09   :  { %5798 = vmatprep.subr.bf16.mxu0 %v6732_v36  ;;  %5830 = vmatprep.subr.bf16.mxu1 %v6743_v48 }
 0xc0c   :  { %5800 = vmatpush1.bf16.msra.mxu0 %v6740_v46  ;;  %5832 = vmatpush1.bf16.msra.mxu1 %v6749_v57 }
 0xc0d   :  { %5802 = vmatprep.subr.bf16.mxu0 %v6746_v51  ;;  %5834 = vmatprep.subr.bf16.mxu1 %v6755_v60 }
 0xc10   :  { %5804 = vmatpush1.bf16.msra.mxu0 %v6752_v58  ;;  %5836 = vmatpush1.bf16.msra.mxu1 %v6761_v6 }
 0xc11   :  { %5806 = vmatprep.subr.bf16.mxu0 %v6758_v63  ;;  %5838 = vmatprep.subr.bf16.mxu1 %v6767_v12 }
 0xc14   :  { %5808 = vmatpush1.bf16.msra.mxu0 %v6764_v10  ;;  %5840 = vmatpush1.bf16.msra.mxu1 %v6775_v25 }
 0xc15   :  { %5810 = vmatprep.subr.bf16.mxu0 %v6770_v15  ;;  %5842 = vmatprep.subr.bf16.mxu1 %v6783_v29 }
 0xc18   :  { %5812 = vmatpush1.bf16.msra.mxu0 %v6780_v27  ;;  %5844 = vmatpush1.bf16.msra.mxu1 %v6789_v42 }
 0xc19   :  { %5814 = vmatprep.subr.bf16.mxu0 %v6786_v34  ;;  %5846 = vmatprep.subr.bf16.mxu1 %v6795_v45 }
 0xc1c   :  { %5816 = vmatpush1.bf16.msra.mxu0 %v6792_v43  ;;  %5848 = vmatpush1.bf16.msra.mxu1 %v6802_v61 }
 0xc1d   :  { %5850 = vmatprep.subr.bf16.mxu0 %v6798_v52  ;;  %5882 = vmatprep.subr.bf16.mxu1 %v8177_v37 }
 0xcd2   :  { %v3313_v1 = vpop.f32.mrb[20].mxu0  ;;  %v3384_v17 = vpop.f32.mrb[20].mxu1 }
 0xcd3   :  { %v3389_v40 = vadd.f32 %v3313_v1, %v8238_v14  ;;  %v3315_v4 = vpop.f32.mrb[21].mxu0  ;;  %v3386_v0 = vpop.f32.mrb[21].mxu1  ;;  %v3391_v28 = vadd.f32 %v3384_v17, %v7080_v2 }
 0xcd4   :  { %v3390_v3 = vadd.f32 %v3315_v4, %v7073_v59  ;;  %v3392_v55 = vadd.f32 %v3386_v0, %v7076_v54 }
 0xcd5   :  { %v3393_v33 = vmul.f32 0.5, %v3389_v40  ;;  %v3395_v23 = vmul.f32 0.5, %v3391_v28  ;;  %v8425_v28 = vld [vmem:[#allocation25_spill] sm:$0xff] }
 0xcd6   :  { %v3394_v31 = vmul.f32 0.5, %v3390_v3 }
 0xcd7   :  { %6348 = vtanh.f32 %v3393_v33  ;;  %v8421_v33 = vld [vmem:[#allocation21_spill] sm:$0xff] }
 0xcd8   :  { %6350 = vtanh.f32 %v3394_v31  ;;  %v8423_v31 = vld [vmem:[#allocation23_spill] sm:$0xff] }
 0xcd9   :  { %6352 = vtanh.f32 %v3392_v55  ;;  %v8424_v55 = vld [vmem:[#allocation22_spill] sm:$0xff] }
 0xcda   :  { %6354 = vtanh.f32 %v3395_v23  ;;  %v8426_v23 = vld [vmem:[#allocation24_spill] sm:$0xff] }
 0xce1   :  { %v6349_v19 = vpop.eup %6348 }
 0xce2   :  { %v3399_v7 = vmul.f32 0.5, %v6349_v19  ;;  %v6351_v11 = vpop.eup %6350  ;;  %v8427_v19 = vld [vmem:[#allocation28_spill] sm:$0xff] }
 0xce3   :  { %v3400_v50 = vmul.f32 0.5, %v6351_v11  ;;  %v6353_v24 = vpop.eup %6352  ;;  %v8429_v11 = vld [vmem:[#allocation30_spill] sm:$0xff] }
 0xce4   :  { %v3402_v35 = vadd.f32 0.5, %v3399_v7  ;;  %v6355_v40 = vpop.eup %6354  ;;  %v8428_v7 = vld [vmem:[#allocation27_spill] sm:$0xff] }
 0xce5   :  { %v3403_v56 = vadd.f32 0.5, %v3400_v50  ;;  %v3401_v4 = vmul.f32 0.5, %v6355_v40  ;;  %v8431_v50 = vld [vmem:[#allocation32_spill] sm:$0xff]  ;;  %v8436_v40 = vld [vmem:[#allocation35_spill] sm:$0xff] }
 0xce6   :  { %v3407_v13 = vmul.f32 %v6353_v24, %v3402_v35  ;;  %v8430_v35 = vld [vmem:[#allocation29_spill] sm:$0xff]  ;;  %v8432_v24 = vld [vmem:[#allocation31_spill] sm:$0xff] }
 0xce7   :  { %v3406_v41 = vmul.f32 %v3403_v56, %v7583_v38  ;;  %v3404_v0 = vadd.f32 0.5, %v3401_v4  ;;  %v8422_v38 = vld [vmem:[#allocation20_spill] sm:$0xff]  ;;  %v8433_v56 = vld [vmem:[#allocation34_spill] sm:$0xff] }
 0xce8   :  { %v8437_v4 = vld [vmem:[#allocation38_spill] sm:$0xff] }
 0xce9   :  { %v7707_v1 = vadd.f32 %v3407_v13, %v3406_v41  ;;  %v8434_v13 = vld [vmem:[#allocation33_spill] sm:$0xff]  ;;  %v8435_v41 = vld [vmem:[#allocation36_spill] sm:$0xff] }
 0xceb   :  { %6356 = vtanh.f32 %v7707_v1 }
 0xcf5   :  { %v6357_v17 = vpop.eup %6356 }
 0xcf6   :  { %v3410_v3 = vmul.f32 %v6357_v17, %v3404_v0  ;;  %v8438_v0 = vld [vmem:[#allocation37_spill] sm:$0xff]  ;;  %v8439_v17 = vld [vmem:[#allocation40_spill] sm:$0xff] }
 0xcf8   :  { %3476 = vmatmul.mubr.f32.vlgmr.msra.gmra.mrb[24].mxu0 %v3410_v3  ;;  %3547 = vmatmul.mubr.f32.vlgmr.msra.gmra.mrb[24].mxu1 %v3410_v3  ;;  %v8440_v3 = vld [vmem:[#allocation39_spill] sm:$0xff] }
 0xcf9   :  { %5852 = vmatpush1.bf16.msra.mxu0 %v6807_v62  ;;  %5884 = vmatpush1.bf16.msra.mxu1 %v6818_v21 }
 0xcfa   :  { %5854 = vmatprep.subr.bf16.mxu0 %v6812_v5  ;;  %5886 = vmatprep.subr.bf16.mxu1 %v8421_v33 }
 0xcfb   :  { %3621 = vmatprep.mubr.f32.mxu0 %v7464_v47  ;;  %3692 = vmatprep.mubr.f32.mxu1 %v7464_v47 }
 0xcfd   :  { %5856 = vmatpush1.bf16.msra.mxu0 %v8422_v38  ;;  %5888 = vmatpush1.bf16.msra.mxu1 %v8423_v31 }
 0xcfe   :  { %5858 = vmatprep.subr.bf16.mxu0 %v8424_v55  ;;  %5890 = vmatprep.subr.bf16.mxu1 %v8425_v28 }
 0xd01   :  { %5860 = vmatpush1.bf16.msra.mxu0 %v8426_v23  ;;  %5892 = vmatpush1.bf16.msra.mxu1 %v8427_v19  ;;  %v3556_v19 = vld [vmem:[#allocation2 + $0xd8] sm:$0xff] }
 0xd02   :  { %5862 = vmatprep.subr.bf16.mxu0 %v8428_v7  ;;  %5894 = vmatprep.subr.bf16.mxu1 %v8429_v11 }
 0xd05   :  { %5864 = vmatpush1.bf16.msra.mxu0 %v8430_v35  ;;  %5896 = vmatpush1.bf16.msra.mxu1 %v8431_v50  ;;  %v8441_v35 = vld [vmem:[#allocation42_spill] sm:$0xff]  ;;  %v8442_v50 = vld [vmem:[#allocation41_spill] sm:$0xff] }
 0xd06   :  { %5866 = vmatprep.subr.bf16.mxu0 %v8432_v24  ;;  %5898 = vmatprep.subr.bf16.mxu1 %v8433_v56  ;;  %v8443_v24 = vld [vmem:[#allocation44_spill] sm:$0xff]  ;;  %v8444_v56 = vld [vmem:[#allocation43_spill] sm:$0xff] }
 0xd09   :  { %5868 = vmatpush1.bf16.msra.mxu0 %v8434_v13  ;;  %5900 = vmatpush1.bf16.msra.mxu1 %v8435_v41  ;;  %v8445_v13 = vld [vmem:[#allocation46_spill] sm:$0xff]  ;;  %v8446_v41 = vld [vmem:[#allocation45_spill] sm:$0xff] }
 0xd0a   :  { %5870 = vmatprep.subr.bf16.mxu0 %v8436_v40  ;;  %5902 = vmatprep.subr.bf16.mxu1 %v8437_v4  ;;  %v8447_v40 = vld [vmem:[#allocation47_spill] sm:$0xff]  ;;  %v8448_v4 = vld [vmem:[#allocation48_spill] sm:$0xff] }
 0xd0d   :  { %5872 = vmatpush1.bf16.msra.mxu0 %v8438_v0  ;;  %5904 = vmatpush1.bf16.msra.mxu1 %v8439_v17  ;;  %v8449_v0 = vld [vmem:[#allocation49_spill] sm:$0xff] }
 0xd0e   :  { %5874 = vmatprep.subr.bf16.mxu0 %v8440_v3  ;;  %5906 = vmatprep.subr.bf16.mxu1 %v8441_v35  ;;  %v8450_v35 = vld [vmem:[#allocation50_spill] sm:$0xff]  ;;  %v8464_v3 = vld [vmem:[#allocation64_spill] sm:$0xff] }
 0xd11   :  { %5876 = vmatpush1.bf16.msra.mxu0 %v8442_v50  ;;  %5908 = vmatpush1.bf16.msra.mxu1 %v8443_v24  ;;  %v8451_v50 = vld [vmem:[#allocation51_spill] sm:$0xff]  ;;  %v8452_v24 = vld [vmem:[#allocation52_spill] sm:$0xff] }
 0xd12   :  { %5878 = vmatprep.subr.bf16.mxu0 %v8444_v56  ;;  %5910 = vmatprep.subr.bf16.mxu1 %v8445_v13  ;;  %v8453_v56 = vld [vmem:[#allocation53_spill] sm:$0xff]  ;;  %v8463_v13 = vld [vmem:[#allocation63_spill] sm:$0xff] }
 0xd15   :  { %5880 = vmatpush1.bf16.msra.mxu0 %v8446_v41  ;;  %5912 = vmatpush1.bf16.msra.mxu1 %v8447_v40  ;;  %v8454_v40 = vld [vmem:[#allocation54_spill] sm:$0xff]  ;;  %v8457_v41 = vld [vmem:[#allocation57_spill] sm:$0xff] }
 0xd16   :  { %5914 = vmatprep.subr.bf16.mxu0 %v8448_v4  ;;  %5946 = vmatprep.subr.bf16.mxu1 %v8449_v0  ;;  %v8455_v4 = vld [vmem:[#allocation55_spill] sm:$0xff]  ;;  %v8456_v0 = vld [vmem:[#allocation56_spill] sm:$0xff] }
 0xd18   :  { %3622 = vmatmul.mubr.f32.vlgmr.msra.gmra.mrb[26].mxu0 %v7660_v53  ;;  %3693 = vmatmul.mubr.f32.vlgmr.msra.gmra.mrb[26].mxu1 %v7660_v53  ;;  %v8458_v53 = vld [vmem:[#allocation58_spill] sm:$0xff] }
 0xd19   :  { %5916 = vmatpush1.bf16.msra.mxu0 %v8450_v35  ;;  %5948 = vmatpush1.bf16.msra.mxu1 %v8451_v50  ;;  %v8459_v35 = vld [vmem:[#allocation59_spill] sm:$0xff]  ;;  %v8460_v50 = vld [vmem:[#allocation60_spill] sm:$0xff] }
 0xd1a   :  { %5918 = vmatprep.subr.bf16.mxu0 %v8452_v24  ;;  %5950 = vmatprep.subr.bf16.mxu1 %v8453_v56  ;;  %v8461_v24 = vld [vmem:[#allocation61_spill] sm:$0xff]  ;;  %v8462_v56 = vld [vmem:[#allocation62_spill] sm:$0xff] }
 0xd1b   :  { %3785 = vmatprep.mubr.f32.mxu0 %v7464_v47  ;;  %3856 = vmatprep.mubr.f32.mxu1 %v7464_v47 }
 0xd1d   :  { %5920 = vmatpush1.bf16.msra.mxu0 %v8454_v40  ;;  %5952 = vmatpush1.bf16.msra.mxu1 %v8455_v4  ;;  %v8465_v40 = vld [vmem:[#allocation65_spill] sm:$0xff]  ;;  %v8466_v4 = vld [vmem:[#allocation66_spill] sm:$0xff] }
 0xd1e   :  { %5922 = vmatprep.subr.bf16.mxu0 %v8456_v0  ;;  %5954 = vmatprep.subr.bf16.mxu1 %v8457_v41  ;;  %v8467_v0 = vld [vmem:[#allocation67_spill] sm:$0xff]  ;;  %v8468_v41 = vld [vmem:[#allocation68_spill] sm:$0xff] }
 0xd21   :  { %5924 = vmatpush1.bf16.msra.mxu0 %v8458_v53  ;;  %5956 = vmatpush1.bf16.msra.mxu1 %v8459_v35  ;;  %v8469_v53 = vld [vmem:[#allocation69_spill] sm:$0xff]  ;;  %v8470_v35 = vld [vmem:[#allocation70_spill] sm:$0xff] }
 0xd22   :  { %5926 = vmatprep.subr.bf16.mxu0 %v8460_v50  ;;  %5958 = vmatprep.subr.bf16.mxu1 %v8461_v24  ;;  %v8471_v50 = vld [vmem:[#allocation71_spill] sm:$0xff]  ;;  %v8472_v24 = vld [vmem:[#allocation72_spill] sm:$0xff] }
 0xd25   :  { %5928 = vmatpush1.bf16.msra.mxu0 %v8462_v56  ;;  %5960 = vmatpush1.bf16.msra.mxu1 %v8463_v13  ;;  %v8473_v56 = vld [vmem:[#allocation73_spill] sm:$0xff]  ;;  %v8474_v13 = vld [vmem:[#allocation74_spill] sm:$0xff] }
 0xd26   :  { %5930 = vmatprep.subr.bf16.mxu0 %v8464_v3  ;;  %5962 = vmatprep.subr.bf16.mxu1 %v8465_v40  ;;  %v8475_v3 = vld [vmem:[#allocation75_spill] sm:$0xff]  ;;  %v8476_v40 = vld [vmem:[#allocation76_spill] sm:$0xff] }
 0xd29   :  { %5932 = vmatpush1.bf16.msra.mxu0 %v8466_v4  ;;  %5964 = vmatpush1.bf16.msra.mxu1 %v8467_v0  ;;  %v8477_v4 = vld [vmem:[#allocation77_spill] sm:$0xff]  ;;  %v8478_v0 = vld [vmem:[#allocation78_spill] sm:$0xff] }
 0xd2a   :  { %5934 = vmatprep.subr.bf16.mxu0 %v8468_v41  ;;  %5966 = vmatprep.subr.bf16.mxu1 %v8469_v53  ;;  %v8479_v41 = vld [vmem:[#allocation79_spill] sm:$0xff]  ;;  %v8480_v53 = vld [vmem:[#allocation17_spill] sm:$0xff] }
 0xd2d   :  { %5936 = vmatpush1.bf16.msra.mxu0 %v8470_v35  ;;  %5968 = vmatpush1.bf16.msra.mxu1 %v8471_v50  ;;  %v8481_v35 = vld [vmem:[#allocation18_spill] sm:$0xff]  ;;  %v3553_v50 = vld [vmem:[#allocation2 + $0xc0] sm:$0xff] }
 0xd2e   :  { %5938 = vmatprep.subr.bf16.mxu0 %v8472_v24  ;;  %5970 = vmatprep.subr.bf16.mxu1 %v8473_v56  ;;  %v3554_v24 = vld [vmem:[#allocation2 + $0xc8] sm:$0xff] }
 0xd31   :  { %5940 = vmatpush1.bf16.msra.mxu0 %v8474_v13  ;;  %5972 = vmatpush1.bf16.msra.mxu1 %v8475_v3 }
 0xd32   :  { %5942 = vmatprep.subr.bf16.mxu0 %v8476_v40  ;;  %5974 = vmatprep.subr.bf16.mxu1 %v8477_v4 }
 0xd35   :  { %5944 = vmatpush1.bf16.msra.mxu0 %v8478_v0  ;;  %5976 = vmatpush1.bf16.msra.mxu1 %v8479_v41  ;;  %v3555_v0 = vld [vmem:[#allocation2 + $0xd0] sm:$0xff] }
 0xd36   :  { %5978 = vmatprep.subr.bf16.mxu0 %v8480_v53  ;;  %6010 = vmatprep.subr.bf16.mxu1 %v8481_v35 }
 0xdeb   :  { %v3623_v17 = vpop.f32.mrb[26].mxu0  ;;  %v3694_v56 = vpop.f32.mrb[26].mxu1 }
 0xdec   :  { %v3699_v11 = vadd.f32 %v3623_v17, %v3553_v50  ;;  %v3625_v13 = vpop.f32.mrb[27].mxu0  ;;  %v3696_v7 = vpop.f32.mrb[27].mxu1  ;;  %v3701_v41 = vadd.f32 %v3694_v56, %v3555_v0  ;;  %v8500_v0 = vld [vmem:[#allocation40_spill] sm:$0xff] }
 0xded   :  { %v3700_v3 = vadd.f32 %v3625_v13, %v3554_v24  ;;  %v3702_v4 = vadd.f32 %v3696_v7, %v3556_v19 }
 0xdee   :  { %v3703_v40 = vmul.f32 0.5, %v3699_v11  ;;  %v3705_v53 = vmul.f32 0.5, %v3701_v41  ;;  %v8497_v41 = vld [vmem:[#allocation35_spill] sm:$0xff] }
 0xdef   :  { %v3704_v23 = vmul.f32 0.5, %v3700_v3  ;;  %v8501_v3 = vld [vmem:[#allocation39_spill] sm:$0xff] }
 0xdf0   :  { %6358 = vtanh.f32 %v3703_v40  ;;  %v8498_v40 = vld [vmem:[#allocation38_spill] sm:$0xff] }
 0xdf1   :  { %6360 = vtanh.f32 %v3704_v23 }
 0xdf2   :  { %6362 = vtanh.f32 %v3702_v4  ;;  %v8499_v4 = vld [vmem:[#allocation37_spill] sm:$0xff] }
 0xdf3   :  { %6364 = vtanh.f32 %v3705_v53  ;;  %v8502_v53 = vld [vmem:[#allocation42_spill] sm:$0xff] }
 0xdfa   :  { %v6359_v28 = vpop.eup %6358 }
 0xdfb   :  { %v3709_v35 = vmul.f32 0.5, %v6359_v28  ;;  %v6361_v55 = vpop.eup %6360  ;;  %v8496_v28 = vld [vmem:[#allocation36_spill] sm:$0xff] }
 0xdfc   :  { %v3710_v38 = vmul.f32 0.5, %v6361_v55  ;;  %v6363_v50 = vpop.eup %6362  ;;  %v8495_v55 = vld [vmem:[#allocation33_spill] sm:$0xff] }
 0xdfd   :  { %v3712_v31 = vadd.f32 0.5, %v3709_v35  ;;  %v6365_v19 = vpop.eup %6364  ;;  %v8503_v35 = vld [vmem:[#allocation41_spill] sm:$0xff] }
 0xdfe   :  { %v3713_v17 = vadd.f32 0.5, %v3710_v38  ;;  %v3711_v23 = vmul.f32 0.5, %v6365_v19  ;;  %v8493_v38 = vld [vmem:[#allocation31_spill] sm:$0xff]  ;;  %v8507_v19 = vld [vmem:[#allocation45_spill] sm:$0xff] }
 0xdff   :  { %v3717_v33 = vmul.f32 %v6363_v50, %v3712_v31  ;;  %v8494_v31 = vld [vmem:[#allocation34_spill] sm:$0xff]  ;;  %v8504_v50 = vld [vmem:[#allocation44_spill] sm:$0xff] }
 0xe00   :  { %v3716_v24 = vmul.f32 %v3713_v17, %v7657_v20  ;;  %v3714_v7 = vadd.f32 0.5, %v3711_v23  ;;  %v8487_v20 = vld [vmem:[#allocation24_spill] sm:$0xff]  ;;  %v8505_v17 = vld [vmem:[#allocation43_spill] sm:$0xff] }
 0xe01   :  { %v8508_v23 = vld [vmem:[#allocation47_spill] sm:$0xff] }
 0xe02   :  { %v7781_v11 = vadd.f32 %v3717_v33, %v3716_v24  ;;  %v8492_v33 = vld [vmem:[#allocation32_spill] sm:$0xff]  ;;  %v8506_v24 = vld [vmem:[#allocation46_spill] sm:$0xff] }
 0xe04   :  { %6366 = vtanh.f32 %v7781_v11 }
 0xe0e   :  { %v6367_v56 = vpop.eup %6366 }
 0xe0f   :  { %v7784_v13 = vmul.f32 %v6367_v56, %v3714_v7  ;;  %v8509_v7 = vld [vmem:[#allocation48_spill] sm:$0xff]  ;;  %v8510_v56 = vld [vmem:[#allocation49_spill] sm:$0xff] }
 0xe11   :  { %3786 = vmatmul.mubr.f32.vlgmr.msra.gmra.mrb[24].mxu0 %v7784_v13  ;;  %3857 = vmatmul.mubr.f32.vlgmr.msra.gmra.mrb[24].mxu1 %v7784_v13 }
 0xe12   :  { %5980 = vmatpush1.bf16.msra.mxu0 %v6706_v8  ;;  %6012 = vmatpush1.bf16.msra.mxu1 %v6716_v18  ;;  %v245_v8 = vld [vmem:[%s244_s9] ss:$8 sm:$0xf] }
 0xe13   :  { %5982 = vmatprep.subr.bf16.mxu0 %v6708_v9  ;;  %6014 = vmatprep.subr.bf16.mxu1 %v6722_v26  ;;  %247 = vst.msk [vmem:[#allocation2 + $0xe0] ss:$8 sm:$0xf] %vm6844_vm0, %v245_v8  ;;  %v349_v9 = vld [vmem:[%s348_s11] ss:$8 sm:$0xf] }
 0xe14   :  { %3949 = vmatprep.mubr.f32.mxu0 %v7464_v47  ;;  %4020 = vmatprep.mubr.f32.mxu1 %v7464_v47  ;;  %351 = vst.msk [vmem:[#allocation2 + $0xe1] ss:$8 sm:$0xf] %vm6844_vm0, %v349_v9  ;;  %v8511_v8 = vld [vmem:[#allocation50_spill] sm:$0xff]  ;;  %v8512_v9 = vld [vmem:[#allocation51_spill] sm:$0xff] }
 0xe16   :  { %5984 = vmatpush1.bf16.msra.mxu0 %v6712_v16  ;;  %6016 = vmatpush1.bf16.msra.mxu1 %v6725_v30 }
 0xe17   :  { %5986 = vmatprep.subr.bf16.mxu0 %v6719_v22  ;;  %6018 = vmatprep.subr.bf16.mxu1 %v6734_v39 }
 0xe1a   :  { %5988 = vmatpush1.bf16.msra.mxu0 %v6728_v32  ;;  %6020 = vmatpush1.bf16.msra.mxu1 %v6737_v44 }
 0xe1b   :  { %5990 = vmatprep.subr.bf16.mxu0 %v6732_v36  ;;  %6022 = vmatprep.subr.bf16.mxu1 %v6743_v48 }
 0xe1e   :  { %5992 = vmatpush1.bf16.msra.mxu0 %v6740_v46  ;;  %6024 = vmatpush1.bf16.msra.mxu1 %v6749_v57 }
 0xe1f   :  { %5994 = vmatprep.subr.bf16.mxu0 %v6746_v51  ;;  %6026 = vmatprep.subr.bf16.mxu1 %v6755_v60 }
 0xe22   :  { %5996 = vmatpush1.bf16.msra.mxu0 %v6752_v58  ;;  %6028 = vmatpush1.bf16.msra.mxu1 %v6761_v6 }
 0xe23   :  { %5998 = vmatprep.subr.bf16.mxu0 %v6758_v63  ;;  %6030 = vmatprep.subr.bf16.mxu1 %v6767_v12 }
 0xe26   :  { %6000 = vmatpush1.bf16.msra.mxu0 %v6764_v10  ;;  %6032 = vmatpush1.bf16.msra.mxu1 %v6775_v25 }
 0xe27   :  { %6002 = vmatprep.subr.bf16.mxu0 %v6770_v15  ;;  %6034 = vmatprep.subr.bf16.mxu1 %v6783_v29 }
 0xe2a   :  { %6004 = vmatpush1.bf16.msra.mxu0 %v6780_v27  ;;  %6036 = vmatpush1.bf16.msra.mxu1 %v6789_v42 }
 0xe2b   :  { %6006 = vmatprep.subr.bf16.mxu0 %v6786_v34  ;;  %6038 = vmatprep.subr.bf16.mxu1 %v6795_v45  ;;  %v8482_v45 = vld [vmem:[#allocation21_spill] sm:$0xff] }
 0xe2e   :  { %6008 = vmatpush1.bf16.msra.mxu0 %v6792_v43  ;;  %6040 = vmatpush1.bf16.msra.mxu1 %v6802_v61  ;;  %v8484_v61 = vld [vmem:[#allocation23_spill] sm:$0xff] }
 0xe2f   :  { %6042 = vmatprep.subr.bf16.mxu0 %v6798_v52  ;;  %6074 = vmatprep.subr.bf16.mxu1 %v8177_v37  ;;  %v8483_v52 = vld [vmem:[#allocation20_spill] sm:$0xff]  ;;  %v8485_v37 = vld [vmem:[#allocation22_spill] sm:$0xff] }
 0xee4   :  { %v3787_v16 = vpop.f32.mrb[24].mxu0  ;;  %v3858_v18 = vpop.f32.mrb[24].mxu1 }
 0xee5   :  { %v3863_v22 = vadd.f32 %v3787_v16, %v8238_v14  ;;  %v3789_v26 = vpop.f32.mrb[25].mxu0  ;;  %v3860_v30 = vpop.f32.mrb[25].mxu1  ;;  %v3865_v46 = vadd.f32 %v3858_v18, %v7080_v2  ;;  %v8513_v16 = vld [vmem:[#allocation52_spill] sm:$0xff]  ;;  %v8514_v18 = vld [vmem:[#allocation53_spill] sm:$0xff] }
 0xee6   :  { %v3864_v32 = vadd.f32 %v3789_v26, %v7073_v59  ;;  %v3866_v44 = vadd.f32 %v3860_v30, %v7076_v54  ;;  %v8516_v26 = vld [vmem:[#allocation55_spill] sm:$0xff]  ;;  %v8517_v30 = vld [vmem:[#allocation56_spill] sm:$0xff] }
 0xee7   :  { %v3867_v36 = vmul.f32 0.5, %v3863_v22  ;;  %v3869_v48 = vmul.f32 0.5, %v3865_v46  ;;  %v8515_v22 = vld [vmem:[#allocation54_spill] sm:$0xff] }
 0xee8   :  { %v3868_v39 = vmul.f32 0.5, %v3864_v32  ;;  %v8518_v32 = vld [vmem:[#allocation57_spill] sm:$0xff]  ;;  %v8523_v46 = vld [vmem:[#allocation62_spill] sm:$0xff] }
 0xee9   :  { %6368 = vtanh.f32 %v3867_v36  ;;  %v8520_v36 = vld [vmem:[#allocation59_spill] sm:$0xff] }
 0xeea   :  { %6370 = vtanh.f32 %v3868_v39  ;;  %v8521_v39 = vld [vmem:[#allocation60_spill] sm:$0xff] }
 0xeeb   :  { %6372 = vtanh.f32 %v3866_v44  ;;  %v8522_v44 = vld [vmem:[#allocation61_spill] sm:$0xff] }
 0xeec   :  { %6374 = vtanh.f32 %v3869_v48  ;;  %v8524_v48 = vld [vmem:[#allocation63_spill] sm:$0xff] }
 0xef3   :  { %v6369_v51 = vpop.eup %6368 }
 0xef4   :  { %v3873_v57 = vmul.f32 0.5, %v6369_v51  ;;  %v6371_v58 = vpop.eup %6370  ;;  %v8525_v51 = vld [vmem:[#allocation64_spill] sm:$0xff] }
 0xef5   :  { %v3874_v63 = vmul.f32 0.5, %v6371_v58  ;;  %v6373_v6 = vpop.eup %6372  ;;  %v8527_v58 = vld [vmem:[#allocation66_spill] sm:$0xff] }
 0xef6   :  { %v3876_v60 = vadd.f32 0.5, %v3873_v57  ;;  %v6375_v27 = vpop.eup %6374  ;;  %v8526_v57 = vld [vmem:[#allocation65_spill] sm:$0xff] }
 0xef7   :  { %v3877_v10 = vadd.f32 0.5, %v3874_v63  ;;  %v3875_v29 = vmul.f32 0.5, %v6375_v27  ;;  %v8529_v63 = vld [vmem:[#allocation68_spill] sm:$0xff]  ;;  %v8534_v27 = vld [vmem:[#allocation73_spill] sm:$0xff] }
 0xef8   :  { %v3881_v12 = vmul.f32 %v6373_v6, %v3876_v60  ;;  %v8528_v60 = vld [vmem:[#allocation67_spill] sm:$0xff]  ;;  %v8530_v6 = vld [vmem:[#allocation69_spill] sm:$0xff] }
 0xef9   :  { %v3880_v15 = vmul.f32 %v3877_v10, %v7707_v1  ;;  %v3878_v34 = vadd.f32 0.5, %v3875_v29  ;;  %v8491_v1 = vld [vmem:[#allocation29_spill] sm:$0xff]  ;;  %v8531_v10 = vld [vmem:[#allocation70_spill] sm:$0xff] }
 0xefa   :  { %v8535_v29 = vld [vmem:[#allocation74_spill] sm:$0xff] }
 0xefb   :  { %v7831_v25 = vadd.f32 %v3881_v12, %v3880_v15  ;;  %v8532_v12 = vld [vmem:[#allocation71_spill] sm:$0xff]  ;;  %v8533_v15 = vld [vmem:[#allocation72_spill] sm:$0xff] }
 0xefd   :  { %6376 = vtanh.f32 %v7831_v25 }
 0xf07   :  { %v6377_v42 = vpop.eup %6376 }
 0xf08   :  { %v3884_v43 = vmul.f32 %v6377_v42, %v3878_v34  ;;  %v8536_v34 = vld [vmem:[#allocation75_spill] sm:$0xff]  ;;  %v8537_v42 = vld [vmem:[#allocation76_spill] sm:$0xff] }
 0xf0a   :  { %3950 = vmatmul.mubr.f32.vlgmr.msra.gmra.mrb[28].mxu0 %v3884_v43  ;;  %4021 = vmatmul.mubr.f32.vlgmr.msra.gmra.mrb[28].mxu1 %v3884_v43  ;;  %v8538_v43 = vld [vmem:[#allocation77_spill] sm:$0xff] }
 0xf0b   :  { %6044 = vmatpush1.bf16.msra.mxu0 %v6807_v62  ;;  %6076 = vmatpush1.bf16.msra.mxu1 %v6818_v21  ;;  %v8488_v62 = vld [vmem:[#allocation28_spill] sm:$0xff]  ;;  %v8489_v21 = vld [vmem:[#allocation27_spill] sm:$0xff] }
 0xf0c   :  { %6046 = vmatprep.subr.bf16.mxu0 %v6812_v5  ;;  %6078 = vmatprep.subr.bf16.mxu1 %v8482_v45  ;;  %v8490_v5 = vld [vmem:[#allocation30_spill] sm:$0xff] }
 0xf0d   :  { %4095 = vmatprep.mubr.f32.mxu0 %v7464_v47  ;;  %4166 = vmatprep.mubr.f32.mxu1 %v7464_v47  ;;  %v8539_v45 = vld [vmem:[#allocation78_spill] sm:$0xff] }
 0xf0f   :  { %6048 = vmatpush1.bf16.msra.mxu0 %v8483_v52  ;;  %6080 = vmatpush1.bf16.msra.mxu1 %v8484_v61  ;;  %v8540_v52 = vld [vmem:[#allocation79_spill] sm:$0xff]  ;;  %v4027_v61 = vld [vmem:[#allocation2 + $0xe0] sm:$0xff] }
 0xf10   :  { %6050 = vmatprep.subr.bf16.mxu0 %v8485_v37  ;;  %6082 = vmatprep.subr.bf16.mxu1 %v8486_v49  ;;  %v4028_v37 = vld [vmem:[#allocation2 + $0xe8] sm:$0xff] }
 0xf13   :  { %6052 = vmatpush1.bf16.msra.mxu0 %v8487_v20  ;;  %6084 = vmatpush1.bf16.msra.mxu1 %v8488_v62 }
 0xf14   :  { %6054 = vmatprep.subr.bf16.mxu0 %v8489_v21  ;;  %6086 = vmatprep.subr.bf16.mxu1 %v8490_v5 }
 0xf17   :  { %6056 = vmatpush1.bf16.msra.mxu0 %v8491_v1  ;;  %6088 = vmatpush1.bf16.msra.mxu1 %v8492_v33  ;;  %v4030_v33 = vld [vmem:[#allocation2 + $0xf8] sm:$0xff] }
 0xf18   :  { %6058 = vmatprep.subr.bf16.mxu0 %v8493_v38  ;;  %6090 = vmatprep.subr.bf16.mxu1 %v8494_v31 }
 0xf1b   :  { %6060 = vmatpush1.bf16.msra.mxu0 %v8495_v55  ;;  %6092 = vmatpush1.bf16.msra.mxu1 %v8496_v28  ;;  %v4029_v28 = vld [vmem:[#allocation2 + $0xf0] sm:$0xff] }
 0xf1c   :  { %6062 = vmatprep.subr.bf16.mxu0 %v8497_v41  ;;  %6094 = vmatprep.subr.bf16.mxu1 %v8498_v40 }
 0xf1f   :  { %6064 = vmatpush1.bf16.msra.mxu0 %v8499_v4  ;;  %6096 = vmatpush1.bf16.msra.mxu1 %v8500_v0 }
 0xf20   :  { %6066 = vmatprep.subr.bf16.mxu0 %v8501_v3  ;;  %6098 = vmatprep.subr.bf16.mxu1 %v8502_v53 }
 0xf23   :  { %6068 = vmatpush1.bf16.msra.mxu0 %v8503_v35  ;;  %6100 = vmatpush1.bf16.msra.mxu1 %v8504_v50 }
 0xf24   :  { %6070 = vmatprep.subr.bf16.mxu0 %v8505_v17  ;;  %6102 = vmatprep.subr.bf16.mxu1 %v8506_v24 }
 0xf27   :  { %6072 = vmatpush1.bf16.msra.mxu0 %v8507_v19  ;;  %6104 = vmatpush1.bf16.msra.mxu1 %v8508_v23 }
 0xf28   :  { %6106 = vmatprep.subr.bf16.mxu0 %v8509_v7  ;;  %6138 = vmatprep.subr.bf16.mxu1 %v8510_v56 }
 0xf2a   :  { %4096 = vmatmul.mubr.f32.vlgmr.msra.gmra.mrb[30].mxu0 %v7784_v13  ;;  %4167 = vmatmul.mubr.f32.vlgmr.msra.gmra.mrb[30].mxu1 %v7784_v13  ;;  %v8519_v13 = vld [vmem:[#allocation58_spill] sm:$0xff] }
 0xf2b   :  { %6108 = vmatpush1.bf16.msra.mxu0 %v8511_v8  ;;  %6140 = vmatpush1.bf16.msra.mxu1 %v8512_v9 }
 0xf2c   :  { %6110 = vmatprep.subr.bf16.mxu0 %v8513_v16  ;;  %6142 = vmatprep.subr.bf16.mxu1 %v8514_v18  ;;  %v4360_v18 = vld [vmem:[#allocation12] sm:$0xff] }
 0xf2d   :  { %4259 = vmatprep.mubr.f32.mxu0 %v7464_v47  ;;  %4330 = vmatprep.mubr.f32.mxu1 %v7464_v47 }
 0xf2f   :  { %6112 = vmatpush1.bf16.msra.mxu0 %v8515_v22  ;;  %6144 = vmatpush1.bf16.msra.mxu1 %v8516_v26  ;;  %v4361_v22 = vld [vmem:[#allocation12 + $0x8] sm:$0xff] }
 0xf30   :  { %6114 = vmatprep.subr.bf16.mxu0 %v8517_v30  ;;  %6146 = vmatprep.subr.bf16.mxu1 %v8518_v32  ;;  %v6170_v26 = vpack.c.bf16 %v4361_v22, %v4360_v18  ;;  %v6541_v30 = vmov 0.0|0.0   ;;  %v4362_v32 = vld [vmem:[#allocation12 + $0x10] sm:$0xff] }
 0xf33   :  { %6116 = vmatpush1.bf16.msra.mxu0 %v8519_v13  ;;  %6148 = vmatpush1.bf16.msra.mxu1 %v8520_v36  ;;  %v4363_v13 = vld [vmem:[#allocation12 + $0x18] sm:$0xff] }
 0xf34   :  { %6118 = vmatprep.subr.bf16.mxu0 %v8521_v39  ;;  %6150 = vmatprep.subr.bf16.mxu1 %v8522_v44  ;;  %v6173_v36 = vpack.c.bf16 %v4363_v13, %v4362_v32  ;;  %v4365_v39 = vld [vmem:[#allocation12 + $0x28] sm:$0xff] }
 0xf37   :  { %6120 = vmatpush1.bf16.msra.mxu0 %v8523_v46  ;;  %6152 = vmatpush1.bf16.msra.mxu1 %v8524_v48  ;;  %v4366_v46 = vld [vmem:[#allocation12 + $0x30] sm:$0xff]  ;;  %v4367_v48 = vld [vmem:[#allocation12 + $0x38] sm:$0xff] }
 0xf38   :  { %6122 = vmatprep.subr.bf16.mxu0 %v8525_v51  ;;  %6154 = vmatprep.subr.bf16.mxu1 %v8526_v57  ;;  %v6179_v51 = vpack.c.bf16 %v4367_v48, %v4366_v46  ;;  %v4368_v57 = vld [vmem:[#allocation12 + $0x40] sm:$0xff] }
 0xf3b   :  { %6124 = vmatpush1.bf16.msra.mxu0 %v8527_v58  ;;  %6156 = vmatpush1.bf16.msra.mxu1 %v8528_v60  ;;  %v4369_v58 = vld [vmem:[#allocation12 + $0x48] sm:$0xff] }
 0xf3c   :  { %6126 = vmatprep.subr.bf16.mxu0 %v8529_v63  ;;  %6158 = vmatprep.subr.bf16.mxu1 %v8530_v6  ;;  %v6182_v60 = vpack.c.bf16 %v4369_v58, %v4368_v57  ;;  %v4370_v63 = vld [vmem:[#allocation12 + $0x50] sm:$0xff]  ;;  %v4371_v6 = vld [vmem:[#allocation12 + $0x58] sm:$0xff] }
 0xf3f   :  { %6128 = vmatpush1.bf16.msra.mxu0 %v8531_v10  ;;  %6160 = vmatpush1.bf16.msra.mxu1 %v8532_v12  ;;  %v6185_v10 = vpack.c.bf16 %v4371_v6, %v4370_v63  ;;  %v4372_v12 = vld [vmem:[#allocation12 + $0x60] sm:$0xff] }
 0xf40   :  { %6130 = vmatprep.subr.bf16.mxu0 %v8533_v15  ;;  %6162 = vmatprep.subr.bf16.mxu1 %v8534_v27  ;;  %v4373_v15 = vld [vmem:[#allocation12 + $0x68] sm:$0xff] }
 0xf41   :  { %v6188_v27 = vpack.c.bf16 %v4373_v15, %v4372_v12 }
 0xf43   :  { %6132 = vmatpush1.bf16.msra.mxu0 %v8535_v29  ;;  %6164 = vmatpush1.bf16.msra.mxu1 %v8536_v34  ;;  %v4374_v29 = vld [vmem:[#allocation12 + $0x70] sm:$0xff]  ;;  %v4375_v34 = vld [vmem:[#allocation12 + $0x78] sm:$0xff] }
 0xf44   :  { %6134 = vmatprep.subr.bf16.mxu0 %v8537_v42  ;;  %6166 = vmatprep.subr.bf16.mxu1 %v8538_v43  ;;  %v6191_v42 = vpack.c.bf16 %v4375_v34, %v4374_v29 }
 0xf47   :  { %6136 = vmatpush1.bf16.msra.mxu0 %v8539_v45  ;;  %6168 = vmatpush1.bf16.msra.mxu1 %v8540_v52 }
 0xf48   :  { %6169 = vmatprep.subr.bf16.mxu0 %v6541_v30 }
 0xffd   :  { %v4097_v49 = vpop.f32.mrb[30].mxu0  ;;  %v4168_v20 = vpop.f32.mrb[30].mxu1 }
 0xffe   :  { %v4173_v62 = vadd.f32 %v4097_v49, %v4027_v61  ;;  %v4099_v21 = vpop.f32.mrb[31].mxu0  ;;  %v4170_v5 = vpop.f32.mrb[31].mxu1  ;;  %v4175_v41 = vadd.f32 %v4168_v20, %v4029_v28 }
 0xfff   :  { %v4174_v1 = vadd.f32 %v4099_v21, %v4028_v37  ;;  %v4176_v55 = vadd.f32 %v4170_v5, %v4030_v33 }
0x1000   :  { %v4177_v38 = vmul.f32 0.5, %v4173_v62  ;;  %v4179_v40 = vmul.f32 0.5, %v4175_v41 }
0x1001   :  { %v4178_v31 = vmul.f32 0.5, %v4174_v1 }
0x1002   :  { %6378 = vtanh.f32 %v4177_v38 }
0x1003   :  { %6380 = vtanh.f32 %v4178_v31 }
0x1004   :  { %6382 = vtanh.f32 %v4176_v55 }
0x1005   :  { %6384 = vtanh.f32 %v4179_v40 }
0x100c   :  { %v6379_v4 = vpop.eup %6378 }
0x100d   :  { %v4183_v0 = vmul.f32 0.5, %v6379_v4  ;;  %v6381_v3 = vpop.eup %6380 }
0x100e   :  { %v4184_v35 = vmul.f32 0.5, %v6381_v3  ;;  %v6383_v50 = vpop.eup %6382 }
0x100f   :  { %v4186_v53 = vadd.f32 0.5, %v4183_v0  ;;  %v6385_v7 = vpop.eup %6384 }
0x1010   :  { %v4187_v17 = vadd.f32 0.5, %v4184_v35  ;;  %v4185_v56 = vmul.f32 0.5, %v6385_v7  ;;  %v4564_v35 = vld [vmem:[%s7922_s7] ss:$0 sm:$0xff] }
0x1011   :  { %v4191_v24 = vmul.f32 %v6383_v50, %v4186_v53 }
0x1012   :  { %v4190_v19 = vmul.f32 %v4187_v17, %v7781_v11  ;;  %v4188_v8 = vadd.f32 0.5, %v4185_v56  ;;  %v4364_v11 = vld [vmem:[#allocation12 + $0x20] sm:$0xff] }
0x1013   :  { %v6176_v44 = vpack.c.bf16 %v4365_v39, %v4364_v11 }
0x1014   :  { %v4192_v23 = vadd.f32 %v4191_v24, %v4190_v19 }
0x1016   :  { %6386 = vtanh.f32 %v4192_v23 }
0x1020   :  { %v6387_v9 = vpop.eup %6386 }
0x1021   :  { %v4194_v16 = vmul.f32 %v6387_v9, %v4188_v8 }
0x1023   :  { %4260 = vmatmul.mubr.f32.vlgmr.msra.gmra.mrb[28].mxu0 %v4194_v16  ;;  %4331 = vmatmul.mubr.f32.vlgmr.msra.gmra.mrb[28].mxu1 %v4194_v16 }
0x1024   :  { %6171 = vmatpush3.bf16.msra.mxu0 %v6170_v26  ;;  %4630 = vmatprep.mubr.msk.f32.mxu0 %vm6542_vm1, %v7464_v47 }
0x1025   :  { %6172 = vmatprep.subr.bf16.mxu0 %v6541_v30 }
0x1028   :  { %6174 = vmatpush3.bf16.msra.mxu0 %v6173_v36 }
0x1029   :  { %6175 = vmatprep.subr.bf16.mxu0 %v6541_v30 }
0x102c   :  { %6177 = vmatpush3.bf16.msra.mxu0 %v6176_v44 }
0x102d   :  { %6178 = vmatprep.subr.bf16.mxu0 %v6541_v30 }
0x1030   :  { %6180 = vmatpush3.bf16.msra.mxu0 %v6179_v51 }
0x1031   :  { %6181 = vmatprep.subr.bf16.mxu0 %v6541_v30 }
0x1034   :  { %6183 = vmatpush3.bf16.msra.mxu0 %v6182_v60 }
0x1035   :  { %6184 = vmatprep.subr.bf16.mxu0 %v6541_v30 }
0x1038   :  { %6186 = vmatpush3.bf16.msra.mxu0 %v6185_v10 }
0x1039   :  { %6187 = vmatprep.subr.bf16.mxu0 %v6541_v30 }
0x103c   :  { %6189 = vmatpush3.bf16.msra.mxu0 %v6188_v27 }
0x103d   :  { %6190 = vmatprep.subr.bf16.mxu0 %v6541_v30 }
0x1040   :  { %6192 = vmatpush3.bf16.msra.mxu0 %v6191_v42 }
0x10f6   :  { %v4261_v43 = vpop.f32.mrb[28].mxu0  ;;  %v4332_v45 = vpop.f32.mrb[28].mxu1 }
0x10f7   :  { %v4337_v52 = vadd.f32 %v4261_v43, %v8238_v14  ;;  %v4263_v61 = vpop.f32.mrb[29].mxu0  ;;  %v4334_v37 = vpop.f32.mrb[29].mxu1  ;;  %v4339_v21 = vadd.f32 %v4332_v45, %v7080_v2 }
0x10f8   :  { %v4338_v49 = vadd.f32 %v4263_v61, %v7073_v59  ;;  %v4340_v47 = vadd.f32 %v4334_v37, %v7076_v54 }
0x10f9   :  { %v4341_v20 = vmul.f32 0.5, %v4337_v52  ;;  %v4343_v5 = vmul.f32 0.5, %v4339_v21 }
0x10fa   :  { %v4342_v62 = vmul.f32 0.5, %v4338_v49 }
0x10fb   :  { %6388 = vtanh.f32 %v4341_v20 }
0x10fc   :  { %6390 = vtanh.f32 %v4342_v62 }
0x10fd   :  { %6392 = vtanh.f32 %v4340_v47 }
0x10fe   :  { %6394 = vtanh.f32 %v4343_v5 }
0x1105   :  { %v6389_v1 = vpop.eup %6388 }
0x1106   :  { %v4347_v33 = vmul.f32 0.5, %v6389_v1  ;;  %v6391_v38 = vpop.eup %6390 }
0x1107   :  { %v4348_v14 = vmul.f32 0.5, %v6391_v38  ;;  %v6393_v55 = vpop.eup %6392 }
0x1108   :  { %v4350_v31 = vadd.f32 0.5, %v4347_v33  ;;  %v6395_v4 = vpop.eup %6394 }
0x1109   :  { %v4351_v28 = vadd.f32 0.5, %v4348_v14  ;;  %v4349_v54 = vmul.f32 0.5, %v6395_v4 }
0x110a   :  { %v4355_v41 = vmul.f32 %v6393_v55, %v4350_v31 }
0x110b   :  { %v4354_v59 = vmul.f32 %v4351_v28, %v7831_v25  ;;  %v4352_v0 = vadd.f32 0.5, %v4349_v54 }
0x110d   :  { %v4356_v40 = vadd.f32 %v4355_v41, %v4354_v59 }
0x110f   :  { %6396 = vtanh.f32 %v4356_v40 }
0x1119   :  { %v6397_v3 = vpop.eup %6396 }
0x111a   :  { %v4358_v53 = vmul.f32 %v6397_v3, %v4352_v0 }
0x111c   :  { %v4359_v2 = vmax.f32 %v4358_v53, 0.0 }
0x111e   :  { %4631 = vmatmul.mubr.f32.vlgmr.msra.gmra.mrb[32].mxu0 %v4359_v2 }
0x11f1   :  { %v4449_v50 = vpop.f32.mrb[32].mxu0 }
0x11f2   :  { %v4450_v17 = vadd.f32 %v4564_v35, %v4449_v50  ;;  %v4632_v24 = vpop.f32.mrb[33].mxu0 }
0x11f4   :  { %4453 = vst [vmem:[%s7923_s8] sm:$0xff] %v4450_v17 }
0x11f5   :  { %4458 = vsyncpa [#allocation4], 1 }
0x11f6   :  { %4459 = vsyncpa [#allocation8], 1 }
0x11f7   :  { %4460 = vsyncpa [#allocation11], 1 }
0x11f8   :  { %4461 = vsyncpa [#allocation5], 1 }

</bundles_post_ra>
